<compile_context>
chip_gen: v5e
topology: v5e:2x2
jax: 0.10.0
libtpu: 0.0.40
codegen_flags: <defaults>
</compile_context>

<pallas_src>
import functools

import numpy as np
import jax
import jax.numpy as jnp
from jax.experimental import pallas as pl
from jax.experimental.pallas import tpu as pltpu

_EPS = 1e-5


def res2net_kernel(x_ref, w1_ref, g1_ref, b1_ref, w2_ref, g2_ref, b2_ref,
                   w3_ref, g3_ref, b3_ref, o_ref, col_ref, y_ref,
                   *, n, h, w_sp, scales):
    """Whole bottleneck block for one (small) batch; everything resident in VMEM."""
    nhw = n * h * w_sp
    cb = w1_ref.shape[1]           # bottleneck planes
    ws = cb // scales              # per-scale width
    ktap = 9 * ws                  # im2col contraction depth per scale

    def bn(t, gamma, beta, relu=True):
        # training-mode BatchNorm2d: stats over all rows (= N*H*W) per channel,
        # folded into a single scale/shift (mul + add).
        mean = jnp.mean(t, axis=0, keepdims=True)
        var = jnp.mean(jnp.square(t - mean), axis=0, keepdims=True)   # two-pass: safe
        scale = gamma * jax.lax.rsqrt(var + _EPS)
        shift = beta - mean * scale
        r = t * scale + shift
        return jnp.maximum(r, 0.0) if relu else r

    # conv1 (1x1) + bn1 + relu  — bf16 MXU matmul, f32 accumulate
    t = jnp.dot(x_ref[...].astype(jnp.bfloat16), w1_ref[...],
                preferred_element_type=jnp.float32)
    t = bn(t, g1_ref[...], b1_ref[...])                               # [nhw, cb]

    # zero the im2col scratch ONCE: halo / never-written boundary cells stay zero
    # for every scale, so no per-scale padding or concatenation is needed.
    col_ref[...] = jnp.zeros_like(col_ref)

    # scale 0 passes through unchanged into the packed output slab
    y_ref[:, 0:ws] = t[:, 0:ws]

    prev = None
    for s in range(1, scales):
        inp = t[:, s * ws:(s + 1) * ws]
        if s > 1:
            inp = inp + prev
        inp4 = inp.reshape(n, h, w_sp, ws)                            # layout-preserving

        # Scatter the 9 shifted taps of the 3x3 conv (padding=1) into the im2col
        # scratch: tap k=(dyi*3+dxi) for spatial offset (dyi-1, dxi-1) lands at
        # lanes [k*ws, (k+1)*ws) with the destination window shifted so that the
        # interior read below sees inp[y+dy, x+dx] (zero outside the image).
        for dyi in range(3):
            y0 = 2 - dyi
            for dxi in range(3):
                x0 = 2 - dxi
                k = dyi * 3 + dxi
                col_ref[:, y0:y0 + h, x0:x0 + w_sp, k * ws:(k + 1) * ws] = inp4

        # single im2col matmul per scale: [nhw, 9*ws] x [9*ws, ws]
        col = col_ref[:, 1:1 + h, 1:1 + w_sp, :].reshape(nhw, ktap)
        acc = jnp.dot(col.astype(jnp.bfloat16), w2_ref[s - 1],
                      preferred_element_type=jnp.float32)
        prev = bn(acc, g2_ref[s - 1], b2_ref[s - 1])
        y_ref[:, s * ws:(s + 1) * ws] = prev

    # conv3 (1x1) + bn3 on the packed slab, then residual add + relu
    out = jnp.dot(y_ref[...].astype(jnp.bfloat16), w3_ref[...],
                  preferred_element_type=jnp.float32)
    out = bn(out, g3_ref[...], b3_ref[...], relu=False)
    o_ref[...] = jnp.maximum(out + x_ref[...], 0.0)


def res2net_bottleneck(x_nchw, w1, g1, b1, w2, g2, b2, w3, g3, b3, *, scales=4):
    N, Cin, H, W = x_nchw.shape
    cb = w1.shape[1]
    ws = cb // scales
    cout = w3.shape[1]
    nhw = N * H * W

    # glue: NCHW -> channels-last, flattened spatial
    x2d = jnp.transpose(x_nchw, (0, 2, 3, 1)).reshape(nhw, Cin)

    # bf16 weights for the MXU; im2col weight layout [scales-1, 9*ws, ws]
    # (row index = (dy*3+dx)*ws + ci, matching the tap lane order in the kernel).
    w1b = w1.astype(jnp.bfloat16)
    w2c = w2.reshape(scales - 1, 9 * ws, ws).astype(jnp.bfloat16)
    w3b = w3.astype(jnp.bfloat16)
    g2r = g2.reshape(scales - 1, 1, ws)
    b2r = b2.reshape(scales - 1, 1, ws)

    kernel = functools.partial(res2net_kernel, n=N, h=H, w_sp=W, scales=scales)
    vmem = pl.BlockSpec(memory_space=pltpu.MemorySpace.VMEM)

    out2d = pl.pallas_call(
        kernel,
        out_shape=jax.ShapeDtypeStruct((nhw, cout), jnp.float32),
        in_specs=[vmem] * 10,
        out_specs=vmem,
        scratch_shapes=[
            pltpu.VMEM((N, H + 2, W + 2, 9 * ws), jnp.float32),  # im2col + zero halo
            pltpu.VMEM((nhw, cb), jnp.float32),                  # packed ys slab
        ],
        compiler_params=pltpu.CompilerParams(vmem_limit_bytes=32 * 1024 * 1024),
    )(x2d, w1b, g1, b1, w2c, g2r, b2r, w3b, g3, b3)

    return jnp.transpose(out2d.reshape(N, H, W, cout), (0, 3, 1, 2))


def reference_nchw(x_nchw, w1, g1, b1, w2, g2, b2, w3, g3, b3, *, scales=4):
    """Pure-JAX f32 ground truth mirroring PyTorch semantics (training-mode BN)."""
    prec = jax.lax.Precision.HIGHEST
    x = jnp.transpose(x_nchw, (0, 2, 3, 1))  # NHWC

    def bn(t, gamma, beta):
        mean = jnp.mean(t, axis=(0, 1, 2), keepdims=True)
        var = jnp.mean(jnp.square(t - mean), axis=(0, 1, 2), keepdims=True)
        return (t - mean) / jnp.sqrt(var + _EPS) * gamma + beta

    def conv1x1(a, wio):
        return jnp.einsum('nhwi,io->nhwo', a, wio, precision=prec)

    def conv3x3(a, wkk):
        Hh, Ww = a.shape[1], a.shape[2]
        ap = jnp.pad(a, ((0, 0), (1, 1), (1, 1), (0, 0)))
        acc = jnp.zeros(a.shape[:3] + (wkk.shape[-1],), jnp.float32)
        for dy in range(3):
            for dx in range(3):
                acc = acc + jnp.einsum('nhwi,io->nhwo',
                                       ap[:, dy:dy + Hh, dx:dx + Ww, :],
                                       wkk[dy, dx], precision=prec)
        return acc

    t = jax.nn.relu(bn(conv1x1(x, w1), g1, b1))
    ws = t.shape[-1] // scales
    ys = [t[..., 0:ws]]
    for s in range(1, scales):
        inp = t[..., s * ws:(s + 1) * ws]
        if s > 1:
            inp = inp + ys[-1]
        ys.append(jax.nn.relu(bn(conv3x3(inp, w2[s - 1]), g2[s - 1], b2[s - 1])))
    out = jnp.concatenate(ys, axis=-1)
    out = bn(conv1x1(out, w3), g3, b3)
    out = jax.nn.relu(out + x)
    return jnp.transpose(out, (0, 3, 1, 2))


if __name__ == "__main__":
    planes, scales, expansion = 16, 4, 4
    inplanes = planes * expansion          # 64 -> residual add works w/o downsample
    cb = 1 * planes                        # groups=1 -> bottleneck_planes = 16
    ws = cb // scales                      # 4 channels per scale
    cout = planes * expansion              # 64
    N, H, W = 2, 8, 8

    key = jax.random.PRNGKey(0)
    ks = jax.random.split(key, 10)
    x = jax.random.normal(ks[0], (N, inplanes, H, W), jnp.float32)

    # deterministic synthetic parameters (conv weights stored as [ci, co])
    w1 = 0.05 * jax.random.normal(ks[1], (inplanes, cb), jnp.float32)
    g1 = 1.0 + 0.1 * jax.random.normal(ks[2], (1, cb), jnp.float32)
    b1 = 0.1 * jax.random.normal(ks[3], (1, cb), jnp.float32)
    w2 = 0.1 * jax.random.normal(ks[4], (scales - 1, 3, 3, ws, ws), jnp.float32)
    g2 = 1.0 + 0.1 * jax.random.normal(ks[5], (scales - 1, ws), jnp.float32)
    b2 = 0.1 * jax.random.normal(ks[6], (scales - 1, ws), jnp.float32)
    w3 = 0.05 * jax.random.normal(ks[7], (cb, cout), jnp.float32)
    g3 = 1.0 + 0.1 * jax.random.normal(ks[8], (1, cout), jnp.float32)
    b3 = 0.1 * jax.random.normal(ks[9], (1, cout), jnp.float32)

    out = res2net_bottleneck(x, w1, g1, b1, w2, g2, b2, w3, g3, b3, scales=scales)
    out = jax.block_until_ready(out)

    ref = reference_nchw(x, w1, g1, b1, w2, g2, b2, w3, g3, b3, scales=scales)
    # kernel uses bf16 MXU matmuls (per perf guidance); tolerance reflects bf16
    # precision vs. the f32/HIGHEST ground-truth reference across 3 matmul stages.
    np.testing.assert_allclose(np.asarray(out), np.asarray(ref), rtol=2e-2, atol=5e-2)
    print("KERNEL_OK")
</pallas_src>

<mosaic_0001>
module attributes {stable_mosaic.version = 11 : i64} {
  func.func @res2net_kernel(%arg0: memref<128x64xf32, #tpu.memory_space<vmem>>, %arg1: memref<64x16xbf16, #tpu.memory_space<vmem>>, %arg2: memref<1x16xf32, #tpu.memory_space<vmem>>, %arg3: memref<1x16xf32, #tpu.memory_space<vmem>>, %arg4: memref<3x36x4xbf16, #tpu.memory_space<vmem>>, %arg5: memref<3x1x4xf32, #tpu.memory_space<vmem>>, %arg6: memref<3x1x4xf32, #tpu.memory_space<vmem>>, %arg7: memref<16x64xbf16, #tpu.memory_space<vmem>>, %arg8: memref<1x64xf32, #tpu.memory_space<vmem>>, %arg9: memref<1x64xf32, #tpu.memory_space<vmem>>, %arg10: memref<128x64xf32, #tpu.memory_space<vmem>>, %arg11: memref<2x10x10x36xf32, #tpu.memory_space<vmem>>, %arg12: memref<128x16xf32, #tpu.memory_space<vmem>>) attributes {dimension_semantics = [], scalar_prefetch = 0 : i64, scratch_operands = 2 : i64, tpu.core_type = #tpu.core_type<tc>} {
    %c0 = arith.constant 0 : index
    %c0_0 = arith.constant 0 : index
    %0 = vector.load %arg0[%c0, %c0_0] : memref<128x64xf32, #tpu.memory_space<vmem>>, vector<128x64xf32>
    %1 = arith.truncf %0 : vector<128x64xf32> to vector<128x64xbf16>
    %c0_1 = arith.constant 0 : index
    %c0_2 = arith.constant 0 : index
    %2 = vector.load %arg1[%c0_1, %c0_2] : memref<64x16xbf16, #tpu.memory_space<vmem>>, vector<64x16xbf16>
    %cst = arith.constant dense<0.000000e+00> : vector<128x16xf32>
    %3 = tpu.matmul %1, %2, %cst {dimension_numbers = #tpu.dot_dimension_numbers<[1], [0], [0], [1], [0, 0, 1, 1], [], []>} : vector<128x64xbf16>, vector<64x16xbf16>, vector<128x16xf32> -> vector<128x16xf32>
    %c0_3 = arith.constant 0 : index
    %c0_4 = arith.constant 0 : index
    %4 = vector.load %arg2[%c0_3, %c0_4] : memref<1x16xf32, #tpu.memory_space<vmem>>, vector<1x16xf32>
    %c0_5 = arith.constant 0 : index
    %c0_6 = arith.constant 0 : index
    %5 = vector.load %arg3[%c0_5, %c0_6] : memref<1x16xf32, #tpu.memory_space<vmem>>, vector<1x16xf32>
    %cst_7 = arith.constant dense<0.000000e+00> : vector<16xf32>
    %6 = vector.multi_reduction <add>, %3, %cst_7 [0] : vector<128x16xf32> to vector<16xf32>
    %7 = vector.shape_cast %6 : vector<16xf32> to vector<1x16xf32>
    %cst_8 = arith.constant 1.280000e+02 : f32
    %8 = vector.broadcast %cst_8 : f32 to vector<1x16xf32>
    %9 = arith.divf %7, %8 : vector<1x16xf32>
    %10 = vector.broadcast %9 : vector<1x16xf32> to vector<128x16xf32>
    %11 = arith.subf %3, %10 : vector<128x16xf32>
    %12 = arith.mulf %11, %11 : vector<128x16xf32>
    %cst_9 = arith.constant dense<0.000000e+00> : vector<16xf32>
    %13 = vector.multi_reduction <add>, %12, %cst_9 [0] : vector<128x16xf32> to vector<16xf32>
    %14 = vector.shape_cast %13 : vector<16xf32> to vector<1x16xf32>
    %cst_10 = arith.constant 1.280000e+02 : f32
    %15 = vector.broadcast %cst_10 : f32 to vector<1x16xf32>
    %16 = arith.divf %14, %15 : vector<1x16xf32>
    %cst_11 = arith.constant 9.99999974E-6 : f32
    %17 = vector.broadcast %cst_11 : f32 to vector<1x16xf32>
    %18 = arith.addf %16, %17 : vector<1x16xf32>
    %19 = math.rsqrt %18 : vector<1x16xf32>
    %20 = arith.mulf %4, %19 : vector<1x16xf32>
    %21 = arith.mulf %9, %20 : vector<1x16xf32>
    %22 = arith.subf %5, %21 : vector<1x16xf32>
    %23 = vector.broadcast %20 : vector<1x16xf32> to vector<128x16xf32>
    %24 = arith.mulf %3, %23 : vector<128x16xf32>
    %25 = vector.broadcast %22 : vector<1x16xf32> to vector<128x16xf32>
    %26 = arith.addf %24, %25 : vector<128x16xf32>
    %cst_12 = arith.constant 0.000000e+00 : f32
    %27 = vector.broadcast %cst_12 : f32 to vector<128x16xf32>
    %28 = arith.maximumf %26, %27 : vector<128x16xf32>
    %cst_13 = arith.constant 0.000000e+00 : f32
    %29 = vector.broadcast %cst_13 : f32 to vector<2x10x10x36xf32>
    %c0_14 = arith.constant 0 : index
    %c0_15 = arith.constant 0 : index
    %c0_16 = arith.constant 0 : index
    %c0_17 = arith.constant 0 : index
    %30 = vector.load %arg11[%c0_14, %c0_15, %c0_16, %c0_17] : memref<2x10x10x36xf32, #tpu.memory_space<vmem>>, vector<2x10x10x36xf32>
    tpu.vector_store %arg11[%c0_14, %c0_15, %c0_16, %c0_17], %29 {strides = array<i32>} : memref<2x10x10x36xf32, #tpu.memory_space<vmem>>, vector<2x10x10x36xf32>,
    %31 = vector.extract_strided_slice %28 {offsets = [0, 0], sizes = [128, 4], strides = [1, 1]} : vector<128x16xf32> to vector<128x4xf32>
    %c0_18 = arith.constant 0 : index
    %c0_19 = arith.constant 0 : index
    %32 = vector.load %arg12[%c0_18, %c0_19] : memref<128x16xf32, #tpu.memory_space<vmem>>, vector<128x4xf32>
    tpu.vector_store %arg12[%c0_18, %c0_19], %31 {strides = array<i32>} : memref<128x16xf32, #tpu.memory_space<vmem>>, vector<128x4xf32>,
    %33 = vector.extract_strided_slice %28 {offsets = [0, 4], sizes = [128, 4], strides = [1, 1]} : vector<128x16xf32> to vector<128x4xf32>
    %34 = vector.shape_cast %33 : vector<128x4xf32> to vector<2x8x8x4xf32>
    %c0_20 = arith.constant 0 : index
    %c2 = arith.constant 2 : index
    %c2_21 = arith.constant 2 : index
    %c0_22 = arith.constant 0 : index
    %35 = vector.load %arg11[%c0_20, %c2, %c2_21, %c0_22] : memref<2x10x10x36xf32, #tpu.memory_space<vmem>>, vector<2x8x8x4xf32>
    tpu.vector_store %arg11[%c0_20, %c2, %c2_21, %c0_22], %34 {strides = array<i32>} : memref<2x10x10x36xf32, #tpu.memory_space<vmem>>, vector<2x8x8x4xf32>,
    %c0_23 = arith.constant 0 : index
    %c2_24 = arith.constant 2 : index
    %c1 = arith.constant 1 : index
    %c4 = arith.constant 4 : index
    %36 = vector.load %arg11[%c0_23, %c2_24, %c1, %c4] : memref<2x10x10x36xf32, #tpu.memory_space<vmem>>, vector<2x8x8x4xf32>
    tpu.vector_store %arg11[%c0_23, %c2_24, %c1, %c4], %34 {strides = array<i32>} : memref<2x10x10x36xf32, #tpu.memory_space<vmem>>, vector<2x8x8x4xf32>,
    %c0_25 = arith.constant 0 : index
    %c2_26 = arith.constant 2 : index
    %c0_27 = arith.constant 0 : index
    %c8 = arith.constant 8 : index
    %37 = vector.load %arg11[%c0_25, %c2_26, %c0_27, %c8] : memref<2x10x10x36xf32, #tpu.memory_space<vmem>>, vector<2x8x8x4xf32>
    tpu.vector_store %arg11[%c0_25, %c2_26, %c0_27, %c8], %34 {strides = array<i32>} : memref<2x10x10x36xf32, #tpu.memory_space<vmem>>, vector<2x8x8x4xf32>,
    %c0_28 = arith.constant 0 : index
    %c1_29 = arith.constant 1 : index
    %c2_30 = arith.constant 2 : index
    %c12 = arith.constant 12 : index
    %38 = vector.load %arg11[%c0_28, %c1_29, %c2_30, %c12] : memref<2x10x10x36xf32, #tpu.memory_space<vmem>>, vector<2x8x8x4xf32>
    tpu.vector_store %arg11[%c0_28, %c1_29, %c2_30, %c12], %34 {strides = array<i32>} : memref<2x10x10x36xf32, #tpu.memory_space<vmem>>, vector<2x8x8x4xf32>,
    %c0_31 = arith.constant 0 : index
    %c1_32 = arith.constant 1 : index
    %c1_33 = arith.constant 1 : index
    %c16 = arith.constant 16 : index
    %39 = vector.load %arg11[%c0_31, %c1_32, %c1_33, %c16] : memref<2x10x10x36xf32, #tpu.memory_space<vmem>>, vector<2x8x8x4xf32>
    tpu.vector_store %arg11[%c0_31, %c1_32, %c1_33, %c16], %34 {strides = array<i32>} : memref<2x10x10x36xf32, #tpu.memory_space<vmem>>, vector<2x8x8x4xf32>,
    %c0_34 = arith.constant 0 : index
    %c1_35 = arith.constant 1 : index
    %c0_36 = arith.constant 0 : index
    %c20 = arith.constant 20 : index
    %40 = vector.load %arg11[%c0_34, %c1_35, %c0_36, %c20] : memref<2x10x10x36xf32, #tpu.memory_space<vmem>>, vector<2x8x8x4xf32>
    tpu.vector_store %arg11[%c0_34, %c1_35, %c0_36, %c20], %34 {strides = array<i32>} : memref<2x10x10x36xf32, #tpu.memory_space<vmem>>, vector<2x8x8x4xf32>,
    %c0_37 = arith.constant 0 : index
    %c0_38 = arith.constant 0 : index
    %c2_39 = arith.constant 2 : index
    %c24 = arith.constant 24 : index
    %41 = vector.load %arg11[%c0_37, %c0_38, %c2_39, %c24] : memref<2x10x10x36xf32, #tpu.memory_space<vmem>>, vector<2x8x8x4xf32>
    tpu.vector_store %arg11[%c0_37, %c0_38, %c2_39, %c24], %34 {strides = array<i32>} : memref<2x10x10x36xf32, #tpu.memory_space<vmem>>, vector<2x8x8x4xf32>,
    %c0_40 = arith.constant 0 : index
    %c0_41 = arith.constant 0 : index
    %c1_42 = arith.constant 1 : index
    %c28 = arith.constant 28 : index
    %42 = vector.load %arg11[%c0_40, %c0_41, %c1_42, %c28] : memref<2x10x10x36xf32, #tpu.memory_space<vmem>>, vector<2x8x8x4xf32>
    tpu.vector_store %arg11[%c0_40, %c0_41, %c1_42, %c28], %34 {strides = array<i32>} : memref<2x10x10x36xf32, #tpu.memory_space<vmem>>, vector<2x8x8x4xf32>,
    %c0_43 = arith.constant 0 : index
    %c0_44 = arith.constant 0 : index
    %c0_45 = arith.constant 0 : index
    %c32 = arith.constant 32 : index
    %43 = vector.load %arg11[%c0_43, %c0_44, %c0_45, %c32] : memref<2x10x10x36xf32, #tpu.memory_space<vmem>>, vector<2x8x8x4xf32>
    tpu.vector_store %arg11[%c0_43, %c0_44, %c0_45, %c32], %34 {strides = array<i32>} : memref<2x10x10x36xf32, #tpu.memory_space<vmem>>, vector<2x8x8x4xf32>,
    %c0_46 = arith.constant 0 : index
    %c1_47 = arith.constant 1 : index
    %c1_48 = arith.constant 1 : index
    %c0_49 = arith.constant 0 : index
    %44 = vector.load %arg11[%c0_46, %c1_47, %c1_48, %c0_49] : memref<2x10x10x36xf32, #tpu.memory_space<vmem>>, vector<2x8x8x36xf32>
    %45 = vector.shape_cast %44 : vector<2x8x8x36xf32> to vector<128x36xf32>
    %46 = arith.truncf %45 : vector<128x36xf32> to vector<128x36xbf16>
    %c0_50 = arith.constant 0 : index
    %c0_51 = arith.constant 0 : index
    %c0_52 = arith.constant 0 : index
    %47 = vector.load %arg4[%c0_50, %c0_51, %c0_52] : memref<3x36x4xbf16, #tpu.memory_space<vmem>>, vector<1x36x4xbf16>
    %48 = vector.shape_cast %47 : vector<1x36x4xbf16> to vector<36x4xbf16>
    %cst_53 = arith.constant dense<0.000000e+00> : vector<128x4xf32>
    %49 = tpu.matmul %46, %48, %cst_53 {dimension_numbers = #tpu.dot_dimension_numbers<[1], [0], [0], [1], [0, 0, 1, 1], [], []>} : vector<128x36xbf16>, vector<36x4xbf16>, vector<128x4xf32> -> vector<128x4xf32>
    %c0_54 = arith.constant 0 : index
    %c0_55 = arith.constant 0 : index
    %c0_56 = arith.constant 0 : index
    %50 = vector.load %arg5[%c0_54, %c0_55, %c0_56] : memref<3x1x4xf32, #tpu.memory_space<vmem>>, vector<1x1x4xf32>
    %51 = vector.shape_cast %50 : vector<1x1x4xf32> to vector<1x4xf32>
    %c0_57 = arith.constant 0 : index
    %c0_58 = arith.constant 0 : index
    %c0_59 = arith.constant 0 : index
    %52 = vector.load %arg6[%c0_57, %c0_58, %c0_59] : memref<3x1x4xf32, #tpu.memory_space<vmem>>, vector<1x1x4xf32>
    %53 = vector.shape_cast %52 : vector<1x1x4xf32> to vector<1x4xf32>
    %cst_60 = arith.constant dense<0.000000e+00> : vector<4xf32>
    %54 = vector.multi_reduction <add>, %49, %cst_60 [0] : vector<128x4xf32> to vector<4xf32>
    %55 = vector.shape_cast %54 : vector<4xf32> to vector<1x4xf32>
    %cst_61 = arith.constant 1.280000e+02 : f32
    %56 = vector.broadcast %cst_61 : f32 to vector<1x4xf32>
    %57 = arith.divf %55, %56 : vector<1x4xf32>
    %58 = vector.broadcast %57 : vector<1x4xf32> to vector<128x4xf32>
    %59 = arith.subf %49, %58 : vector<128x4xf32>
    %60 = arith.mulf %59, %59 : vector<128x4xf32>
    %cst_62 = arith.constant dense<0.000000e+00> : vector<4xf32>
    %61 = vector.multi_reduction <add>, %60, %cst_62 [0] : vector<128x4xf32> to vector<4xf32>
    %62 = vector.shape_cast %61 : vector<4xf32> to vector<1x4xf32>
    %cst_63 = arith.constant 1.280000e+02 : f32
    %63 = vector.broadcast %cst_63 : f32 to vector<1x4xf32>
    %64 = arith.divf %62, %63 : vector<1x4xf32>
    %cst_64 = arith.constant 9.99999974E-6 : f32
    %65 = vector.broadcast %cst_64 : f32 to vector<1x4xf32>
    %66 = arith.addf %64, %65 : vector<1x4xf32>
    %67 = math.rsqrt %66 : vector<1x4xf32>
    %68 = arith.mulf %51, %67 : vector<1x4xf32>
    %69 = arith.mulf %57, %68 : vector<1x4xf32>
    %70 = arith.subf %53, %69 : vector<1x4xf32>
    %71 = vector.broadcast %68 : vector<1x4xf32> to vector<128x4xf32>
    %72 = arith.mulf %49, %71 : vector<128x4xf32>
    %73 = vector.broadcast %70 : vector<1x4xf32> to vector<128x4xf32>
    %74 = arith.addf %72, %73 : vector<128x4xf32>
    %cst_65 = arith.constant 0.000000e+00 : f32
    %75 = vector.broadcast %cst_65 : f32 to vector<128x4xf32>
    %76 = arith.maximumf %74, %75 : vector<128x4xf32>
    %c0_66 = arith.constant 0 : index
    %c4_67 = arith.constant 4 : index
    %77 = vector.load %arg12[%c0_66, %c4_67] : memref<128x16xf32, #tpu.memory_space<vmem>>, vector<128x4xf32>
    tpu.vector_store %arg12[%c0_66, %c4_67], %76 {strides = array<i32>} : memref<128x16xf32, #tpu.memory_space<vmem>>, vector<128x4xf32>,
    %78 = vector.extract_strided_slice %28 {offsets = [0, 8], sizes = [128, 4], strides = [1, 1]} : vector<128x16xf32> to vector<128x4xf32>
    %79 = arith.addf %78, %76 : vector<128x4xf32>
    %80 = vector.shape_cast %79 : vector<128x4xf32> to vector<2x8x8x4xf32>
    %c0_68 = arith.constant 0 : index
    %c2_69 = arith.constant 2 : index
    %c2_70 = arith.constant 2 : index
    %c0_71 = arith.constant 0 : index
    %81 = vector.load %arg11[%c0_68, %c2_69, %c2_70, %c0_71] : memref<2x10x10x36xf32, #tpu.memory_space<vmem>>, vector<2x8x8x4xf32>
    tpu.vector_store %arg11[%c0_68, %c2_69, %c2_70, %c0_71], %80 {strides = array<i32>} : memref<2x10x10x36xf32, #tpu.memory_space<vmem>>, vector<2x8x8x4xf32>,
    %c0_72 = arith.constant 0 : index
    %c2_73 = arith.constant 2 : index
    %c1_74 = arith.constant 1 : index
    %c4_75 = arith.constant 4 : index
    %82 = vector.load %arg11[%c0_72, %c2_73, %c1_74, %c4_75] : memref<2x10x10x36xf32, #tpu.memory_space<vmem>>, vector<2x8x8x4xf32>
    tpu.vector_store %arg11[%c0_72, %c2_73, %c1_74, %c4_75], %80 {strides = array<i32>} : memref<2x10x10x36xf32, #tpu.memory_space<vmem>>, vector<2x8x8x4xf32>,
    %c0_76 = arith.constant 0 : index
    %c2_77 = arith.constant 2 : index
    %c0_78 = arith.constant 0 : index
    %c8_79 = arith.constant 8 : index
    %83 = vector.load %arg11[%c0_76, %c2_77, %c0_78, %c8_79] : memref<2x10x10x36xf32, #tpu.memory_space<vmem>>, vector<2x8x8x4xf32>
    tpu.vector_store %arg11[%c0_76, %c2_77, %c0_78, %c8_79], %80 {strides = array<i32>} : memref<2x10x10x36xf32, #tpu.memory_space<vmem>>, vector<2x8x8x4xf32>,
    %c0_80 = arith.constant 0 : index
    %c1_81 = arith.constant 1 : index
    %c2_82 = arith.constant 2 : index
    %c12_83 = arith.constant 12 : index
    %84 = vector.load %arg11[%c0_80, %c1_81, %c2_82, %c12_83] : memref<2x10x10x36xf32, #tpu.memory_space<vmem>>, vector<2x8x8x4xf32>
    tpu.vector_store %arg11[%c0_80, %c1_81, %c2_82, %c12_83], %80 {strides = array<i32>} : memref<2x10x10x36xf32, #tpu.memory_space<vmem>>, vector<2x8x8x4xf32>,
    %c0_84 = arith.constant 0 : index
    %c1_85 = arith.constant 1 : index
    %c1_86 = arith.constant 1 : index
    %c16_87 = arith.constant 16 : index
    %85 = vector.load %arg11[%c0_84, %c1_85, %c1_86, %c16_87] : memref<2x10x10x36xf32, #tpu.memory_space<vmem>>, vector<2x8x8x4xf32>
    tpu.vector_store %arg11[%c0_84, %c1_85, %c1_86, %c16_87], %80 {strides = array<i32>} : memref<2x10x10x36xf32, #tpu.memory_space<vmem>>, vector<2x8x8x4xf32>,
    %c0_88 = arith.constant 0 : index
    %c1_89 = arith.constant 1 : index
    %c0_90 = arith.constant 0 : index
    %c20_91 = arith.constant 20 : index
    %86 = vector.load %arg11[%c0_88, %c1_89, %c0_90, %c20_91] : memref<2x10x10x36xf32, #tpu.memory_space<vmem>>, vector<2x8x8x4xf32>
    tpu.vector_store %arg11[%c0_88, %c1_89, %c0_90, %c20_91], %80 {strides = array<i32>} : memref<2x10x10x36xf32, #tpu.memory_space<vmem>>, vector<2x8x8x4xf32>,
    %c0_92 = arith.constant 0 : index
    %c0_93 = arith.constant 0 : index
    %c2_94 = arith.constant 2 : index
    %c24_95 = arith.constant 24 : index
    %87 = vector.load %arg11[%c0_92, %c0_93, %c2_94, %c24_95] : memref<2x10x10x36xf32, #tpu.memory_space<vmem>>, vector<2x8x8x4xf32>
    tpu.vector_store %arg11[%c0_92, %c0_93, %c2_94, %c24_95], %80 {strides = array<i32>} : memref<2x10x10x36xf32, #tpu.memory_space<vmem>>, vector<2x8x8x4xf32>,
    %c0_96 = arith.constant 0 : index
    %c0_97 = arith.constant 0 : index
    %c1_98 = arith.constant 1 : index
    %c28_99 = arith.constant 28 : index
    %88 = vector.load %arg11[%c0_96, %c0_97, %c1_98, %c28_99] : memref<2x10x10x36xf32, #tpu.memory_space<vmem>>, vector<2x8x8x4xf32>
    tpu.vector_store %arg11[%c0_96, %c0_97, %c1_98, %c28_99], %80 {strides = array<i32>} : memref<2x10x10x36xf32, #tpu.memory_space<vmem>>, vector<2x8x8x4xf32>,
    %c0_100 = arith.constant 0 : index
    %c0_101 = arith.constant 0 : index
    %c0_102 = arith.constant 0 : index
    %c32_103 = arith.constant 32 : index
    %89 = vector.load %arg11[%c0_100, %c0_101, %c0_102, %c32_103] : memref<2x10x10x36xf32, #tpu.memory_space<vmem>>, vector<2x8x8x4xf32>
    tpu.vector_store %arg11[%c0_100, %c0_101, %c0_102, %c32_103], %80 {strides = array<i32>} : memref<2x10x10x36xf32, #tpu.memory_space<vmem>>, vector<2x8x8x4xf32>,
    %c0_104 = arith.constant 0 : index
    %c1_105 = arith.constant 1 : index
    %c1_106 = arith.constant 1 : index
    %c0_107 = arith.constant 0 : index
    %90 = vector.load %arg11[%c0_104, %c1_105, %c1_106, %c0_107] : memref<2x10x10x36xf32, #tpu.memory_space<vmem>>, vector<2x8x8x36xf32>
    %91 = vector.shape_cast %90 : vector<2x8x8x36xf32> to vector<128x36xf32>
    %92 = arith.truncf %91 : vector<128x36xf32> to vector<128x36xbf16>
    %c1_108 = arith.constant 1 : index
    %c0_109 = arith.constant 0 : index
    %c0_110 = arith.constant 0 : index
    %93 = vector.load %arg4[%c1_108, %c0_109, %c0_110] : memref<3x36x4xbf16, #tpu.memory_space<vmem>>, vector<1x36x4xbf16>
    %94 = vector.shape_cast %93 : vector<1x36x4xbf16> to vector<36x4xbf16>
    %cst_111 = arith.constant dense<0.000000e+00> : vector<128x4xf32>
    %95 = tpu.matmul %92, %94, %cst_111 {dimension_numbers = #tpu.dot_dimension_numbers<[1], [0], [0], [1], [0, 0, 1, 1], [], []>} : vector<128x36xbf16>, vector<36x4xbf16>, vector<128x4xf32> -> vector<128x4xf32>
    %c1_112 = arith.constant 1 : index
    %c0_113 = arith.constant 0 : index
    %c0_114 = arith.constant 0 : index
    %96 = vector.load %arg5[%c1_112, %c0_113, %c0_114] : memref<3x1x4xf32, #tpu.memory_space<vmem>>, vector<1x1x4xf32>
    %97 = vector.shape_cast %96 : vector<1x1x4xf32> to vector<1x4xf32>
    %c1_115 = arith.constant 1 : index
    %c0_116 = arith.constant 0 : index
    %c0_117 = arith.constant 0 : index
    %98 = vector.load %arg6[%c1_115, %c0_116, %c0_117] : memref<3x1x4xf32, #tpu.memory_space<vmem>>, vector<1x1x4xf32>
    %99 = vector.shape_cast %98 : vector<1x1x4xf32> to vector<1x4xf32>
    %cst_118 = arith.constant dense<0.000000e+00> : vector<4xf32>
    %100 = vector.multi_reduction <add>, %95, %cst_118 [0] : vector<128x4xf32> to vector<4xf32>
    %101 = vector.shape_cast %100 : vector<4xf32> to vector<1x4xf32>
    %cst_119 = arith.constant 1.280000e+02 : f32
    %102 = vector.broadcast %cst_119 : f32 to vector<1x4xf32>
    %103 = arith.divf %101, %102 : vector<1x4xf32>
    %104 = vector.broadcast %103 : vector<1x4xf32> to vector<128x4xf32>
    %105 = arith.subf %95, %104 : vector<128x4xf32>
    %106 = arith.mulf %105, %105 : vector<128x4xf32>
    %cst_120 = arith.constant dense<0.000000e+00> : vector<4xf32>
    %107 = vector.multi_reduction <add>, %106, %cst_120 [0] : vector<128x4xf32> to vector<4xf32>
    %108 = vector.shape_cast %107 : vector<4xf32> to vector<1x4xf32>
    %cst_121 = arith.constant 1.280000e+02 : f32
    %109 = vector.broadcast %cst_121 : f32 to vector<1x4xf32>
    %110 = arith.divf %108, %109 : vector<1x4xf32>
    %cst_122 = arith.constant 9.99999974E-6 : f32
    %111 = vector.broadcast %cst_122 : f32 to vector<1x4xf32>
    %112 = arith.addf %110, %111 : vector<1x4xf32>
    %113 = math.rsqrt %112 : vector<1x4xf32>
    %114 = arith.mulf %97, %113 : vector<1x4xf32>
    %115 = arith.mulf %103, %114 : vector<1x4xf32>
    %116 = arith.subf %99, %115 : vector<1x4xf32>
    %117 = vector.broadcast %114 : vector<1x4xf32> to vector<128x4xf32>
    %118 = arith.mulf %95, %117 : vector<128x4xf32>
    %119 = vector.broadcast %116 : vector<1x4xf32> to vector<128x4xf32>
    %120 = arith.addf %118, %119 : vector<128x4xf32>
    %cst_123 = arith.constant 0.000000e+00 : f32
    %121 = vector.broadcast %cst_123 : f32 to vector<128x4xf32>
    %122 = arith.maximumf %120, %121 : vector<128x4xf32>
    %c0_124 = arith.constant 0 : index
    %c8_125 = arith.constant 8 : index
    %123 = vector.load %arg12[%c0_124, %c8_125] : memref<128x16xf32, #tpu.memory_space<vmem>>, vector<128x4xf32>
    tpu.vector_store %arg12[%c0_124, %c8_125], %122 {strides = array<i32>} : memref<128x16xf32, #tpu.memory_space<vmem>>, vector<128x4xf32>,
    %124 = vector.extract_strided_slice %28 {offsets = [0, 12], sizes = [128, 4], strides = [1, 1]} : vector<128x16xf32> to vector<128x4xf32>
    %125 = arith.addf %124, %122 : vector<128x4xf32>
    %126 = vector.shape_cast %125 : vector<128x4xf32> to vector<2x8x8x4xf32>
    %c0_126 = arith.constant 0 : index
    %c2_127 = arith.constant 2 : index
    %c2_128 = arith.constant 2 : index
    %c0_129 = arith.constant 0 : index
    %127 = vector.load %arg11[%c0_126, %c2_127, %c2_128, %c0_129] : memref<2x10x10x36xf32, #tpu.memory_space<vmem>>, vector<2x8x8x4xf32>
    tpu.vector_store %arg11[%c0_126, %c2_127, %c2_128, %c0_129], %126 {strides = array<i32>} : memref<2x10x10x36xf32, #tpu.memory_space<vmem>>, vector<2x8x8x4xf32>,
    %c0_130 = arith.constant 0 : index
    %c2_131 = arith.constant 2 : index
    %c1_132 = arith.constant 1 : index
    %c4_133 = arith.constant 4 : index
    %128 = vector.load %arg11[%c0_130, %c2_131, %c1_132, %c4_133] : memref<2x10x10x36xf32, #tpu.memory_space<vmem>>, vector<2x8x8x4xf32>
    tpu.vector_store %arg11[%c0_130, %c2_131, %c1_132, %c4_133], %126 {strides = array<i32>} : memref<2x10x10x36xf32, #tpu.memory_space<vmem>>, vector<2x8x8x4xf32>,
    %c0_134 = arith.constant 0 : index
    %c2_135 = arith.constant 2 : index
    %c0_136 = arith.constant 0 : index
    %c8_137 = arith.constant 8 : index
    %129 = vector.load %arg11[%c0_134, %c2_135, %c0_136, %c8_137] : memref<2x10x10x36xf32, #tpu.memory_space<vmem>>, vector<2x8x8x4xf32>
    tpu.vector_store %arg11[%c0_134, %c2_135, %c0_136, %c8_137], %126 {strides = array<i32>} : memref<2x10x10x36xf32, #tpu.memory_space<vmem>>, vector<2x8x8x4xf32>,
    %c0_138 = arith.constant 0 : index
    %c1_139 = arith.constant 1 : index
    %c2_140 = arith.constant 2 : index
    %c12_141 = arith.constant 12 : index
    %130 = vector.load %arg11[%c0_138, %c1_139, %c2_140, %c12_141] : memref<2x10x10x36xf32, #tpu.memory_space<vmem>>, vector<2x8x8x4xf32>
    tpu.vector_store %arg11[%c0_138, %c1_139, %c2_140, %c12_141], %126 {strides = array<i32>} : memref<2x10x10x36xf32, #tpu.memory_space<vmem>>, vector<2x8x8x4xf32>,
    %c0_142 = arith.constant 0 : index
    %c1_143 = arith.constant 1 : index
    %c1_144 = arith.constant 1 : index
    %c16_145 = arith.constant 16 : index
    %131 = vector.load %arg11[%c0_142, %c1_143, %c1_144, %c16_145] : memref<2x10x10x36xf32, #tpu.memory_space<vmem>>, vector<2x8x8x4xf32>
    tpu.vector_store %arg11[%c0_142, %c1_143, %c1_144, %c16_145], %126 {strides = array<i32>} : memref<2x10x10x36xf32, #tpu.memory_space<vmem>>, vector<2x8x8x4xf32>,
    %c0_146 = arith.constant 0 : index
    %c1_147 = arith.constant 1 : index
    %c0_148 = arith.constant 0 : index
    %c20_149 = arith.constant 20 : index
    %132 = vector.load %arg11[%c0_146, %c1_147, %c0_148, %c20_149] : memref<2x10x10x36xf32, #tpu.memory_space<vmem>>, vector<2x8x8x4xf32>
    tpu.vector_store %arg11[%c0_146, %c1_147, %c0_148, %c20_149], %126 {strides = array<i32>} : memref<2x10x10x36xf32, #tpu.memory_space<vmem>>, vector<2x8x8x4xf32>,
    %c0_150 = arith.constant 0 : index
    %c0_151 = arith.constant 0 : index
    %c2_152 = arith.constant 2 : index
    %c24_153 = arith.constant 24 : index
    %133 = vector.load %arg11[%c0_150, %c0_151, %c2_152, %c24_153] : memref<2x10x10x36xf32, #tpu.memory_space<vmem>>, vector<2x8x8x4xf32>
    tpu.vector_store %arg11[%c0_150, %c0_151, %c2_152, %c24_153], %126 {strides = array<i32>} : memref<2x10x10x36xf32, #tpu.memory_space<vmem>>, vector<2x8x8x4xf32>,
    %c0_154 = arith.constant 0 : index
    %c0_155 = arith.constant 0 : index
    %c1_156 = arith.constant 1 : index
    %c28_157 = arith.constant 28 : index
    %134 = vector.load %arg11[%c0_154, %c0_155, %c1_156, %c28_157] : memref<2x10x10x36xf32, #tpu.memory_space<vmem>>, vector<2x8x8x4xf32>
    tpu.vector_store %arg11[%c0_154, %c0_155, %c1_156, %c28_157], %126 {strides = array<i32>} : memref<2x10x10x36xf32, #tpu.memory_space<vmem>>, vector<2x8x8x4xf32>,
    %c0_158 = arith.constant 0 : index
    %c0_159 = arith.constant 0 : index
    %c0_160 = arith.constant 0 : index
    %c32_161 = arith.constant 32 : index
    %135 = vector.load %arg11[%c0_158, %c0_159, %c0_160, %c32_161] : memref<2x10x10x36xf32, #tpu.memory_space<vmem>>, vector<2x8x8x4xf32>
    tpu.vector_store %arg11[%c0_158, %c0_159, %c0_160, %c32_161], %126 {strides = array<i32>} : memref<2x10x10x36xf32, #tpu.memory_space<vmem>>, vector<2x8x8x4xf32>,
    %c0_162 = arith.constant 0 : index
    %c1_163 = arith.constant 1 : index
    %c1_164 = arith.constant 1 : index
    %c0_165 = arith.constant 0 : index
    %136 = vector.load %arg11[%c0_162, %c1_163, %c1_164, %c0_165] : memref<2x10x10x36xf32, #tpu.memory_space<vmem>>, vector<2x8x8x36xf32>
    %137 = vector.shape_cast %136 : vector<2x8x8x36xf32> to vector<128x36xf32>
    %138 = arith.truncf %137 : vector<128x36xf32> to vector<128x36xbf16>
    %c2_166 = arith.constant 2 : index
    %c0_167 = arith.constant 0 : index
    %c0_168 = arith.constant 0 : index
    %139 = vector.load %arg4[%c2_166, %c0_167, %c0_168] : memref<3x36x4xbf16, #tpu.memory_space<vmem>>, vector<1x36x4xbf16>
    %140 = vector.shape_cast %139 : vector<1x36x4xbf16> to vector<36x4xbf16>
    %cst_169 = arith.constant dense<0.000000e+00> : vector<128x4xf32>
    %141 = tpu.matmul %138, %140, %cst_169 {dimension_numbers = #tpu.dot_dimension_numbers<[1], [0], [0], [1], [0, 0, 1, 1], [], []>} : vector<128x36xbf16>, vector<36x4xbf16>, vector<128x4xf32> -> vector<128x4xf32>
    %c2_170 = arith.constant 2 : index
    %c0_171 = arith.constant 0 : index
    %c0_172 = arith.constant 0 : index
    %142 = vector.load %arg5[%c2_170, %c0_171, %c0_172] : memref<3x1x4xf32, #tpu.memory_space<vmem>>, vector<1x1x4xf32>
    %143 = vector.shape_cast %142 : vector<1x1x4xf32> to vector<1x4xf32>
    %c2_173 = arith.constant 2 : index
    %c0_174 = arith.constant 0 : index
    %c0_175 = arith.constant 0 : index
    %144 = vector.load %arg6[%c2_173, %c0_174, %c0_175] : memref<3x1x4xf32, #tpu.memory_space<vmem>>, vector<1x1x4xf32>
    %145 = vector.shape_cast %144 : vector<1x1x4xf32> to vector<1x4xf32>
    %cst_176 = arith.constant dense<0.000000e+00> : vector<4xf32>
    %146 = vector.multi_reduction <add>, %141, %cst_176 [0] : vector<128x4xf32> to vector<4xf32>
    %147 = vector.shape_cast %146 : vector<4xf32> to vector<1x4xf32>
    %cst_177 = arith.constant 1.280000e+02 : f32
    %148 = vector.broadcast %cst_177 : f32 to vector<1x4xf32>
    %149 = arith.divf %147, %148 : vector<1x4xf32>
    %150 = vector.broadcast %149 : vector<1x4xf32> to vector<128x4xf32>
    %151 = arith.subf %141, %150 : vector<128x4xf32>
    %152 = arith.mulf %151, %151 : vector<128x4xf32>
    %cst_178 = arith.constant dense<0.000000e+00> : vector<4xf32>
    %153 = vector.multi_reduction <add>, %152, %cst_178 [0] : vector<128x4xf32> to vector<4xf32>
    %154 = vector.shape_cast %153 : vector<4xf32> to vector<1x4xf32>
    %cst_179 = arith.constant 1.280000e+02 : f32
    %155 = vector.broadcast %cst_179 : f32 to vector<1x4xf32>
    %156 = arith.divf %154, %155 : vector<1x4xf32>
    %cst_180 = arith.constant 9.99999974E-6 : f32
    %157 = vector.broadcast %cst_180 : f32 to vector<1x4xf32>
    %158 = arith.addf %156, %157 : vector<1x4xf32>
    %159 = math.rsqrt %158 : vector<1x4xf32>
    %160 = arith.mulf %143, %159 : vector<1x4xf32>
    %161 = arith.mulf %149, %160 : vector<1x4xf32>
    %162 = arith.subf %145, %161 : vector<1x4xf32>
    %163 = vector.broadcast %160 : vector<1x4xf32> to vector<128x4xf32>
    %164 = arith.mulf %141, %163 : vector<128x4xf32>
    %165 = vector.broadcast %162 : vector<1x4xf32> to vector<128x4xf32>
    %166 = arith.addf %164, %165 : vector<128x4xf32>
    %cst_181 = arith.constant 0.000000e+00 : f32
    %167 = vector.broadcast %cst_181 : f32 to vector<128x4xf32>
    %168 = arith.maximumf %166, %167 : vector<128x4xf32>
    %c0_182 = arith.constant 0 : index
    %c12_183 = arith.constant 12 : index
    %169 = vector.load %arg12[%c0_182, %c12_183] : memref<128x16xf32, #tpu.memory_space<vmem>>, vector<128x4xf32>
    tpu.vector_store %arg12[%c0_182, %c12_183], %168 {strides = array<i32>} : memref<128x16xf32, #tpu.memory_space<vmem>>, vector<128x4xf32>,
    %c0_184 = arith.constant 0 : index
    %c0_185 = arith.constant 0 : index
    %170 = vector.load %arg12[%c0_184, %c0_185] : memref<128x16xf32, #tpu.memory_space<vmem>>, vector<128x16xf32>
    %171 = arith.truncf %170 : vector<128x16xf32> to vector<128x16xbf16>
    %c0_186 = arith.constant 0 : index
    %c0_187 = arith.constant 0 : index
    %172 = vector.load %arg7[%c0_186, %c0_187] : memref<16x64xbf16, #tpu.memory_space<vmem>>, vector<16x64xbf16>
    %cst_188 = arith.constant dense<0.000000e+00> : vector<128x64xf32>
    %173 = tpu.matmul %171, %172, %cst_188 {dimension_numbers = #tpu.dot_dimension_numbers<[1], [0], [0], [1], [0, 0, 1, 1], [], []>} : vector<128x16xbf16>, vector<16x64xbf16>, vector<128x64xf32> -> vector<128x64xf32>
    %c0_189 = arith.constant 0 : index
    %c0_190 = arith.constant 0 : index
    %174 = vector.load %arg8[%c0_189, %c0_190] : memref<1x64xf32, #tpu.memory_space<vmem>>, vector<1x64xf32>
    %c0_191 = arith.constant 0 : index
    %c0_192 = arith.constant 0 : index
    %175 = vector.load %arg9[%c0_191, %c0_192] : memref<1x64xf32, #tpu.memory_space<vmem>>, vector<1x64xf32>
    %cst_193 = arith.constant dense<0.000000e+00> : vector<64xf32>
    %176 = vector.multi_reduction <add>, %173, %cst_193 [0] : vector<128x64xf32> to vector<64xf32>
    %177 = vector.shape_cast %176 : vector<64xf32> to vector<1x64xf32>
    %cst_194 = arith.constant 1.280000e+02 : f32
    %178 = vector.broadcast %cst_194 : f32 to vector<1x64xf32>
    %179 = arith.divf %177, %178 : vector<1x64xf32>
    %180 = vector.broadcast %179 : vector<1x64xf32> to vector<128x64xf32>
    %181 = arith.subf %173, %180 : vector<128x64xf32>
    %182 = arith.mulf %181, %181 : vector<128x64xf32>
    %cst_195 = arith.constant dense<0.000000e+00> : vector<64xf32>
    %183 = vector.multi_reduction <add>, %182, %cst_195 [0] : vector<128x64xf32> to vector<64xf32>
    %184 = vector.shape_cast %183 : vector<64xf32> to vector<1x64xf32>
    %cst_196 = arith.constant 1.280000e+02 : f32
    %185 = vector.broadcast %cst_196 : f32 to vector<1x64xf32>
    %186 = arith.divf %184, %185 : vector<1x64xf32>
    %cst_197 = arith.constant 9.99999974E-6 : f32
    %187 = vector.broadcast %cst_197 : f32 to vector<1x64xf32>
    %188 = arith.addf %186, %187 : vector<1x64xf32>
    %189 = math.rsqrt %188 : vector<1x64xf32>
    %190 = arith.mulf %174, %189 : vector<1x64xf32>
    %191 = arith.mulf %179, %190 : vector<1x64xf32>
    %192 = arith.subf %175, %191 : vector<1x64xf32>
    %193 = vector.broadcast %190 : vector<1x64xf32> to vector<128x64xf32>
    %194 = arith.mulf %173, %193 : vector<128x64xf32>
    %195 = vector.broadcast %192 : vector<1x64xf32> to vector<128x64xf32>
    %196 = arith.addf %194, %195 : vector<128x64xf32>
    %c0_198 = arith.constant 0 : index
    %c0_199 = arith.constant 0 : index
    %197 = vector.load %arg0[%c0_198, %c0_199] : memref<128x64xf32, #tpu.memory_space<vmem>>, vector<128x64xf32>
    %198 = arith.addf %196, %197 : vector<128x64xf32>
    %cst_200 = arith.constant 0.000000e+00 : f32
    %199 = vector.broadcast %cst_200 : f32 to vector<128x64xf32>
    %200 = arith.maximumf %198, %199 : vector<128x64xf32>
    %c0_201 = arith.constant 0 : index
    %c0_202 = arith.constant 0 : index
    %201 = vector.load %arg10[%c0_201, %c0_202] : memref<128x64xf32, #tpu.memory_space<vmem>>, vector<128x64xf32>
    tpu.vector_store %arg10[%c0_201, %c0_202], %200 {strides = array<i32>} : memref<128x64xf32, #tpu.memory_space<vmem>>, vector<128x64xf32>,
    return
  }
}

</mosaic_0001>

<bundles_post_ra>
// kernel: tpu_custom_call.1
= control target key start
LH: loop header
LB: loop body
LE: loop exit
PB: predicated region body
PF: predicated region fallthrough
CT: control target
= control target key end

     0   :  { %vm92_vm0 = vcmask 523264   ;;  %vm168_vm1 = vcmask 130048   ;;  %v3799_v60 = vmov 128.0   ;;  %vm394_vm6 = vcmask 31744   ;;  %s3802_s15 = smov 4   ;;  %s3803_s16 = smov 8   ;;  %s6730_s1 = inlined_call_operand.vmem [shape: bf16[64,16], index: 1, kind: input, shape index: {}]   ;;  %s6731_s0 = inlined_call_operand.vmem [shape: f32[128,64], index: 0, kind: input, shape index: {}]   ;;  %s6732_s2 = inlined_call_operand.vmem [shape: f32[1,16], index: 2, kind: input, shape index: {}]   ;;  %s6733_s3 = inlined_call_operand.vmem [shape: f32[1,16], index: 3, kind: input, shape index: {}]   ;;  %s6734_s4 = inlined_call_operand.vmem [shape: bf16[3,36,4], index: 4, kind: input, shape index: {}]   ;;  %s6735_s5 = inlined_call_operand.vmem [shape: f32[3,1,4], index: 5, kind: input, shape index: {}]   ;;  %s6736_s6 = inlined_call_operand.vmem [shape: f32[3,1,4], index: 6, kind: input, shape index: {}]   ;;  %s6737_s7 = inlined_call_operand.vmem [shape: bf16[16,64], index: 7, kind: input, shape index: {}]   ;;  %s6738_s8 = inlined_call_operand.vmem [shape: f32[1,64], index: 8, kind: input, shape index: {}]   ;;  %s6739_s9 = inlined_call_operand.vmem [shape: f32[1,64], index: 9, kind: input, shape index: {}]   ;;  %s6740_s10 = inlined_call_operand.vmem [shape: f32[128,64], index: 10, kind: output, shape index: {}]  }
   0x1   :  { %v3758_v0 = vld [vmem:[%s6730_s1 + $0x18] sm:$0xff]  ;;  %v3757_v1 = vld [vmem:[%s6730_s1 + $0x10] sm:$0xff]  ;;  %v3756_v2 = vld [vmem:[%s6730_s1 + $0x8] sm:$0xff]  ;;  %3787 = vrcp.f32 %v3799_v60  ;;  %s3804_s17 = smov 16   ;;  %s3805_s18 = smov 24   ;;  %vm352_vm7 = vcmask 293888  }
   0x2   :  { %121 = vmatpush.bf16.msra.mxu0 %v3758_v0  ;;  %v3755_v3 = vld [vmem:[%s6730_s1] sm:$0xff]  ;;  %v37_v5 = vld [vmem:[%s6731_s0 + $0x8] sm:$0xff]  ;;  %v38_v7 = vld [vmem:[%s6731_s0 + $0x10] sm:$0xff]  ;;  %s3806_s19 = smov 20   ;;  %s3807_s20 = smov 28   ;;  %vm354_vm8 = vcmask 287744  }
   0x3   :  { %v36_v4 = vld [vmem:[%s6731_s0] sm:$0xff]  ;;  %v39_v8 = vld [vmem:[%s6731_s0 + $0x18] sm:$0xff]  ;;  %v41_v11 = vld [vmem:[%s6731_s0 + $0x28] sm:$0xff]  ;;  %vm492_vm9 = vcmask 64544   ;;  %vm1033_vm10 = vcmask 1041408   ;;  %vm557_vm11 = vcmask 97344  }
   0x4   :  { %v52_v6 = vpack.c.bf16 %v37_v5, %v36_v4  ;;  %v53_v9 = vpack.c.bf16 %v39_v8, %v38_v7  ;;  %v40_v10 = vld [vmem:[%s6731_s0 + $0x20] sm:$0xff]  ;;  %v42_v13 = vld [vmem:[%s6731_s0 + $0x30] sm:$0xff]  ;;  %v43_v14 = vld [vmem:[%s6731_s0 + $0x38] sm:$0xff]  ;;  %vm623_vm12 = vcmask 130144   ;;  %vm688_vm13 = vcmask 162944   ;;  %s3809_s30 = smov 120  }
   0x5   :  { %v54_v12 = vpack.c.bf16 %v41_v11, %v40_v10  ;;  %v55_v15 = vpack.c.bf16 %v43_v14, %v42_v13  ;;  %v44_v16 = vld [vmem:[%s6731_s0 + $0x40] sm:$0xff]  ;;  %v45_v17 = vld [vmem:[%s6731_s0 + $0x48] sm:$0xff]  ;;  %v46_v19 = vld [vmem:[%s6731_s0 + $0x50] sm:$0xff]  ;;  %vm753_vm14 = vcmask 195744   ;;  %vm818_vm15 = vcmask 228544   ;;  %s3810_s27 = smov 116  }
   0x6   :  { %122 = vmatpush.bf16.msra.mxu0 %v3757_v1  ;;  %v56_v18 = vpack.c.bf16 %v45_v17, %v44_v16  ;;  %v47_v20 = vld [vmem:[%s6731_s0 + $0x58] sm:$0xff]  ;;  %v48_v22 = vld [vmem:[%s6731_s0 + $0x60] sm:$0xff]  ;;  %v49_v23 = vld [vmem:[%s6731_s0 + $0x68] sm:$0xff] }
   0x7   :  { %v57_v21 = vpack.c.bf16 %v47_v20, %v46_v19  ;;  %v58_v24 = vpack.c.bf16 %v49_v23, %v48_v22  ;;  %v50_v25 = vld [vmem:[%s6731_s0 + $0x70] sm:$0xff]  ;;  %v51_v26 = vld [vmem:[%s6731_s0 + $0x78] sm:$0xff] }
   0x8   :  { %v59_v27 = vpack.c.bf16 %v51_v26, %v50_v25 }
   0xa   :  { %123 = vmatpush.bf16.msra.mxu0 %v3756_v2 }
   0xe   :  { %124 = vmatpush.bf16.msra.mxu0 %v3755_v3  ;;  %v3788_v3 = vpop.eup %3787 }
   0xf   :  { %v207_v8 = vmul.f32 128.0, %v3788_v3  ;;  %vm211_vm2 = vweird.f32 %v3788_v3 }
  0x11   :  { %3673 = vmatmul.msk.bf16.vlgmr.msra.gmra.mxu0 %vm92_vm0, %v52_v6  ;;  %v208_v13 = vsub.f32 1.0, %v207_v8 }
  0x13   :  { %v209_v16 = vmul.f32 %v3788_v3, %v208_v13 }
  0x15   :  { %v210_v19 = vadd.f32 %v3788_v3, %v209_v16 }
  0x17   :  { %v3998_v22 = vsel %vm211_vm2, %v3788_v3, %v210_v19  ;;  %vm883_vm2 = vcmask 261344  }
  0x21   :  { %3674 = vmatmul.msk.bf16.gmra.mxu0 %vm92_vm0, %v53_v9 }
  0x31   :  { %3675 = vmatmul.msk.bf16.gmra.mxu0 %vm92_vm0, %v54_v12 }
  0x41   :  { %3676 = vmatmul.msk.bf16.gmra.mxu0 %vm92_vm0, %v55_v15 }
  0x51   :  { %3677 = vmatmul.msk.bf16.gmra.mxu0 %vm92_vm0, %v56_v18 }
  0x61   :  { %3678 = vmatmul.msk.bf16.gmra.mxu0 %vm92_vm0, %v57_v21 }
  0x71   :  { %3679 = vmatmul.msk.bf16.gmra.mxu0 %vm92_vm0, %v58_v24 }
  0x81   :  { %3680 = vmatmul.msk.bf16.gmra.mxu0 %vm92_vm0, %v59_v27 }
  0x8e   :  { %v3934_v28 = vpop.f32.mrf.mxu0 }
  0x8f   :  { %v169_v41 = vsel %vm168_vm1, %v3934_v28, 0.0 }
  0x96   :  { %v3936_v29 = vpop.f32.mrf.mxu0 }
  0x97   :  { %v170_v40 = vsel %vm168_vm1, %v3936_v29, 0.0 }
  0x98   :  { %v171_v43 = vadd.f32 %v170_v40, %v169_v41 }
  0x9e   :  { %v3938_v30 = vpop.f32.mrf.mxu0 }
  0x9f   :  { %v172_v42 = vsel %vm168_vm1, %v3938_v30, 0.0 }
  0xa0   :  { %v173_v45 = vadd.f32 %v172_v42, %v171_v43 }
  0xa6   :  { %v3940_v31 = vpop.f32.mrf.mxu0 }
  0xa7   :  { %v174_v44 = vsel %vm168_vm1, %v3940_v31, 0.0 }
  0xa8   :  { %v175_v48 = vadd.f32 %v174_v44, %v173_v45 }
  0xae   :  { %v3942_v32 = vpop.f32.mrf.mxu0 }
  0xaf   :  { %v176_v47 = vsel %vm168_vm1, %v3942_v32, 0.0 }
  0xb0   :  { %v177_v50 = vadd.f32 %v176_v47, %v175_v48 }
  0xb6   :  { %v3944_v33 = vpop.f32.mrf.mxu0 }
  0xb7   :  { %v178_v49 = vsel %vm168_vm1, %v3944_v33, 0.0 }
  0xb8   :  { %v179_v52 = vadd.f32 %v178_v49, %v177_v50 }
  0xbe   :  { %v3946_v34 = vpop.f32.mrf.mxu0 }
  0xbf   :  { %v180_v51 = vsel %vm168_vm1, %v3946_v34, 0.0 }
  0xc0   :  { %v181_v54 = vadd.f32 %v180_v51, %v179_v52 }
  0xc6   :  { %v3948_v35 = vpop.f32.mrf.mxu0 }
  0xc7   :  { %v182_v53 = vsel %vm168_vm1, %v3948_v35, 0.0 }
  0xc8   :  { %v183_v57 = vadd.f32 %v182_v53, %v181_v54 }
  0xce   :  { %v3950_v36 = vpop.f32.mrf.mxu0 }
  0xcf   :  { %v184_v56 = vsel %vm168_vm1, %v3950_v36, 0.0 }
  0xd0   :  { %v185_v59 = vadd.f32 %v184_v56, %v183_v57 }
  0xd6   :  { %v3952_v37 = vpop.f32.mrf.mxu0 }
  0xd7   :  { %v186_v58 = vsel %vm168_vm1, %v3952_v37, 0.0 }
  0xd8   :  { %v187_v62 = vadd.f32 %v186_v58, %v185_v59 }
  0xde   :  { %v3954_v38 = vpop.f32.mrf.mxu0 }
  0xdf   :  { %v188_v61 = vsel %vm168_vm1, %v3954_v38, 0.0 }
  0xe0   :  { %v189_v0 = vadd.f32 %v188_v61, %v187_v62 }
  0xe6   :  { %v3956_v39 = vpop.f32.mrf.mxu0 }
  0xe7   :  { %v190_v63 = vsel %vm168_vm1, %v3956_v39, 0.0 }
  0xe8   :  { %v191_v4 = vadd.f32 %v190_v63, %v189_v0 }
  0xee   :  { %v3966_v46 = vpop.f32.mrf.mxu0 }
  0xef   :  { %v192_v2 = vsel %vm168_vm1, %v3966_v46, 0.0 }
  0xf0   :  { %v193_v6 = vadd.f32 %v192_v2, %v191_v4 }
  0xf6   :  { %v3976_v55 = vpop.f32.mrf.mxu0 }
  0xf7   :  { %v194_v5 = vsel %vm168_vm1, %v3976_v55, 0.0 }
  0xf8   :  { %v195_v9 = vadd.f32 %v194_v5, %v193_v6 }
  0xfe   :  { %v3986_v1 = vpop.f32.mrf.mxu0 }
  0xff   :  { %v196_v7 = vsel %vm168_vm1, %v3986_v1, 0.0 }
 0x100   :  { %v197_v10 = vadd.f32 %v196_v7, %v195_v9 }
 0x106   :  { %v3994_v11 = vpop.f32.mrf.mxu0 }
 0x107   :  { %v198_v12 = vsel %vm168_vm1, %v3994_v11, 0.0 }
 0x108   :  { %v199_v14 = vadd.f32 %v198_v12, %v197_v10 }
 0x10a   :  { %v200_v15 = vrot.slane %v199_v14, 4 }
 0x10c   :  { %v201_v17 = vadd.f32 %v200_v15, %v199_v14 }
 0x10e   :  { %v202_v18 = vrot.slane %v201_v17, 2 }
 0x110   :  { %v203_v20 = vadd.f32 %v202_v18, %v201_v17 }
 0x112   :  { %v204_v21 = vrot.slane %v203_v20, 1 }
 0x114   :  { %v205_v23 = vadd.f32 %v204_v21, %v203_v20 }
 0x116   :  { %v4001_v24 = vmul.f32 %v3998_v22, %v205_v23 }
 0x118   :  { %v214_v25 = vsub.f32 %v3934_v28, %v4001_v24  ;;  %v215_v26 = vsub.f32 %v3936_v29, %v4001_v24  ;;  %v216_v27 = vsub.f32 %v3938_v30, %v4001_v24  ;;  %v217_v40 = vsub.f32 %v3940_v31, %v4001_v24 }
 0x119   :  { %v218_v43 = vsub.f32 %v3942_v32, %v4001_v24  ;;  %v219_v45 = vsub.f32 %v3944_v33, %v4001_v24  ;;  %v220_v51 = vsub.f32 %v3946_v34, %v4001_v24  ;;  %v221_v56 = vsub.f32 %v3948_v35, %v4001_v24 }
 0x11a   :  { %v230_v41 = vmul.f32 %v214_v25, %v214_v25  ;;  %v231_v42 = vmul.f32 %v215_v26, %v215_v26  ;;  %v232_v44 = vmul.f32 %v216_v27, %v216_v27  ;;  %v233_v47 = vmul.f32 %v217_v40, %v217_v40 }
 0x11b   :  { %v234_v52 = vmul.f32 %v218_v43, %v218_v43  ;;  %v235_v57 = vmul.f32 %v219_v45, %v219_v45  ;;  %v222_v60 = vsub.f32 %v3950_v36, %v4001_v24  ;;  %v236_v61 = vmul.f32 %v220_v51, %v220_v51 }
 0x11c   :  { %v246_v48 = vsel %vm168_vm1, %v230_v41, 0.0  ;;  %v247_v49 = vsel %vm168_vm1, %v231_v42, 0.0  ;;  %v249_v53 = vsel %vm168_vm1, %v232_v44, 0.0  ;;  %v251_v58 = vsel %vm168_vm1, %v233_v47, 0.0 }
 0x11d   :  { %v248_v50 = vadd.f32 %v247_v49, %v246_v48  ;;  %v253_v62 = vsel %vm168_vm1, %v234_v52, 0.0  ;;  %v223_v0 = vsub.f32 %v3952_v37, %v4001_v24  ;;  %v237_v2 = vmul.f32 %v221_v56, %v221_v56 }
 0x11e   :  { %v255_v3 = vsel %vm168_vm1, %v235_v57, 0.0  ;;  %v224_v5 = vsub.f32 %v3954_v38, %v4001_v24  ;;  %v238_v6 = vmul.f32 %v222_v60, %v222_v60  ;;  %v257_v7 = vsel %vm168_vm1, %v236_v61, 0.0 }
 0x11f   :  { %v250_v54 = vadd.f32 %v249_v53, %v248_v50  ;;  %v225_v9 = vsub.f32 %v3956_v39, %v4001_v24  ;;  %v239_v10 = vmul.f32 %v223_v0, %v223_v0  ;;  %v259_v12 = vsel %vm168_vm1, %v237_v2, 0.0 }
 0x120   :  { %v226_v14 = vsub.f32 %v3966_v46, %v4001_v24  ;;  %v240_v15 = vmul.f32 %v224_v5, %v224_v5  ;;  %v261_v16 = vsel %vm168_vm1, %v238_v6, 0.0  ;;  %v227_v18 = vsub.f32 %v3976_v55, %v4001_v24  ;;  %v166_v6 = vld [vmem:[%s6732_s2] sm:$0x1]  ;;  %s3800_s2 = smov 12  }
 0x121   :  { %v252_v59 = vadd.f32 %v251_v58, %v250_v54  ;;  %v241_v19 = vmul.f32 %v225_v9, %v225_v9  ;;  %v263_v20 = vsel %vm168_vm1, %v239_v10, 0.0  ;;  %v228_v23 = vsub.f32 %v3986_v1, %v4001_v24  ;;  %v167_v10 = vld [vmem:[%s6733_s3] sm:$0x1]  ;;  %s3801_s3 = smov 124  }
 0x122   :  { %v242_v25 = vmul.f32 %v226_v14, %v226_v14  ;;  %v265_v26 = vsel %vm168_vm1, %v240_v15, 0.0  ;;  %v229_v40 = vsub.f32 %v3994_v11, %v4001_v24  ;;  %v243_v41 = vmul.f32 %v227_v18, %v227_v18 }
 0x123   :  { %v254_v63 = vadd.f32 %v253_v62, %v252_v59  ;;  %v267_v42 = vsel %vm168_vm1, %v241_v19, 0.0  ;;  %v244_v44 = vmul.f32 %v228_v23, %v228_v23 }
 0x124   :  { %v269_v45 = vsel %vm168_vm1, %v242_v25, 0.0  ;;  %v245_v48 = vmul.f32 %v229_v40, %v229_v40  ;;  %v271_v49 = vsel %vm168_vm1, %v243_v41, 0.0 }
 0x125   :  { %v256_v4 = vadd.f32 %v255_v3, %v254_v63  ;;  %v273_v51 = vsel %vm168_vm1, %v244_v44, 0.0 }
 0x126   :  { %v275_v53 = vsel %vm168_vm1, %v245_v48, 0.0 }
 0x127   :  { %v258_v8 = vadd.f32 %v257_v7, %v256_v4 }
 0x129   :  { %v260_v13 = vadd.f32 %v259_v12, %v258_v8 }
 0x12b   :  { %v262_v17 = vadd.f32 %v261_v16, %v260_v13 }
 0x12d   :  { %v264_v21 = vadd.f32 %v263_v20, %v262_v17 }
 0x12f   :  { %v266_v27 = vadd.f32 %v265_v26, %v264_v21 }
 0x131   :  { %v268_v43 = vadd.f32 %v267_v42, %v266_v27 }
 0x133   :  { %v270_v47 = vadd.f32 %v269_v45, %v268_v43 }
 0x135   :  { %v272_v50 = vadd.f32 %v271_v49, %v270_v47 }
 0x137   :  { %v274_v52 = vadd.f32 %v273_v51, %v272_v50 }
 0x139   :  { %v276_v54 = vadd.f32 %v275_v53, %v274_v52 }
 0x13b   :  { %v277_v56 = vrot.slane %v276_v54, 4 }
 0x13d   :  { %v278_v57 = vadd.f32 %v277_v56, %v276_v54 }
 0x13f   :  { %v279_v58 = vrot.slane %v278_v57, 2 }
 0x141   :  { %v280_v59 = vadd.f32 %v279_v58, %v278_v57 }
 0x143   :  { %v281_v60 = vrot.slane %v280_v59, 1 }
 0x145   :  { %v282_v61 = vadd.f32 %v281_v60, %v280_v59 }
 0x147   :  { %v283_v62 = vmul.f32 %v282_v61, %v3998_v22 }
 0x149   :  { %v284_v63 = vadd.f32 1e-05, %v283_v62 }
 0x14b   :  { %3789 = vrsqrt.f32 %v284_v63  ;;  %vm291_vm4 = vweird.f32 %v284_v63 }
 0x151   :  { %v3790_v0 = vpop.eup %3789 }
 0x152   :  { %v286_v2 = vmul.f32 %v3790_v0, %v284_v63  ;;  %vm292_vm3 = vweird.f32 %v3790_v0  ;;  %v3808_v63 = vmov 0.0  }
 0x153   :  { %vm293_vm5 = vmor %vm291_vm4, %vm292_vm3  ;;  %370 = vst.msk [vmem:[#allocation2 + $0x80] sm:$0xff] %vm352_vm7, %v3808_v63  ;;  %vm948_vm3 = vcmask 294144  }
 0x154   :  { %v287_v3 = vmul.f32 %v3790_v0, %v286_v2  ;;  %371 = vst.msk [vmem:[#allocation2 + $0x88] sm:$0x3] %vm354_vm8, %v3808_v63 }
 0x155   :  { %356 = vst.msk [vmem:[#allocation2 + $0x10] sm:$0xff] %vm352_vm7, %v3808_v63 }
 0x156   :  { %v288_v4 = vmul.f32 0.5, %v287_v3  ;;  %357 = vst.msk [vmem:[#allocation2 + $0x18] sm:$0x3] %vm354_vm8, %v3808_v63 }
 0x157   :  { %358 = vst.msk [vmem:[#allocation2 + $0x20] sm:$0xff] %vm352_vm7, %v3808_v63 }
 0x158   :  { %v289_v5 = vsub.f32 1.5, %v288_v4  ;;  %359 = vst.msk [vmem:[#allocation2 + $0x28] sm:$0x3] %vm354_vm8, %v3808_v63  ;;  %v993_v4 = vld [vmem:[%s6734_s4 + $0x10] sm:$0x3] }
 0x159   :  { %360 = vst.msk [vmem:[#allocation2 + $0x30] sm:$0xff] %vm352_vm7, %v3808_v63 }
 0x15a   :  { %v290_v7 = vmul.f32 %v3790_v0, %v289_v5  ;;  %361 = vst.msk [vmem:[#allocation2 + $0x38] sm:$0x3] %vm354_vm8, %v3808_v63 }
 0x15b   :  { %362 = vst.msk [vmem:[#allocation2 + $0x40] sm:$0xff] %vm352_vm7, %v3808_v63 }
 0x15c   :  { %v294_v8 = vsel %vm293_vm5, %v3790_v0, %v290_v7  ;;  %363 = vst.msk [vmem:[#allocation2 + $0x48] sm:$0x3] %vm354_vm8, %v3808_v63  ;;  %v1003_v7 = vunpack.c.l.b16 %v993_v4 }
 0x15d   :  { %v295_v9 = vmul.f32 %v294_v8, %v166_v6  ;;  %364 = vst.msk [vmem:[#allocation2 + $0x50] sm:$0xff] %vm352_vm7, %v3808_v63 }
 0x15e   :  { %365 = vst.msk [vmem:[#allocation2 + $0x58] sm:$0x3] %vm354_vm8, %v3808_v63 }
 0x15f   :  { %v296_v12 = vmul.f32 %v295_v9, %v4001_v24  ;;  %v299_v13 = vperm.slane %v295_v9, 0  ;;  %366 = vst.msk [vmem:[#allocation2 + $0x60] sm:$0xff] %vm352_vm7, %v3808_v63  ;;  %v1006_v9 = vpack.c.b16 %v1003_v7, %v1003_v7 }
 0x160   :  { %367 = vst.msk [vmem:[#allocation2 + $0x68] sm:$0x3] %vm354_vm8, %v3808_v63 }
 0x161   :  { %v297_v14 = vsub.f32 %v167_v10, %v296_v12  ;;  %v307_v16 = vmul.f32 %v299_v13, %v3946_v34  ;;  %v306_v17 = vmul.f32 %v299_v13, %v3944_v33  ;;  %v308_v18 = vmul.f32 %v299_v13, %v3948_v35  ;;  %368 = vst.msk [vmem:[#allocation2 + $0x70] sm:$0xff] %vm352_vm7, %v3808_v63  ;;  %v3760_v12 = vld [vmem:[%s6734_s4 + $0x8] sm:$0xff] }
 0x162   :  { %v301_v19 = vmul.f32 %v299_v13, %v3934_v28  ;;  %v302_v20 = vmul.f32 %v299_v13, %v3936_v29  ;;  %v303_v21 = vmul.f32 %v299_v13, %v3938_v30  ;;  %v309_v24 = vmul.f32 %v299_v13, %v3950_v36  ;;  %369 = vst.msk [vmem:[#allocation2 + $0x78] sm:$0x3] %vm354_vm8, %v3808_v63 }
 0x163   :  { %v318_v15 = vperm.slane %v297_v14, 0  ;;  %v310_v26 = vmul.f32 %v299_v13, %v3952_v37  ;;  %v311_v28 = vmul.f32 %v299_v13, %v3954_v38  ;;  %v312_v36 = vmul.f32 %v299_v13, %v3956_v39  ;;  %376 = vst.msk [vmem:[#allocation2 + $0xb0] sm:$0xff] %vm352_vm7, %v3808_v63 }
 0x164   :  { %v313_v38 = vmul.f32 %v299_v13, %v3966_v46  ;;  %v316_v45 = vmul.f32 %v299_v13, %v3994_v11  ;;  %v305_v46 = vmul.f32 %v299_v13, %v3942_v32  ;;  %v304_v11 = vmul.f32 %v299_v13, %v3940_v31  ;;  %377 = vst.msk [vmem:[#allocation2 + $0xb8] sm:$0x3] %vm354_vm8, %v3808_v63 }
 0x165   :  { %v326_v23 = vadd.f32 %v318_v15, %v307_v16  ;;  %v325_v25 = vadd.f32 %v318_v15, %v306_v17  ;;  %v327_v27 = vadd.f32 %v318_v15, %v308_v18  ;;  %v320_v40 = vadd.f32 %v318_v15, %v301_v19  ;;  %378 = vst.msk [vmem:[#allocation2 + $0xc0] sm:$0xff] %vm352_vm7, %v3808_v63  ;;  %v3759_v16 = vld [vmem:[%s6734_s4] sm:$0xff] }
 0x166   :  { %v321_v34 = vadd.f32 %v318_v15, %v302_v20  ;;  %v322_v41 = vadd.f32 %v318_v15, %v303_v21  ;;  %v328_v35 = vadd.f32 %v318_v15, %v309_v24  ;;  %v329_v37 = vadd.f32 %v318_v15, %v310_v26  ;;  %379 = vst.msk [vmem:[#allocation2 + $0xc8] sm:$0x3] %vm354_vm8, %v3808_v63 }
 0x167   :  { %v4067_v33 = vmax.f32 %v326_v23, 0.0  ;;  %v4069_v42 = vmax.f32 %v325_v25, 0.0  ;;  %v4072_v29 = vmax.f32 %v320_v40, 0.0  ;;  %v330_v44 = vadd.f32 %v318_v15, %v311_v28  ;;  %380 = vst.msk [vmem:[#allocation2 + $0xd0] sm:$0xff] %vm352_vm7, %v3808_v63 }
 0x168   :  { %v4074_v30 = vmax.f32 %v321_v34, 0.0  ;;  %v4076_v43 = vmax.f32 %v322_v41, 0.0  ;;  %v4089_v39 = vmax.f32 %v327_v27, 0.0  ;;  %v331_v47 = vadd.f32 %v318_v15, %v312_v36  ;;  %381 = vst.msk [vmem:[#allocation2 + $0xd8] sm:$0x3] %vm354_vm8, %v3808_v63 }
 0x169   :  { %652 = vrot.lane.b32.xlu2 %v4067_v33, %s3800_s2  ;;  %439 = vrot.lane.b32.xlu1 %v4067_v33, %s3801_s3  ;;  %400 = vst.msk [vmem:[#allocation3 + $0x28] sm:$0xff] %vm394_vm6, %v4069_v42  ;;  %v4093_v48 = vmax.f32 %v328_v35, 0.0  ;;  %v332_v49 = vadd.f32 %v318_v15, %v313_v38  ;;  %v335_v50 = vadd.f32 %v318_v15, %v316_v45  ;;  %v4098_v51 = vmax.f32 %v329_v37, 0.0 }
 0x16a   :  { %437 = vrot.lane.b32.xlu0 %v4069_v42, %s3801_s3  ;;  %395 = vst.msk [vmem:[#allocation3] sm:$0xff] %vm394_vm6, %v4072_v29  ;;  %v4103_v52 = vmax.f32 %v330_v44, 0.0  ;;  %v324_v53 = vadd.f32 %v318_v15, %v305_v46  ;;  %v314_v54 = vmul.f32 %v299_v13, %v3976_v55  ;;  %v4108_v56 = vmax.f32 %v331_v47, 0.0 }
 0x16b   :  { %396 = vst.msk [vmem:[#allocation3 + $0x8] sm:$0xff] %vm394_vm6, %v4074_v30  ;;  %v323_v32 = vadd.f32 %v318_v15, %v304_v11  ;;  %v315_v57 = vmul.f32 %v299_v13, %v3986_v1  ;;  %v4113_v58 = vmax.f32 %v332_v49, 0.0  ;;  %v4117_v59 = vmax.f32 %v335_v50, 0.0 }
 0x16c   :  { %397 = vst.msk [vmem:[#allocation3 + $0x10] sm:$0xff] %vm394_vm6, %v4076_v43  ;;  %v333_v31 = vadd.f32 %v318_v15, %v314_v54  ;;  %v4127_v1 = vmax.f32 %v324_v53, 0.0  ;;  %v1035_v10 = vsel %vm1033_vm10, %v1006_v9, 0 }
 0x16d   :  { %401 = vst.msk [vmem:[#allocation3 + $0x30] sm:$0xff] %vm394_vm6, %v4067_v33  ;;  %v334_v55 = vadd.f32 %v318_v15, %v315_v57  ;;  %v4133_v60 = vmax.f32 %v323_v32, 0.0  ;;  %3767 = vmatpush.bf16.msra.mxu2 %v1035_v10  ;;  %1042 = vmatpush.bf16.msrb.mxu0 %v1035_v10 }
 0x16e   :  { %402 = vst.msk [vmem:[#allocation3 + $0x38] sm:$0xff] %vm394_vm6, %v4089_v39  ;;  %v4137_v61 = vmax.f32 %v333_v31, 0.0  ;;  %3768 = vmatpush.bf16.msra.mxu3 %v1035_v10  ;;  %3766 = vmatpush.bf16.msra.mxu1 %v1035_v10 }
 0x16f   :  { %403 = vst.msk [vmem:[#allocation3 + $0x40] sm:$0xff] %vm394_vm6, %v4093_v48  ;;  %v4141_v62 = vmax.f32 %v334_v55, 0.0 }
 0x170   :  { %404 = vst.msk [vmem:[#allocation3 + $0x48] sm:$0xff] %vm394_vm6, %v4098_v51 }
 0x171   :  { %521 = vrot.lane.b32.xlu2 %v4067_v33, %s3802_s15  ;;  %586 = vrot.lane.b32.xlu1 %v4067_v33, %s3803_s16  ;;  %405 = vst.msk [vmem:[#allocation3 + $0x50] sm:$0xff] %vm394_vm6, %v4103_v52 }
 0x172   :  { %519 = vrot.lane.b32.xlu0 %v4069_v42, %s3802_s15  ;;  %406 = vst.msk [vmem:[#allocation3 + $0x58] sm:$0xff] %vm394_vm6, %v4108_v56  ;;  %3770 = vmatpush.bf16.msra.mxu2 %v3760_v12 }
 0x173   :  { %407 = vst.msk [vmem:[#allocation3 + $0x60] sm:$0xff] %vm394_vm6, %v4113_v58  ;;  %1043 = vmatpush.bf16.msrb.mxu0 %v3760_v12  ;;  %3771 = vmatpush.bf16.msra.mxu3 %v3760_v12 }
 0x174   :  { %410 = vst.msk [vmem:[#allocation3 + $0x78] sm:$0xff] %vm394_vm6, %v4117_v59  ;;  %3769 = vmatpush.bf16.msra.mxu1 %v3760_v12 }
 0x175   :  { %399 = vst.msk [vmem:[#allocation3 + $0x20] sm:$0xff] %vm394_vm6, %v4127_v1 }
 0x176   :  { %398 = vst.msk [vmem:[#allocation3 + $0x18] sm:$0xff] %vm394_vm6, %v4133_v60  ;;  %3773 = vmatpush.bf16.msra.mxu2 %v3759_v16 }
 0x177   :  { %408 = vst.msk [vmem:[#allocation3 + $0x68] sm:$0xff] %vm394_vm6, %v4137_v61  ;;  %1044 = vmatpush.bf16.msrb.mxu0 %v3759_v16  ;;  %3774 = vmatpush.bf16.msra.mxu3 %v3759_v16 }
 0x178   :  { %409 = vst.msk [vmem:[#allocation3 + $0x70] sm:$0xff] %vm394_vm6, %v4141_v62  ;;  %3772 = vmatpush.bf16.msra.mxu1 %v3759_v16 }
 0x179   :  { %588 = vrot.lane.b32.xlu2 %v4089_v39, %s3803_s16  ;;  %427 = vrot.lane.b32.xlu1 %v4072_v29, %s3801_s3  ;;  %382 = vst.msk [vmem:[#allocation2 + $0xe0] sm:$0xff] %vm352_vm7, %v3808_v63 }
 0x17a   :  { %717 = vrot.lane.b32.xlu0 %v4067_v33, %s3804_s17  ;;  %383 = vst.msk [vmem:[#allocation2 + $0xe8] sm:$0x3] %vm354_vm8, %v3808_v63 }
 0x17b   :  { %384 = vst.msk [vmem:[#allocation2 + $0xf0] sm:$0xff] %vm352_vm7, %v3808_v63 }
 0x17c   :  { %385 = vst.msk [vmem:[#allocation2 + $0xf8] sm:$0x3] %vm354_vm8, %v3808_v63 }
 0x17d   :  { %386 = vst.msk [vmem:[#allocation2 + $0x100] sm:$0xff] %vm352_vm7, %v3808_v63 }
 0x17e   :  { %387 = vst.msk [vmem:[#allocation2 + $0x108] sm:$0x3] %vm354_vm8, %v3808_v63 }
 0x17f   :  { %388 = vst.msk [vmem:[#allocation2 + $0x110] sm:$0xff] %vm352_vm7, %v3808_v63 }
 0x180   :  { %389 = vst.msk [vmem:[#allocation2 + $0x118] sm:$0x3] %vm354_vm8, %v3808_v63 }
 0x181   :  { %849 = vrot.lane.b32.xlu2 %v4089_v39, %s3805_s18  ;;  %654 = vrot.lane.b32.xlu1 %v4089_v39, %s3800_s2  ;;  %390 = vst.msk [vmem:[#allocation2 + $0x120] sm:$0xff] %vm352_vm7, %v3808_v63 }
 0x182   :  { %784 = vrot.lane.b32.xlu0 %v4089_v39, %s3806_s19  ;;  %391 = vst.msk [vmem:[#allocation2 + $0x128] sm:$0x3] %vm354_vm8, %v3808_v63 }
 0x189   :  { %914 = vrot.lane.b32.xlu2 %v4089_v39, %s3807_s20  ;;  %719 = vrot.lane.b32.xlu1 %v4089_v39, %s3804_s17 }
 0x18a   :  { %509 = vrot.lane.b32.xlu0 %v4072_v29, %s3802_s15 }
 0x191   :  { %640 = vrot.lane.b32.xlu2 %v4072_v29, %s3800_s2  ;;  %576 = vrot.lane.b32.xlu1 %v4074_v30, %s3803_s16 }
 0x192   :  { %574 = vrot.lane.b32.xlu0 %v4072_v29, %s3803_s16 }
 0x199   :  { %707 = vrot.lane.b32.xlu2 %v4074_v30, %s3804_s17  ;;  %705 = vrot.lane.b32.xlu1 %v4072_v29, %s3804_s17 }
 0x19a   :  { %642 = vrot.lane.b32.xlu0 %v4074_v30, %s3800_s2 }
 0x1a1   :  { %837 = vrot.lane.b32.xlu2 %v4074_v30, %s3805_s18  ;;  %774 = vrot.lane.b32.xlu1 %v4076_v43, %s3806_s19 }
 0x1a2   :  { %772 = vrot.lane.b32.xlu0 %v4074_v30, %s3806_s19 }
 0x1a9   :  { %904 = vrot.lane.b32.xlu2 %v4076_v43, %s3807_s20  ;;  %902 = vrot.lane.b32.xlu1 %v4074_v30, %s3807_s20 }
 0x1aa   :  { %839 = vrot.lane.b32.xlu0 %v4076_v43, %s3805_s18 }
 0x1b1   :  { %590 = vrot.lane.b32.xlu2 %v4093_v48, %s3803_s16  ;;  %525 = vrot.lane.b32.xlu1 %v4093_v48, %s3802_s15 }
 0x1b2   :  { %443 = vrot.lane.b32.xlu0 %v4093_v48, %s3801_s3 }
 0x1b9   :  { %658 = vrot.lane.b32.xlu2 %v4098_v51, %s3800_s2  ;;  %656 = vrot.lane.b32.xlu1 %v4093_v48, %s3800_s2 }
 0x1ba   :  { %592 = vrot.lane.b32.xlu0 %v4098_v51, %s3803_s16 }
 0x1c1   :  { %429 = vrot.lane.b32.xlu2 %v4074_v30, %s3801_s3  ;;  %723 = vrot.lane.b32.xlu1 %v4098_v51, %s3804_s17 }
 0x1c2   :  { %721 = vrot.lane.b32.xlu0 %v4093_v48, %s3804_s17 }
 0x1c3   :  { %v4221_v0 = vpop.permute.xlu2 %652 }
 0x1c9   :  { %790 = vrot.lane.b32.xlu2 %v4103_v52, %s3806_s19  ;;  %788 = vrot.lane.b32.xlu1 %v4098_v51, %s3806_s19 }
 0x1ca   :  { %431 = vrot.lane.b32.xlu0 %v4076_v43, %s3801_s3 }
 0x1cb   :  { %v4245_v2 = vpop.permute.xlu2 %521 }
 0x1d1   :  { %449 = vrot.lane.b32.xlu2 %v4108_v56, %s3801_s3  ;;  %855 = vrot.lane.b32.xlu1 %v4103_v52, %s3805_s18 }
 0x1d2   :  { %853 = vrot.lane.b32.xlu0 %v4098_v51, %s3805_s18 }
 0x1d3   :  { %v589_v3 = vpop.permute.xlu2 %588 }
 0x1d9   :  { %513 = vrot.lane.b32.xlu2 %v4076_v43, %s3802_s15  ;;  %511 = vrot.lane.b32.xlu1 %v4074_v30, %s3802_s15 }
 0x1da   :  { %451 = vrot.lane.b32.xlu0 %v4113_v58, %s3801_s3 }
 0x1db   :  { %v4286_v5 = vpop.permute.xlu2 %849  ;;  %v440_v6 = vpop.permute.xlu1 %439 }
 0x1dc   :  { %482 = vst.msk [vmem:[#allocation2 + $0x82] sm:$0xff] %vm394_vm6, %v440_v6  ;;  %v438_v8 = vpop.permute.xlu0 %437 }
 0x1dd   :  { %499 = vst.msk [vmem:[#allocation2 + $0x81] sm:$0xff] %vm492_vm9, %v4067_v33 }
 0x1de   :  { %481 = vst.msk [vmem:[#allocation2 + $0x72] sm:$0xff] %vm394_vm6, %v438_v8 }
 0x1df   :  { %498 = vst.msk [vmem:[#allocation2 + $0x71] sm:$0xff] %vm492_vm9, %v4069_v42 }
 0x1e0   :  { %564 = vst.msk [vmem:[#allocation2 + $0x80] sm:$0xff] %vm557_vm11, %v4245_v2 }
 0x1e1   :  { %578 = vrot.lane.b32.xlu2 %v4076_v43, %s3803_s16  ;;  %920 = vrot.lane.b32.xlu1 %v4103_v52, %s3807_s20  ;;  %631 = vst.msk [vmem:[#allocation2 + $0x82] sm:$0xff] %vm623_vm12, %v589_v3 }
 0x1e2   :  { %918 = vrot.lane.b32.xlu0 %v4098_v51, %s3807_s20 }
 0x1e3   :  { %v915_v13 = vpop.permute.xlu2 %914  ;;  %v587_v14 = vpop.permute.xlu1 %586 }
 0x1e4   :  { %v520_v15 = vpop.permute.xlu0 %519 }
 0x1e5   :  { %563 = vst.msk [vmem:[#allocation2 + $0x70] sm:$0xff] %vm557_vm11, %v520_v15 }
 0x1e6   :  { %630 = vst.msk [vmem:[#allocation2 + $0x72] sm:$0xff] %vm623_vm12, %v587_v14 }
 0x1e7   :  { %695 = vst.msk [vmem:[#allocation2 + $0x71] sm:$0xff] %vm688_vm13, %v4221_v0 }
 0x1e9   :  { %435 = vrot.lane.b32.xlu2 %v4127_v1, %s3801_s3  ;;  %433 = vrot.lane.b32.xlu1 %v4133_v60, %s3801_s3 }
 0x1ea   :  { %580 = vrot.lane.b32.xlu0 %v4133_v60, %s3803_s16 }
 0x1eb   :  { %v641_v17 = vpop.permute.xlu2 %640  ;;  %v428_v18 = vpop.permute.xlu1 %427 }
 0x1ec   :  { %v718_v19 = vpop.permute.xlu0 %717  ;;  %476 = vst.msk [vmem:[#allocation2 + $0x22] sm:$0xff] %vm394_vm6, %v428_v18 }
 0x1ed   :  { %760 = vst.msk [vmem:[#allocation2 + $0x70] sm:$0xff] %vm753_vm14, %v718_v19 }
 0x1ee   :  { %493 = vst.msk [vmem:[#allocation2 + $0x21] sm:$0xff] %vm492_vm9, %v4072_v29 }
 0x1f1   :  { %644 = vrot.lane.b32.xlu2 %v4076_v43, %s3800_s2  ;;  %533 = vrot.lane.b32.xlu1 %v4113_v58, %s3802_s15 }
 0x1f2   :  { %531 = vrot.lane.b32.xlu0 %v4108_v56, %s3802_s15 }
 0x1f3   :  { %v708_v20 = vpop.permute.xlu2 %707  ;;  %v655_v21 = vpop.permute.xlu1 %654 }
 0x1f4   :  { %v785_v23 = vpop.permute.xlu0 %784  ;;  %696 = vst.msk [vmem:[#allocation2 + $0x81] sm:$0xff] %vm688_vm13, %v655_v21 }
 0x1f5   :  { %826 = vst.msk [vmem:[#allocation2 + $0x72] sm:$0xff] %vm818_vm15, %v785_v23 }
 0x1f6   :  { %891 = vst.msk [vmem:[#allocation2 + $0x71] sm:$0xff] %vm883_vm2, %v4286_v5 }
 0x1f7   :  { %956 = vst.msk [vmem:[#allocation2 + $0x70] sm:$0xff] %vm948_vm3, %v915_v13 }
 0x1f9   :  { %600 = vrot.lane.b32.xlu2 %v4137_v61, %s3803_s16  ;;  %598 = vrot.lane.b32.xlu1 %v4113_v58, %s3803_s16 }
 0x1fa   :  { %646 = vrot.lane.b32.xlu0 %v4133_v60, %s3800_s2 }
 0x1fb   :  { %v838_v25 = vpop.permute.xlu2 %837  ;;  %v720_v24 = vpop.permute.xlu1 %719 }
 0x1fc   :  { %v510_v26 = vpop.permute.xlu0 %509  ;;  %761 = vst.msk [vmem:[#allocation2 + $0x80] sm:$0xff] %vm753_vm14, %v720_v24 }
 0x1fd   :  { %558 = vst.msk [vmem:[#allocation2 + $0x20] sm:$0xff] %vm557_vm11, %v510_v26 }
 0x1fe   :  { %v971_v34 = vld [vmem:[#allocation2 + $0x71] sm:$0xff] }
 0x201   :  { %515 = vrot.lane.b32.xlu2 %v4133_v60, %s3802_s15  ;;  %711 = vrot.lane.b32.xlu1 %v4133_v60, %s3804_s17 }
 0x202   :  { %709 = vrot.lane.b32.xlu0 %v4076_v43, %s3804_s17 }
 0x203   :  { %v905_v27 = vpop.permute.xlu2 %904  ;;  %v577_v40 = vpop.permute.xlu1 %576  ;;  %v972_v41 = vld [vmem:[#allocation2 + $0x81] sm:$0xff] }
 0x204   :  { %v575_v35 = vpop.permute.xlu0 %574  ;;  %625 = vst.msk [vmem:[#allocation2 + $0x22] sm:$0xff] %vm623_vm12, %v577_v40  ;;  %v984_v28 = vpack.c.bf16 %v972_v41, %v971_v34 }
 0x205   :  { %624 = vst.msk [vmem:[#allocation2 + $0x12] sm:$0xff] %vm623_vm12, %v575_v35 }
 0x206   :  { %689 = vst.msk [vmem:[#allocation2 + $0x11] sm:$0xff] %vm688_vm13, %v641_v17  ;;  %3692 = vmatmul.msk.bf16.vlgmr.msra.gmra.mxu2 %vm352_vm7, %v984_v28 }
 0x209   :  { %666 = vrot.lane.b32.xlu2 %v4137_v61, %s3800_s2  ;;  %664 = vrot.lane.b32.xlu1 %v4113_v58, %s3800_s2 }
 0x20a   :  { %517 = vrot.lane.b32.xlu0 %v4127_v1, %s3802_s15 }
 0x20b   :  { %v591_v36 = vpop.permute.xlu2 %590  ;;  %v706_v37 = vpop.permute.xlu1 %705 }
 0x20c   :  { %632 = vst.msk [vmem:[#allocation2 + $0xb2] sm:$0xff] %vm623_vm12, %v591_v36  ;;  %v643_v44 = vpop.permute.xlu0 %642 }
 0x20d   :  { %690 = vst.msk [vmem:[#allocation2 + $0x21] sm:$0xff] %vm688_vm13, %v643_v44 }
 0x20e   :  { %755 = vst.msk [vmem:[#allocation2 + $0x20] sm:$0xff] %vm753_vm14, %v708_v20 }
 0x20f   :  { %754 = vst.msk [vmem:[#allocation2 + $0x10] sm:$0xff] %vm753_vm14, %v706_v37 }
 0x211   :  { %582 = vrot.lane.b32.xlu2 %v4127_v1, %s3803_s16  ;;  %778 = vrot.lane.b32.xlu1 %v4127_v1, %s3806_s19 }
 0x212   :  { %776 = vrot.lane.b32.xlu0 %v4133_v60, %s3806_s19 }
 0x213   :  { %v659_v38 = vpop.permute.xlu2 %658  ;;  %v775_v45 = vpop.permute.xlu1 %774 }
 0x214   :  { %v773_v47 = vpop.permute.xlu0 %772  ;;  %821 = vst.msk [vmem:[#allocation2 + $0x22] sm:$0xff] %vm818_vm15, %v775_v45 }
 0x215   :  { %820 = vst.msk [vmem:[#allocation2 + $0x12] sm:$0xff] %vm818_vm15, %v773_v47 }
 0x216   :  { %885 = vst.msk [vmem:[#allocation2 + $0x11] sm:$0xff] %vm883_vm2, %v838_v25 }
 0x219   :  { %731 = vrot.lane.b32.xlu2 %v4137_v61, %s3804_s17  ;;  %729 = vrot.lane.b32.xlu1 %v4113_v58, %s3804_s17 }
 0x21a   :  { %584 = vrot.lane.b32.xlu0 %v4069_v42, %s3803_s16 }
 0x21b   :  { %v430_v49 = vpop.permute.xlu2 %429  ;;  %v903_v46 = vpop.permute.xlu1 %902 }
 0x21c   :  { %477 = vst.msk [vmem:[#allocation2 + $0x32] sm:$0xff] %vm394_vm6, %v430_v49  ;;  %v840_v50 = vpop.permute.xlu0 %839 }
 0x21d   :  { %494 = vst.msk [vmem:[#allocation2 + $0x31] sm:$0xff] %vm492_vm9, %v4074_v30 }
 0x21e   :  { %886 = vst.msk [vmem:[#allocation2 + $0x21] sm:$0xff] %vm883_vm2, %v840_v50 }
 0x21f   :  { %951 = vst.msk [vmem:[#allocation2 + $0x20] sm:$0xff] %vm948_vm3, %v905_v27 }
 0x220   :  { %950 = vst.msk [vmem:[#allocation2 + $0x10] sm:$0xff] %vm948_vm3, %v903_v46 }
 0x221   :  { %648 = vrot.lane.b32.xlu2 %v4127_v1, %s3800_s2  ;;  %843 = vrot.lane.b32.xlu1 %v4127_v1, %s3805_s18 }
 0x222   :  { %841 = vrot.lane.b32.xlu0 %v4133_v60, %s3805_s18 }
 0x223   :  { %v791_v11 = vpop.permute.xlu2 %790  ;;  %v526_v53 = vpop.permute.xlu1 %525 }
 0x224   :  { %v444_v54 = vpop.permute.xlu0 %443 }
 0x225   :  { %484 = vst.msk [vmem:[#allocation2 + $0xc2] sm:$0xff] %vm394_vm6, %v444_v54 }
 0x226   :  { %501 = vst.msk [vmem:[#allocation2 + $0xc1] sm:$0xff] %vm492_vm9, %v4093_v48  ;;  %v966_v32 = vld [vmem:[#allocation2 + $0x21] sm:$0xff] }
 0x227   :  { %566 = vst.msk [vmem:[#allocation2 + $0xc0] sm:$0xff] %vm557_vm11, %v526_v53  ;;  %v965_v57 = vld [vmem:[#allocation2 + $0x11] sm:$0xff] }
 0x228   :  { %v981_v31 = vpack.c.bf16 %v966_v32, %v965_v57 }
 0x229   :  { %798 = vrot.lane.b32.xlu2 %v4141_v62, %s3806_s19  ;;  %796 = vrot.lane.b32.xlu1 %v4137_v61, %s3806_s19 }
 0x22a   :  { %3689 = vmatmul.msk.bf16.vlgmr.msrb.gmra.mxu0 %vm352_vm7, %v981_v31  ;;  %650 = vrot.lane.b32.xlu0 %v4069_v42, %s3800_s2 }
 0x22b   :  { %v450_v55 = vpop.permute.xlu2 %449  ;;  %v657_v63 = vpop.permute.xlu1 %656 }
 0x22c   :  { %487 = vst.msk [vmem:[#allocation2 + $0xf2] sm:$0xff] %vm394_vm6, %v450_v55  ;;  %v593_v0 = vpop.permute.xlu0 %592 }
 0x22d   :  { %504 = vst.msk [vmem:[#allocation2 + $0xf1] sm:$0xff] %vm492_vm9, %v4108_v56 }
 0x22e   :  { %633 = vst.msk [vmem:[#allocation2 + $0xc2] sm:$0xff] %vm623_vm12, %v593_v0 }
 0x22f   :  { %698 = vst.msk [vmem:[#allocation2 + $0xc1] sm:$0xff] %vm688_vm13, %v659_v38 }
 0x230   :  { %697 = vst.msk [vmem:[#allocation2 + $0xb1] sm:$0xff] %vm688_vm13, %v657_v63 }
 0x231   :  { %713 = vrot.lane.b32.xlu2 %v4127_v1, %s3804_s17  ;;  %908 = vrot.lane.b32.xlu1 %v4127_v1, %s3807_s20 }
 0x232   :  { %906 = vrot.lane.b32.xlu0 %v4133_v60, %s3807_s20 }
 0x233   :  { %v514_v2 = vpop.permute.xlu2 %513  ;;  %v724_v3 = vpop.permute.xlu1 %723 }
 0x234   :  { %v722_v4 = vpop.permute.xlu0 %721  ;;  %763 = vst.msk [vmem:[#allocation2 + $0xc0] sm:$0xff] %vm753_vm14, %v724_v3 }
 0x235   :  { %762 = vst.msk [vmem:[#allocation2 + $0xb0] sm:$0xff] %vm753_vm14, %v722_v4 }
 0x236   :  { %829 = vst.msk [vmem:[#allocation2 + $0xc2] sm:$0xff] %vm818_vm15, %v791_v11 }
 0x239   :  { %863 = vrot.lane.b32.xlu2 %v4141_v62, %s3805_s18  ;;  %861 = vrot.lane.b32.xlu1 %v4137_v61, %s3805_s18 }
 0x23a   :  { %715 = vrot.lane.b32.xlu0 %v4069_v42, %s3804_s17 }
 0x23b   :  { %v579_v5 = vpop.permute.xlu2 %578  ;;  %v789_v6 = vpop.permute.xlu1 %788 }
 0x23c   :  { %v432_v7 = vpop.permute.xlu0 %431  ;;  %828 = vst.msk [vmem:[#allocation2 + $0xb2] sm:$0xff] %vm818_vm15, %v789_v6 }
 0x23d   :  { %478 = vst.msk [vmem:[#allocation2 + $0x42] sm:$0xff] %vm394_vm6, %v432_v7 }
 0x23e   :  { %495 = vst.msk [vmem:[#allocation2 + $0x41] sm:$0xff] %vm492_vm9, %v4076_v43 }
 0x23f   :  { %560 = vst.msk [vmem:[#allocation2 + $0x40] sm:$0xff] %vm557_vm11, %v514_v2 }
 0x241   :  { %780 = vrot.lane.b32.xlu2 %v4069_v42, %s3806_s19  ;;  %447 = vrot.lane.b32.xlu1 %v4103_v52, %s3801_s3 }
 0x242   :  { %445 = vrot.lane.b32.xlu0 %v4098_v51, %s3801_s3 }
 0x243   :  { %v436_v8 = vpop.permute.xlu2 %435  ;;  %v856_v9 = vpop.permute.xlu1 %855 }
 0x244   :  { %480 = vst.msk [vmem:[#allocation2 + $0x62] sm:$0xff] %vm394_vm6, %v436_v8  ;;  %v854_v10 = vpop.permute.xlu0 %853 }
 0x245   :  { %497 = vst.msk [vmem:[#allocation2 + $0x61] sm:$0xff] %vm492_vm9, %v4127_v1 }
 0x246   :  { %893 = vst.msk [vmem:[#allocation2 + $0xb1] sm:$0xff] %vm883_vm2, %v854_v10 }
 0x247   :  { %894 = vst.msk [vmem:[#allocation2 + $0xc1] sm:$0xff] %vm883_vm2, %v856_v9 }
 0x249   :  { %928 = vrot.lane.b32.xlu2 %v4141_v62, %s3807_s20  ;;  %926 = vrot.lane.b32.xlu1 %v4137_v61, %s3807_s20 }
 0x24a   :  { %782 = vrot.lane.b32.xlu0 %v4067_v33, %s3806_s19 }
 0x24b   :  { %v645_v12 = vpop.permute.xlu2 %644  ;;  %v512_v13 = vpop.permute.xlu1 %511 }
 0x24c   :  { %v452_v14 = vpop.permute.xlu0 %451  ;;  %559 = vst.msk [vmem:[#allocation2 + $0x30] sm:$0xff] %vm557_vm11, %v512_v13 }
 0x24d   :  { %488 = vst.msk [vmem:[#allocation2 + $0x102] sm:$0xff] %vm394_vm6, %v452_v14 }
 0x24e   :  { %505 = vst.msk [vmem:[#allocation2 + $0x101] sm:$0xff] %vm492_vm9, %v4113_v58 }
 0x24f   :  { %626 = vst.msk [vmem:[#allocation2 + $0x32] sm:$0xff] %vm623_vm12, %v579_v5 }
 0x250   :  { %691 = vst.msk [vmem:[#allocation2 + $0x31] sm:$0xff] %vm688_vm13, %v645_v12 }
 0x251   :  { %527 = vrot.lane.b32.xlu2 %v4098_v51, %s3802_s15  ;;  %847 = vrot.lane.b32.xlu1 %v4067_v33, %s3805_s18 }
 0x252   :  { %845 = vrot.lane.b32.xlu0 %v4069_v42, %s3805_s18 }
 0x253   :  { %v601_v15 = vpop.permute.xlu2 %600  ;;  %v921_v16 = vpop.permute.xlu1 %920 }
 0x254   :  { %v919_v17 = vpop.permute.xlu0 %918  ;;  %959 = vst.msk [vmem:[#allocation2 + $0xc0] sm:$0xff] %vm948_vm3, %v921_v16 }
 0x255   :  { %958 = vst.msk [vmem:[#allocation2 + $0xb0] sm:$0xff] %vm948_vm3, %v919_v17 }
 0x259   :  { %912 = vrot.lane.b32.xlu2 %v4067_v33, %s3807_s20  ;;  %910 = vrot.lane.b32.xlu1 %v4069_v42, %s3807_s20 }
 0x25a   :  { %529 = vrot.lane.b32.xlu0 %v4103_v52, %s3802_s15 }
 0x25b   :  { %v516_v18 = vpop.permute.xlu2 %515  ;;  %v434_v19 = vpop.permute.xlu1 %433  ;;  %v974_v20 = vld [vmem:[#allocation2 + $0xc1] sm:$0xff] }
 0x25c   :  { %v581_v21 = vpop.permute.xlu0 %580  ;;  %479 = vst.msk [vmem:[#allocation2 + $0x52] sm:$0xff] %vm394_vm6, %v434_v19  ;;  %v973_v23 = vld [vmem:[#allocation2 + $0xb1] sm:$0xff] }
 0x25d   :  { %627 = vst.msk [vmem:[#allocation2 + $0x42] sm:$0xff] %vm623_vm12, %v581_v21  ;;  %v985_v25 = vpack.c.bf16 %v974_v20, %v973_v23 }
 0x25e   :  { %496 = vst.msk [vmem:[#allocation2 + $0x51] sm:$0xff] %vm492_vm9, %v4133_v60 }
 0x25f   :  { %561 = vst.msk [vmem:[#allocation2 + $0x50] sm:$0xff] %vm557_vm11, %v516_v18  ;;  %3693 = vmatmul.msk.bf16.gmra.mxu2 %vm352_vm7, %v985_v25 }
 0x261   :  { %660 = vrot.lane.b32.xlu2 %v4103_v52, %s3800_s2  ;;  %596 = vrot.lane.b32.xlu1 %v4108_v56, %s3803_s16 }
 0x262   :  { %594 = vrot.lane.b32.xlu0 %v4103_v52, %s3803_s16 }
 0x263   :  { %v667_v24 = vpop.permute.xlu2 %666  ;;  %v534_v26 = vpop.permute.xlu1 %533 }
 0x264   :  { %v532_v27 = vpop.permute.xlu0 %531  ;;  %570 = vst.msk [vmem:[#allocation2 + $0x100] sm:$0xff] %vm557_vm11, %v534_v26 }
 0x265   :  { %569 = vst.msk [vmem:[#allocation2 + $0xf0] sm:$0xff] %vm557_vm11, %v532_v27 }
 0x266   :  { %637 = vst.msk [vmem:[#allocation2 + $0x102] sm:$0xff] %vm623_vm12, %v601_v15 }
 0x267   :  { %702 = vst.msk [vmem:[#allocation2 + $0x101] sm:$0xff] %vm688_vm13, %v667_v24 }
 0x269   :  { %727 = vrot.lane.b32.xlu2 %v4108_v56, %s3804_s17  ;;  %725 = vrot.lane.b32.xlu1 %v4103_v52, %s3804_s17 }
 0x26a   :  { %662 = vrot.lane.b32.xlu0 %v4108_v56, %s3800_s2 }
 0x26b   :  { %v583_v40 = vpop.permute.xlu2 %582  ;;  %v599_v34 = vpop.permute.xlu1 %598 }
 0x26c   :  { %628 = vst.msk [vmem:[#allocation2 + $0x52] sm:$0xff] %vm623_vm12, %v583_v40  ;;  %v647_v41 = vpop.permute.xlu0 %646 }
 0x26d   :  { %692 = vst.msk [vmem:[#allocation2 + $0x41] sm:$0xff] %vm688_vm13, %v647_v41 }
 0x26e   :  { %636 = vst.msk [vmem:[#allocation2 + $0xf2] sm:$0xff] %vm623_vm12, %v599_v34 }
 0x271   :  { %857 = vrot.lane.b32.xlu2 %v4108_v56, %s3805_s18  ;;  %794 = vrot.lane.b32.xlu1 %v4113_v58, %s3806_s19 }
 0x272   :  { %792 = vrot.lane.b32.xlu0 %v4108_v56, %s3806_s19 }
 0x273   :  { %v732_v35 = vpop.permute.xlu2 %731  ;;  %v712_v28 = vpop.permute.xlu1 %711 }
 0x274   :  { %767 = vst.msk [vmem:[#allocation2 + $0x100] sm:$0xff] %vm753_vm14, %v732_v35  ;;  %v710_v36 = vpop.permute.xlu0 %709 }
 0x275   :  { %756 = vst.msk [vmem:[#allocation2 + $0x30] sm:$0xff] %vm753_vm14, %v710_v36 }
 0x276   :  { %757 = vst.msk [vmem:[#allocation2 + $0x40] sm:$0xff] %vm753_vm14, %v712_v28 }
 0x279   :  { %922 = vrot.lane.b32.xlu2 %v4108_v56, %s3807_s20  ;;  %453 = vrot.lane.b32.xlu1 %v4137_v61, %s3801_s3 }
 0x27a   :  { %859 = vrot.lane.b32.xlu0 %v4113_v58, %s3805_s18 }
 0x27b   :  { %v649_v37 = vpop.permute.xlu2 %648  ;;  %v665_v44 = vpop.permute.xlu1 %664 }
 0x27c   :  { %693 = vst.msk [vmem:[#allocation2 + $0x51] sm:$0xff] %vm688_vm13, %v649_v37  ;;  %v518_v38 = vpop.permute.xlu0 %517 }
 0x27d   :  { %562 = vst.msk [vmem:[#allocation2 + $0x60] sm:$0xff] %vm557_vm11, %v518_v38 }
 0x27e   :  { %701 = vst.msk [vmem:[#allocation2 + $0xf1] sm:$0xff] %vm688_vm13, %v665_v44 }
 0x281   :  { %455 = vrot.lane.b32.xlu2 %v4141_v62, %s3801_s3  ;;  %535 = vrot.lane.b32.xlu1 %v4137_v61, %s3802_s15 }
 0x282   :  { %924 = vrot.lane.b32.xlu0 %v4113_v58, %s3807_s20 }
 0x283   :  { %v799_v45 = vpop.permute.xlu2 %798  ;;  %v779_v47 = vpop.permute.xlu1 %778 }
 0x284   :  { %833 = vst.msk [vmem:[#allocation2 + $0x102] sm:$0xff] %vm818_vm15, %v799_v45  ;;  %v777_v49 = vpop.permute.xlu0 %776 }
 0x285   :  { %822 = vst.msk [vmem:[#allocation2 + $0x32] sm:$0xff] %vm818_vm15, %v777_v49 }
 0x286   :  { %823 = vst.msk [vmem:[#allocation2 + $0x42] sm:$0xff] %vm818_vm15, %v779_v47 }
 0x289   :  { %537 = vrot.lane.b32.xlu2 %v4141_v62, %s3802_s15  ;;  %668 = vrot.lane.b32.xlu1 %v4141_v62, %s3800_s2 }
 0x28a   :  { %602 = vrot.lane.b32.xlu0 %v4141_v62, %s3803_s16 }
 0x28b   :  { %v714_v46 = vpop.permute.xlu2 %713  ;;  %v730_v50 = vpop.permute.xlu1 %729 }
 0x28c   :  { %758 = vst.msk [vmem:[#allocation2 + $0x50] sm:$0xff] %vm753_vm14, %v714_v46  ;;  %v585_v11 = vpop.permute.xlu0 %584 }
 0x28d   :  { %629 = vst.msk [vmem:[#allocation2 + $0x62] sm:$0xff] %vm623_vm12, %v585_v11 }
 0x28e   :  { %766 = vst.msk [vmem:[#allocation2 + $0xf0] sm:$0xff] %vm753_vm14, %v730_v50 }
 0x291   :  { %800 = vrot.lane.b32.xlu2 %v4117_v59, %s3806_s19  ;;  %604 = vrot.lane.b32.xlu1 %v4117_v59, %s3803_s16 }
 0x292   :  { %733 = vrot.lane.b32.xlu0 %v4141_v62, %s3804_s17 }
 0x293   :  { %v864_v53 = vpop.permute.xlu2 %863  ;;  %v844_v54 = vpop.permute.xlu1 %843 }
 0x294   :  { %898 = vst.msk [vmem:[#allocation2 + $0x101] sm:$0xff] %vm883_vm2, %v864_v53  ;;  %v842_v32 = vpop.permute.xlu0 %841 }
 0x295   :  { %887 = vst.msk [vmem:[#allocation2 + $0x31] sm:$0xff] %vm883_vm2, %v842_v32 }
 0x296   :  { %888 = vst.msk [vmem:[#allocation2 + $0x41] sm:$0xff] %vm883_vm2, %v844_v54 }
 0x299   :  { %735 = vrot.lane.b32.xlu2 %v4117_v59, %s3804_s17  ;;  %865 = vrot.lane.b32.xlu1 %v4117_v59, %s3805_s18 }
 0x29a   :  { %670 = vrot.lane.b32.xlu0 %v4117_v59, %s3800_s2 }
 0x29b   :  { %v781_v57 = vpop.permute.xlu2 %780  ;;  %v797_v31 = vpop.permute.xlu1 %796 }
 0x29c   :  { %824 = vst.msk [vmem:[#allocation2 + $0x52] sm:$0xff] %vm818_vm15, %v781_v57  ;;  %v651_v55 = vpop.permute.xlu0 %650 }
 0x29d   :  { %694 = vst.msk [vmem:[#allocation2 + $0x61] sm:$0xff] %vm688_vm13, %v651_v55 }
 0x29e   :  { %832 = vst.msk [vmem:[#allocation2 + $0xf2] sm:$0xff] %vm818_vm15, %v797_v31 }
 0x2a2   :  { %930 = vrot.lane.b32.xlu0 %v4117_v59, %s3807_s20 }
 0x2a3   :  { %v929_v63 = vpop.permute.xlu2 %928  ;;  %v909_v0 = vpop.permute.xlu1 %908 }
 0x2a4   :  { %963 = vst.msk [vmem:[#allocation2 + $0x100] sm:$0xff] %vm948_vm3, %v929_v63  ;;  %v907_v2 = vpop.permute.xlu0 %906 }
 0x2a5   :  { %952 = vst.msk [vmem:[#allocation2 + $0x30] sm:$0xff] %vm948_vm3, %v907_v2 }
 0x2a6   :  { %953 = vst.msk [vmem:[#allocation2 + $0x40] sm:$0xff] %vm948_vm3, %v909_v0 }
 0x2ab   :  { %v528_v3 = vpop.permute.xlu2 %527  ;;  %v862_v4 = vpop.permute.xlu1 %861  ;;  %v978_v19 = vld [vmem:[#allocation2 + $0x101] sm:$0xff] }
 0x2ac   :  { %v716_v5 = vpop.permute.xlu0 %715  ;;  %897 = vst.msk [vmem:[#allocation2 + $0xf1] sm:$0xff] %vm883_vm2, %v862_v4  ;;  %v967_v6 = vld [vmem:[#allocation2 + $0x31] sm:$0xff] }
 0x2ad   :  { %759 = vst.msk [vmem:[#allocation2 + $0x60] sm:$0xff] %vm753_vm14, %v716_v5  ;;  %v968_v7 = vld [vmem:[#allocation2 + $0x41] sm:$0xff] }
 0x2ae   :  { %v982_v8 = vpack.c.bf16 %v968_v7, %v967_v6 }
 0x2b0   :  { %3690 = vmatmul.msk.bf16.gmra.mxu0 %vm352_vm7, %v982_v8  ;;  %v4612_v8 = vpop.f32.mrf.mxu0 }
 0x2b3   :  { %v913_v9 = vpop.permute.xlu2 %912  ;;  %v448_v10 = vpop.permute.xlu1 %447 }
 0x2b4   :  { %v446_v12 = vpop.permute.xlu0 %445  ;;  %486 = vst.msk [vmem:[#allocation2 + $0xe2] sm:$0xff] %vm394_vm6, %v448_v10 }
 0x2b5   :  { %485 = vst.msk [vmem:[#allocation2 + $0xd2] sm:$0xff] %vm394_vm6, %v446_v12 }
 0x2b6   :  { %502 = vst.msk [vmem:[#allocation2 + $0xd1] sm:$0xff] %vm492_vm9, %v4098_v51 }
 0x2b7   :  { %567 = vst.msk [vmem:[#allocation2 + $0xd0] sm:$0xff] %vm557_vm11, %v528_v3 }
 0x2b8   :  { %503 = vst.msk [vmem:[#allocation2 + $0xe1] sm:$0xff] %vm492_vm9, %v4103_v52  ;;  %v4616_v10 = vpop.f32.mrf.mxu0 }
 0x2bb   :  { %v661_v13 = vpop.permute.xlu2 %660  ;;  %v927_v14 = vpop.permute.xlu1 %926 }
 0x2bc   :  { %v783_v15 = vpop.permute.xlu0 %782  ;;  %962 = vst.msk [vmem:[#allocation2 + $0xf0] sm:$0xff] %vm948_vm3, %v927_v14 }
 0x2bd   :  { %825 = vst.msk [vmem:[#allocation2 + $0x62] sm:$0xff] %vm818_vm15, %v783_v15 }
 0x2c3   :  { %v728_v16 = vpop.permute.xlu2 %727  ;;  %v848_v17 = vpop.permute.xlu1 %847  ;;  %v977_v18 = vld [vmem:[#allocation2 + $0xf1] sm:$0xff] }
 0x2c4   :  { %v846_v20 = vpop.permute.xlu0 %845  ;;  %890 = vst.msk [vmem:[#allocation2 + $0x61] sm:$0xff] %vm883_vm2, %v848_v17  ;;  %v987_v21 = vpack.c.bf16 %v978_v19, %v977_v18  ;;  %v1088_v18 = vsel %vm394_vm6, %v4612_v8, 0.0 }
 0x2c5   :  { %889 = vst.msk [vmem:[#allocation2 + $0x51] sm:$0xff] %vm883_vm2, %v846_v20 }
 0x2c6   :  { %955 = vst.msk [vmem:[#allocation2 + $0x60] sm:$0xff] %vm948_vm3, %v913_v9  ;;  %3695 = vmatmul.msk.bf16.vlgmr.msra.gmra.mxu3 %vm352_vm7, %v987_v21  ;;  %v4614_v9 = vpop.f32.mrf.mxu2 }
 0x2cb   :  { %v858_v23 = vpop.permute.xlu2 %857  ;;  %v911_v25 = vpop.permute.xlu1 %910 }
 0x2cc   :  { %v530_v24 = vpop.permute.xlu0 %529  ;;  %954 = vst.msk [vmem:[#allocation2 + $0x50] sm:$0xff] %vm948_vm3, %v911_v25 }
 0x2cd   :  { %568 = vst.msk [vmem:[#allocation2 + $0xe0] sm:$0xff] %vm557_vm11, %v530_v24  ;;  %v970_v34 = vld [vmem:[#allocation2 + $0x61] sm:$0xff] }
 0x2ce   :  { %v4618_v12 = vpop.f32.mrf.mxu2 }
 0x2d3   :  { %v923_v26 = vpop.permute.xlu2 %922  ;;  %v597_v27 = vpop.permute.xlu1 %596  ;;  %v969_v40 = vld [vmem:[#allocation2 + $0x51] sm:$0xff] }
 0x2d4   :  { %v595_v41 = vpop.permute.xlu0 %594  ;;  %635 = vst.msk [vmem:[#allocation2 + $0xe2] sm:$0xff] %vm623_vm12, %v597_v27  ;;  %v983_v35 = vpack.c.bf16 %v970_v34, %v969_v40 }
 0x2d5   :  { %634 = vst.msk [vmem:[#allocation2 + $0xd2] sm:$0xff] %vm623_vm12, %v595_v41 }
 0x2d6   :  { %699 = vst.msk [vmem:[#allocation2 + $0xd1] sm:$0xff] %vm688_vm13, %v661_v13  ;;  %3691 = vmatmul.msk.bf16.vlgmr.msra.gmra.mxu1 %vm352_vm7, %v983_v35  ;;  %v1099_v35 = vsel %vm394_vm6, %v4614_v9, 0.0 }
 0x2db   :  { %v456_v28 = vpop.permute.xlu2 %455  ;;  %v726_v36 = vpop.permute.xlu1 %725 }
 0x2dc   :  { %490 = vst.msk [vmem:[#allocation2 + $0x122] sm:$0xff] %vm394_vm6, %v456_v28  ;;  %v663_v37 = vpop.permute.xlu0 %662 }
 0x2dd   :  { %507 = vst.msk [vmem:[#allocation2 + $0x121] sm:$0xff] %vm492_vm9, %v4141_v62 }
 0x2de   :  { %700 = vst.msk [vmem:[#allocation2 + $0xe1] sm:$0xff] %vm688_vm13, %v663_v37 }
 0x2df   :  { %765 = vst.msk [vmem:[#allocation2 + $0xe0] sm:$0xff] %vm753_vm14, %v728_v16  ;;  %v1089_v16 = vsel %vm394_vm6, %v4616_v10, 0.0 }
 0x2e0   :  { %764 = vst.msk [vmem:[#allocation2 + $0xd0] sm:$0xff] %vm753_vm14, %v726_v36  ;;  %v1090_v20 = vadd.f32 %v1089_v16, %v1088_v18 }
 0x2e2   :  { %v4624_v15 = vpop.f32.mrf.mxu2 }
 0x2e3   :  { %v538_v44 = vpop.permute.xlu2 %537  ;;  %v795_v38 = vpop.permute.xlu1 %794 }
 0x2e4   :  { %572 = vst.msk [vmem:[#allocation2 + $0x120] sm:$0xff] %vm557_vm11, %v538_v44  ;;  %v793_v45 = vpop.permute.xlu0 %792  ;;  %v1101_v44 = vsel %vm394_vm6, %v4618_v12, 0.0 }
 0x2e5   :  { %830 = vst.msk [vmem:[#allocation2 + $0xd2] sm:$0xff] %vm818_vm15, %v793_v45  ;;  %v1103_v45 = vsel %vm394_vm6, %v4624_v15, 0.0 }
 0x2e6   :  { %895 = vst.msk [vmem:[#allocation2 + $0xd1] sm:$0xff] %vm883_vm2, %v858_v23 }
 0x2e7   :  { %960 = vst.msk [vmem:[#allocation2 + $0xd0] sm:$0xff] %vm948_vm3, %v923_v26 }
 0x2e8   :  { %831 = vst.msk [vmem:[#allocation2 + $0xe2] sm:$0xff] %vm818_vm15, %v795_v38 }
 0x2ea   :  { %v4640_v26 = vpop.f32.mrf.mxu2 }
 0x2eb   :  { %v454_v47 = vpop.permute.xlu1 %453  ;;  %v801_v31 = vpop.permute.xlu2 %800 }
 0x2ec   :  { %v860_v49 = vpop.permute.xlu0 %859  ;;  %489 = vst.msk [vmem:[#allocation2 + $0x112] sm:$0xff] %vm394_vm6, %v454_v47 }
 0x2ed   :  { %896 = vst.msk [vmem:[#allocation2 + $0xe1] sm:$0xff] %vm883_vm2, %v860_v49 }
 0x2ee   :  { %506 = vst.msk [vmem:[#allocation2 + $0x111] sm:$0xff] %vm492_vm9, %v4137_v61  ;;  %v975_v54 = vld [vmem:[#allocation2 + $0xd1] sm:$0xff] }
 0x2f3   :  { %v536_v46 = vpop.permute.xlu1 %535  ;;  %v736_v3 = vpop.permute.xlu2 %735 }
 0x2f4   :  { %v925_v50 = vpop.permute.xlu0 %924  ;;  %571 = vst.msk [vmem:[#allocation2 + $0x110] sm:$0xff] %vm557_vm11, %v536_v46 }
 0x2f5   :  { %961 = vst.msk [vmem:[#allocation2 + $0xe0] sm:$0xff] %vm948_vm3, %v925_v50  ;;  %v1105_v50 = vsel %vm394_vm6, %v4640_v26, 0.0 }
 0x2fb   :  { %v669_v11 = vpop.permute.xlu1 %668 }
 0x2fc   :  { %v603_v53 = vpop.permute.xlu0 %602  ;;  %v976_v32 = vld [vmem:[#allocation2 + $0xe1] sm:$0xff] }
 0x2fd   :  { %638 = vst.msk [vmem:[#allocation2 + $0x112] sm:$0xff] %vm623_vm12, %v603_v53  ;;  %v986_v57 = vpack.c.bf16 %v976_v32, %v975_v54 }
 0x2fe   :  { %703 = vst.msk [vmem:[#allocation2 + $0x111] sm:$0xff] %vm688_vm13, %v669_v11 }
 0x2ff   :  { %3694 = vmatmul.msk.bf16.gmra.mxu2 %vm352_vm7, %v986_v57 }
 0x303   :  { %v605_v55 = vpop.permute.xlu1 %604 }
 0x304   :  { %v734_v63 = vpop.permute.xlu0 %733  ;;  %639 = vst.msk [vmem:[#allocation2 + $0x122] sm:$0xff] %vm623_vm12, %v605_v55 }
 0x305   :  { %768 = vst.msk [vmem:[#allocation2 + $0x110] sm:$0xff] %vm753_vm14, %v734_v63 }
 0x306   :  { %834 = vst.msk [vmem:[#allocation2 + $0x112] sm:$0xff] %vm818_vm15, %v801_v31 }
 0x30b   :  { %v866_v0 = vpop.permute.xlu1 %865 }
 0x30c   :  { %v671_v2 = vpop.permute.xlu0 %670  ;;  %899 = vst.msk [vmem:[#allocation2 + $0x111] sm:$0xff] %vm883_vm2, %v866_v0 }
 0x30d   :  { %704 = vst.msk [vmem:[#allocation2 + $0x121] sm:$0xff] %vm688_vm13, %v671_v2 }
 0x30e   :  { %769 = vst.msk [vmem:[#allocation2 + $0x120] sm:$0xff] %vm753_vm14, %v736_v3 }
 0x314   :  { %v931_v4 = vpop.permute.xlu0 %930 }
 0x315   :  { %964 = vst.msk [vmem:[#allocation2 + $0x110] sm:$0xff] %vm948_vm3, %v931_v4  ;;  %v980_v6 = vld [vmem:[#allocation2 + $0x121] sm:$0xff] }
 0x31c   :  { %v979_v5 = vld [vmem:[#allocation2 + $0x111] sm:$0xff] }
 0x31d   :  { %v988_v7 = vpack.c.bf16 %v980_v6, %v979_v5 }
 0x31f   :  { %3696 = vmatmul.msk.bf16.gmra.mxu3 %vm352_vm7, %v988_v7 }
 0x32d   :  { %v4620_v13 = vpop.f32.mrf.mxu0 }
 0x32e   :  { %v1091_v19 = vsel %vm394_vm6, %v4620_v13, 0.0 }
 0x32f   :  { %v1092_v23 = vadd.f32 %v1091_v19, %v1090_v20 }
 0x335   :  { %v4628_v17 = vpop.f32.mrf.mxu0 }
 0x336   :  { %v1093_v21 = vsel %vm394_vm6, %v4628_v17, 0.0 }
 0x337   :  { %v1094_v27 = vadd.f32 %v1093_v21, %v1092_v23 }
 0x349   :  { %v4646_v28 = vpop.f32.mrf.mxu3 }
 0x34a   :  { %v1111_v55 = vsel %vm394_vm6, %v4646_v28, 0.0 }
 0x351   :  { %v4654_v49 = vpop.f32.mrf.mxu3 }
 0x352   :  { %v1113_v0 = vsel %vm394_vm6, %v4654_v49, 0.0 }
 0x353   :  { %v4622_v14 = vpop.f32.mrf.mxu1 }
 0x354   :  { %v1095_v24 = vsel %vm394_vm6, %v4622_v14, 0.0 }
 0x355   :  { %v1096_v34 = vadd.f32 %v1095_v24, %v1094_v27 }
 0x35b   :  { %v4636_v25 = vpop.f32.mrf.mxu1 }
 0x35c   :  { %v1097_v40 = vsel %vm394_vm6, %v4636_v25, 0.0 }
 0x35d   :  { %v1098_v41 = vadd.f32 %v1097_v40, %v1096_v34 }
 0x35f   :  { %v1100_v36 = vadd.f32 %v1099_v35, %v1098_v41 }
 0x361   :  { %v1102_v38 = vadd.f32 %v1101_v44, %v1100_v36 }
 0x363   :  { %v1104_v47 = vadd.f32 %v1103_v45, %v1102_v38 }
 0x365   :  { %v1106_v53 = vadd.f32 %v1105_v50, %v1104_v47 }
 0x382   :  { %v4648_v37 = vpop.f32.mrf.mxu2 }
 0x383   :  { %v1107_v11 = vsel %vm394_vm6, %v4648_v37, 0.0 }
 0x384   :  { %v1108_v32 = vadd.f32 %v1107_v11, %v1106_v53 }
 0x38a   :  { %v4656_v46 = vpop.f32.mrf.mxu2 }
 0x38b   :  { %v1109_v54 = vsel %vm394_vm6, %v4656_v46, 0.0 }
 0x38c   :  { %v1110_v57 = vadd.f32 %v1109_v54, %v1108_v32 }
 0x38e   :  { %v1112_v63 = vadd.f32 %v1111_v55, %v1110_v57 }
 0x390   :  { %v1114_v3 = vadd.f32 %v1113_v0, %v1112_v63 }
 0x3a2   :  { %v4664_v31 = vpop.f32.mrf.mxu3 }
 0x3a3   :  { %v1115_v2 = vsel %vm394_vm6, %v4664_v31, 0.0 }
 0x3a4   :  { %v1116_v4 = vadd.f32 %v1115_v2, %v1114_v3 }
 0x3aa   :  { %v4672_v5 = vpop.f32.mrf.mxu3 }
 0x3ab   :  { %v1117_v6 = vsel %vm394_vm6, %v4672_v5, 0.0 }
 0x3ac   :  { %v1118_v7 = vadd.f32 %v1117_v6, %v1116_v4 }
 0x3ae   :  { %v1119_v16 = vrot.slane %v1118_v7, 4 }
 0x3b0   :  { %v1120_v18 = vadd.f32 %v1119_v16, %v1118_v7 }
 0x3b2   :  { %v1121_v19 = vrot.slane %v1120_v18, 2 }
 0x3b4   :  { %v1122_v20 = vadd.f32 %v1121_v19, %v1120_v18 }
 0x3b6   :  { %v1123_v21 = vrot.slane %v1122_v20, 1 }
 0x3b8   :  { %v1124_v23 = vadd.f32 %v1123_v21, %v1122_v20 }
 0x3ba   :  { %v4677_v24 = vmul.f32 %v1124_v23, %v3998_v22 }
 0x3bc   :  { %v1126_v27 = vsub.f32 %v4612_v8, %v4677_v24  ;;  %v1127_v40 = vsub.f32 %v4616_v10, %v4677_v24  ;;  %v1128_v34 = vsub.f32 %v4620_v13, %v4677_v24  ;;  %v1129_v41 = vsub.f32 %v4628_v17, %v4677_v24 }
 0x3bd   :  { %v1130_v44 = vsub.f32 %v4622_v14, %v4677_v24  ;;  %v1131_v45 = vsub.f32 %v4636_v25, %v4677_v24  ;;  %v1132_v54 = vsub.f32 %v4614_v9, %v4677_v24  ;;  %v1133_v63 = vsub.f32 %v4618_v12, %v4677_v24 }
 0x3be   :  { %v1142_v35 = vmul.f32 %v1126_v27, %v1126_v27  ;;  %v1143_v36 = vmul.f32 %v1127_v40, %v1127_v40  ;;  %v1144_v38 = vmul.f32 %v1128_v34, %v1128_v34  ;;  %v1145_v47 = vmul.f32 %v1129_v41, %v1129_v41 }
 0x3bf   :  { %v1146_v32 = vmul.f32 %v1130_v44, %v1130_v44  ;;  %v1147_v0 = vmul.f32 %v1131_v45, %v1131_v45  ;;  %v1134_v4 = vsub.f32 %v4624_v15, %v4677_v24  ;;  %v1148_v6 = vmul.f32 %v1132_v54, %v1132_v54 }
 0x3c0   :  { %v1158_v50 = vsel %vm394_vm6, %v1142_v35, 0.0  ;;  %v1159_v11 = vsel %vm394_vm6, %v1143_v36, 0.0  ;;  %v1161_v57 = vsel %vm394_vm6, %v1144_v38, 0.0  ;;  %v1163_v2 = vsel %vm394_vm6, %v1145_v47, 0.0 }
 0x3c1   :  { %v1160_v53 = vadd.f32 %v1159_v11, %v1158_v50  ;;  %v1165_v7 = vsel %vm394_vm6, %v1146_v32, 0.0  ;;  %v1135_v18 = vsub.f32 %v4640_v26, %v4677_v24  ;;  %v1149_v19 = vmul.f32 %v1133_v63, %v1133_v63 }
 0x3c2   :  { %v1167_v20 = vsel %vm394_vm6, %v1147_v0, 0.0  ;;  %v1136_v23 = vsub.f32 %v4648_v37, %v4677_v24  ;;  %v1150_v27 = vmul.f32 %v1134_v4, %v1134_v4  ;;  %v1169_v40 = vsel %vm394_vm6, %v1148_v6, 0.0 }
 0x3c3   :  { %v1162_v55 = vadd.f32 %v1161_v57, %v1160_v53  ;;  %v1137_v41 = vsub.f32 %v4656_v46, %v4677_v24  ;;  %v1151_v35 = vmul.f32 %v1135_v18, %v1135_v18  ;;  %v1171_v36 = vsel %vm394_vm6, %v1149_v19, 0.0 }
 0x3c4   :  { %v1138_v38 = vsub.f32 %v4646_v28, %v4677_v24  ;;  %v1152_v45 = vmul.f32 %v1136_v23, %v1136_v23  ;;  %v1173_v47 = vsel %vm394_vm6, %v1150_v27, 0.0  ;;  %v1139_v11 = vsub.f32 %v4654_v49, %v4677_v24 }
 0x3c5   :  { %v1164_v3 = vadd.f32 %v1163_v2, %v1162_v55  ;;  %v1153_v53 = vmul.f32 %v1137_v41, %v1137_v41  ;;  %v1175_v54 = vsel %vm394_vm6, %v1151_v35, 0.0  ;;  %v1140_v57 = vsub.f32 %v4664_v31, %v4677_v24 }
 0x3c6   :  { %v1154_v55 = vmul.f32 %v1138_v38, %v1138_v38  ;;  %v1177_v63 = vsel %vm394_vm6, %v1152_v45, 0.0  ;;  %v1141_v2 = vsub.f32 %v4672_v5, %v4677_v24 }
 0x3c7   :  { %v1166_v16 = vadd.f32 %v1165_v7, %v1164_v3  ;;  %v1155_v3 = vmul.f32 %v1139_v11, %v1139_v11  ;;  %v1179_v4 = vsel %vm394_vm6, %v1153_v53, 0.0  ;;  %v1156_v7 = vmul.f32 %v1140_v57, %v1140_v57 }
 0x3c8   :  { %v1157_v19 = vmul.f32 %v1141_v2, %v1141_v2 }
 0x3c9   :  { %v1168_v21 = vadd.f32 %v1167_v20, %v1166_v16  ;;  %v1181_v16 = vsel %vm394_vm6, %v1154_v55, 0.0  ;;  %v1183_v20 = vsel %vm394_vm6, %v1155_v3, 0.0  ;;  %v1185_v23 = vsel %vm394_vm6, %v1156_v7, 0.0  ;;  %v1086_v55 = vld [vmem:[%s6735_s5] sm:$0x1] }
 0x3ca   :  { %v1087_v3 = vld [vmem:[%s6736_s6] sm:$0x1] }
 0x3cb   :  { %v1170_v34 = vadd.f32 %v1169_v40, %v1168_v21  ;;  %v1187_v40 = vsel %vm394_vm6, %v1157_v19, 0.0 }
 0x3cd   :  { %v1172_v44 = vadd.f32 %v1171_v36, %v1170_v34 }
 0x3cf   :  { %v1174_v50 = vadd.f32 %v1173_v47, %v1172_v44 }
 0x3d1   :  { %v1176_v32 = vadd.f32 %v1175_v54, %v1174_v50 }
 0x3d3   :  { %v1178_v0 = vadd.f32 %v1177_v63, %v1176_v32 }
 0x3d5   :  { %v1180_v6 = vadd.f32 %v1179_v4, %v1178_v0 }
 0x3d7   :  { %v1182_v18 = vadd.f32 %v1181_v16, %v1180_v6 }
 0x3d9   :  { %v1184_v21 = vadd.f32 %v1183_v20, %v1182_v18 }
 0x3db   :  { %v1186_v27 = vadd.f32 %v1185_v23, %v1184_v21 }
 0x3dd   :  { %v1188_v34 = vadd.f32 %v1187_v40, %v1186_v27 }
 0x3df   :  { %v1189_v41 = vrot.slane %v1188_v34, 4 }
 0x3e1   :  { %v1190_v35 = vadd.f32 %v1189_v41, %v1188_v34 }
 0x3e3   :  { %v1191_v36 = vrot.slane %v1190_v35, 2 }
 0x3e5   :  { %v1192_v44 = vadd.f32 %v1191_v36, %v1190_v35 }
 0x3e7   :  { %v1193_v38 = vrot.slane %v1192_v44, 1 }
 0x3e9   :  { %v1194_v45 = vadd.f32 %v1193_v38, %v1192_v44 }
 0x3eb   :  { %v1195_v47 = vmul.f32 %v1194_v45, %v3998_v22 }
 0x3ed   :  { %v1196_v50 = vadd.f32 1e-05, %v1195_v47 }
 0x3ef   :  { %3791 = vrsqrt.f32 %v1196_v50  ;;  %vm1203_vm5 = vweird.f32 %v1196_v50 }
 0x3f5   :  { %v3792_v11 = vpop.eup %3791 }
 0x3f6   :  { %v1198_v53 = vmul.f32 %v3792_v11, %v1196_v50  ;;  %vm1204_vm4 = vweird.f32 %v3792_v11 }
 0x3f7   :  { %vm1205_vm8 = vmor %vm1203_vm5, %vm1204_vm4 }
 0x3f8   :  { %v1199_v54 = vmul.f32 %v3792_v11, %v1198_v53 }
 0x3fa   :  { %v1200_v32 = vmul.f32 0.5, %v1199_v54 }
 0x3fc   :  { %v1201_v57 = vsub.f32 1.5, %v1200_v32 }
 0x3fe   :  { %v1202_v63 = vmul.f32 %v3792_v11, %v1201_v57 }
 0x400   :  { %v1206_v0 = vsel %vm1205_vm8, %v3792_v11, %v1202_v63 }
 0x401   :  { %v1207_v2 = vmul.f32 %v1206_v0, %v1086_v55 }
 0x403   :  { %v1208_v4 = vmul.f32 %v1207_v2, %v4677_v24  ;;  %v1211_v6 = vperm.slane %v1207_v2, 0 }
 0x405   :  { %v1209_v7 = vsub.f32 %v1087_v3, %v1208_v4  ;;  %v1215_v18 = vmul.f32 %v1211_v6, %v4620_v13  ;;  %v1214_v19 = vmul.f32 %v1211_v6, %v4616_v10  ;;  %v1213_v20 = vmul.f32 %v1211_v6, %v4612_v8 }
 0x406   :  { %v1218_v8 = vmul.f32 %v1211_v6, %v4636_v25  ;;  %v1217_v10 = vmul.f32 %v1211_v6, %v4622_v14  ;;  %v1216_v13 = vmul.f32 %v1211_v6, %v4628_v17  ;;  %v1221_v14 = vmul.f32 %v1211_v6, %v4624_v15 }
 0x407   :  { %v1230_v16 = vperm.slane %v1209_v7, 0  ;;  %v1219_v17 = vmul.f32 %v1211_v6, %v4614_v9  ;;  %v1223_v15 = vmul.f32 %v1211_v6, %v4648_v37  ;;  %v1220_v9 = vmul.f32 %v1211_v6, %v4618_v12 }
 0x408   :  { %v1225_v37 = vmul.f32 %v1211_v6, %v4646_v28  ;;  %v1222_v12 = vmul.f32 %v1211_v6, %v4640_v26  ;;  %v1227_v28 = vmul.f32 %v1211_v6, %v4664_v31  ;;  %v1224_v26 = vmul.f32 %v1211_v6, %v4656_v46 }
 0x409   :  { %v4738_v21 = vadd.f32 %v1230_v16, %v1215_v18  ;;  %v4740_v23 = vadd.f32 %v1230_v16, %v1214_v19  ;;  %v4742_v27 = vadd.f32 %v1230_v16, %v1213_v20  ;;  %v4759_v41 = vadd.f32 %v1230_v16, %v1218_v8 }
 0x40a   :  { %v4761_v35 = vadd.f32 %v1230_v16, %v1217_v10  ;;  %v4763_v36 = vadd.f32 %v1230_v16, %v1216_v13  ;;  %v4779_v45 = vadd.f32 %v1230_v16, %v1221_v14  ;;  %v4781_v47 = vadd.f32 %v1230_v16, %v1219_v17 }
 0x40b   :  { %v6755_v40 = vmax.f32 %v4738_v21, 0.0  ;;  %v6753_v34 = vmax.f32 %v4740_v23, 0.0  ;;  %v6756_v24 = vmax.f32 %v4742_v27, 0.0  ;;  %6787 = vst [vmem:[#allocation4_spill] sm:$0xff] %v4759_v41  ;;  %v6746_v44 = vmax.f32 %v4759_v41, 0.0 }
 0x40c   :  { %6788 = vst [vmem:[#allocation5_spill] sm:$0xff] %v4763_v36  ;;  %v6754_v38 = vmax.f32 %v4761_v35, 0.0  ;;  %v6747_v25 = vmax.f32 %v4763_v36, 0.0  ;;  %v6751_v50 = vmax.f32 %v4779_v45, 0.0  ;;  %v6752_v11 = vmax.f32 %v4781_v47, 0.0 }
 0x40d   :  { %1348 = vrot.lane.b32.xlu0 %v6755_v40, %s3803_s16  ;;  %1346 = vrot.lane.b32.xlu2 %v6753_v34, %s3803_s16  ;;  %v4793_v53 = vadd.f32 %v1230_v16, %v1223_v15  ;;  %v4795_v54 = vadd.f32 %v1230_v16, %v1220_v9  ;;  %v4807_v55 = vadd.f32 %v1230_v16, %v1225_v37 }
 0x40e   :  { %1344 = vrot.lane.b32.xlu1 %v6756_v24, %s3803_s16  ;;  %v4809_v63 = vadd.f32 %v1230_v16, %v1222_v12  ;;  %v4821_v3 = vadd.f32 %v1230_v16, %v1227_v28  ;;  %v4823_v4 = vadd.f32 %v1230_v16, %v1224_v26  ;;  %v1228_v19 = vmul.f32 %v1211_v6, %v4672_v5 }
 0x40f   :  { %6789 = vst [vmem:[#allocation6_spill] sm:$0xff] %v4795_v54  ;;  %v6750_v32 = vmax.f32 %v4793_v53, 0.0  ;;  %v6745_v57 = vmax.f32 %v4795_v54, 0.0  ;;  %v6749_v0 = vmax.f32 %v4807_v55, 0.0  ;;  %v1226_v46 = vmul.f32 %v1211_v6, %v4654_v49 }
 0x410   :  { %6790 = vst [vmem:[#allocation7_spill] sm:$0xff] %v4809_v63  ;;  %v6744_v2 = vmax.f32 %v4809_v63, 0.0  ;;  %v6748_v7 = vmax.f32 %v4821_v3, 0.0  ;;  %v6743_v18 = vmax.f32 %v4823_v4, 0.0  ;;  %v4835_v31 = vadd.f32 %v1230_v16, %v1228_v19 }
 0x411   :  { %6791 = vst [vmem:[#allocation8_spill] sm:$0xff] %v4821_v3  ;;  %v4837_v20 = vadd.f32 %v1230_v16, %v1226_v46 }
 0x412   :  { %6792 = vst [vmem:[#allocation9_spill] sm:$0xff] %v4823_v4  ;;  %v6741_v8 = vmax.f32 %v4835_v31, 0.0 }
 0x413   :  { %6793 = vst [vmem:[#allocation10_spill] sm:$0xff] %v4835_v31  ;;  %v6742_v10 = vmax.f32 %v4837_v20, 0.0 }
 0x414   :  { %6794 = vst [vmem:[#allocation11_spill] sm:$0xff] %v4837_v20 }
 0x415   :  { %1354 = vrot.lane.b32.xlu0 %v6746_v44, %s3803_s16  ;;  %1352 = vrot.lane.b32.xlu2 %v6754_v38, %s3803_s16 }
 0x416   :  { %1350 = vrot.lane.b32.xlu1 %v6747_v25, %s3803_s16 }
 0x41d   :  { %1360 = vrot.lane.b32.xlu2 %v6751_v50, %s3803_s16  ;;  %v3762_v50 = vld [vmem:[%s6734_s4 + $0x1c] sm:$0xff] }
 0x41e   :  { %1356 = vrot.lane.b32.xlu1 %v6752_v11, %s3803_s16 }
 0x425   :  { %1364 = vrot.lane.b32.xlu2 %v6750_v32, %s3803_s16 }
 0x426   :  { %1358 = vrot.lane.b32.xlu1 %v6745_v57, %s3803_s16 }
 0x42d   :  { %1368 = vrot.lane.b32.xlu2 %v6749_v0, %s3803_s16 }
 0x42e   :  { %1362 = vrot.lane.b32.xlu1 %v6744_v2, %s3803_s16 }
 0x435   :  { %1372 = vrot.lane.b32.xlu2 %v6748_v7, %s3803_s16 }
 0x436   :  { %1366 = vrot.lane.b32.xlu1 %v6743_v18, %s3803_s16 }
 0x43d   :  { %1374 = vrot.lane.b32.xlu2 %v6741_v8, %s3803_s16 }
 0x43e   :  { %1370 = vrot.lane.b32.xlu1 %v6742_v10, %s3803_s16 }
 0x467   :  { %v1347_v49 = vpop.permute.xlu2 %1346 }
 0x468   :  { %v4857_v6 = vadd.f32 %v1347_v49, %v4074_v30 }
 0x46f   :  { %v1353_v17 = vpop.permute.xlu2 %1352 }
 0x470   :  { %v4906_v28 = vadd.f32 %v1353_v17, %v4127_v1 }
 0x477   :  { %v4895_v37 = vpop.permute.xlu2 %1360 }
 0x47f   :  { %v1349_v16 = vpop.permute.xlu0 %1348  ;;  %v4903_v12 = vpop.permute.xlu2 %1364 }
 0x480   :  { %v1345_v5 = vpop.permute.xlu1 %1344  ;;  %v4872_v14 = vadd.f32 %v1349_v16, %v4076_v43 }
 0x481   :  { %v4848_v13 = vadd.f32 %v1345_v5, %v4072_v29 }
 0x483   :  { %6795 = vst [vmem:[#allocation12_spill] sm:$0xff] %v4848_v13  ;;  %1568 = vrot.lane.b32.xlu1 %v4848_v13, %s3802_s15  ;;  %1488 = vrot.lane.b32.xlu0 %v4848_v13, %s3801_s3 }
 0x484   :  { %1424 = vrot.lane.b32.xlu2 %v4848_v13, %s3809_s30 }
 0x487   :  { %v4914_v26 = vpop.permute.xlu2 %1368  ;;  %v1355_v49 = vpop.permute.xlu0 %1354 }
 0x488   :  { %v1351_v15 = vpop.permute.xlu1 %1350  ;;  %v4939_v17 = vadd.f32 %v1355_v49, %v4069_v42 }
 0x489   :  { %v4887_v9 = vadd.f32 %v1351_v15, %v4133_v60 }
 0x48b   :  { %1634 = vrot.lane.b32.xlu1 %v4857_v6, %s3803_s16  ;;  %1632 = vrot.lane.b32.xlu0 %v4848_v13, %s3803_s16 }
 0x48c   :  { %1570 = vrot.lane.b32.xlu2 %v4857_v6, %s3802_s15 }
 0x48f   :  { %v4926_v46 = vpop.permute.xlu2 %1372 }
 0x490   :  { %v1357_v19 = vpop.permute.xlu1 %1356 }
 0x491   :  { %v4959_v18 = vadd.f32 %v1357_v19, %v4067_v33  ;;  %v3701_v19 = vld [vmem:[%s6734_s4 + $0x24] sm:$0x3] }
 0x492   :  { %v1991_v25 = vunpack.c.l.b16 %v3701_v19 }
 0x493   :  { %1762 = vrot.lane.b32.xlu1 %v4857_v6, %s3804_s17  ;;  %1698 = vrot.lane.b32.xlu0 %v4857_v6, %s3800_s2 }
 0x494   :  { %1696 = vrot.lane.b32.xlu2 %v4848_v13, %s3800_s2  ;;  %v1994_v0 = vpack.c.b16 %v1991_v25, %v1991_v25 }
 0x496   :  { %v2022_v32 = vsel %vm1033_vm10, %v1994_v0, 0 }
 0x497   :  { %v4936_v16 = vpop.permute.xlu2 %1374  ;;  %2029 = vmatpush.bf16.msrb.mxu2 %v2022_v32  ;;  %v3761_v32 = vld [vmem:[%s6734_s4 + $0x14] sm:$0xff] }
 0x498   :  { %v1359_v5 = vpop.permute.xlu1 %1358 }
 0x499   :  { %v5000_v0 = vadd.f32 %v1359_v5, %v4089_v39 }
 0x49b   :  { %1828 = vrot.lane.b32.xlu1 %v4872_v14, %s3806_s19  ;;  %1826 = vrot.lane.b32.xlu0 %v4857_v6, %s3806_s19  ;;  %6796 = vst [vmem:[#allocation13_spill] sm:$0xff] %v5000_v0 }
 0x49c   :  { %1764 = vrot.lane.b32.xlu2 %v4872_v14, %s3804_s17  ;;  %2030 = vmatpush.bf16.msrb.mxu2 %v3762_v50 }
 0x4a0   :  { %v4941_v15 = vpop.permute.xlu1 %1362  ;;  %2031 = vmatpush.bf16.msrb.mxu2 %v3761_v32 }
 0x4a3   :  { %1490 = vrot.lane.b32.xlu1 %v4857_v6, %s3801_s3  ;;  %1892 = vrot.lane.b32.xlu0 %v4872_v14, %s3805_s18 }
 0x4a4   :  { %1890 = vrot.lane.b32.xlu2 %v4857_v6, %s3805_s18 }
 0x4a8   :  { %v4950_v10 = vpop.permute.xlu1 %1366 }
 0x4ab   :  { %1428 = vrot.lane.b32.xlu0 %v4872_v14, %s3809_s30  ;;  %1574 = vrot.lane.b32.xlu1 %v4887_v9, %s3802_s15 }
 0x4ac   :  { %1426 = vrot.lane.b32.xlu2 %v4857_v6, %s3809_s30 }
 0x4b3   :  { %1572 = vrot.lane.b32.xlu0 %v4872_v14, %s3802_s15  ;;  %1700 = vrot.lane.b32.xlu1 %v4872_v14, %s3800_s2 }
 0x4b4   :  { %1492 = vrot.lane.b32.xlu2 %v4872_v14, %s3801_s3 }
 0x4bb   :  { %1638 = vrot.lane.b32.xlu0 %v4887_v9, %s3803_s16  ;;  %1768 = vrot.lane.b32.xlu1 %v4906_v28, %s3804_s17 }
 0x4bc   :  { %1636 = vrot.lane.b32.xlu2 %v4872_v14, %s3803_s16 }
 0x4c3   :  { %1766 = vrot.lane.b32.xlu0 %v4887_v9, %s3804_s17  ;;  %1832 = vrot.lane.b32.xlu1 %v4906_v28, %s3806_s19 }
 0x4c4   :  { %1702 = vrot.lane.b32.xlu2 %v4887_v9, %s3800_s2 }
 0x4cb   :  { %1830 = vrot.lane.b32.xlu0 %v4887_v9, %s3806_s19  ;;  %1432 = vrot.lane.b32.xlu1 %v4906_v28, %s3809_s30 }
 0x4cc   :  { %1894 = vrot.lane.b32.xlu2 %v4887_v9, %s3805_s18 }
 0x4d3   :  { %1896 = vrot.lane.b32.xlu0 %v4906_v28, %s3805_s18  ;;  %1576 = vrot.lane.b32.xlu1 %v4906_v28, %s3802_s15 }
 0x4d4   :  { %1494 = vrot.lane.b32.xlu2 %v4887_v9, %s3801_s3 }
 0x4db   :  { %1430 = vrot.lane.b32.xlu0 %v4887_v9, %s3809_s30  ;;  %1642 = vrot.lane.b32.xlu1 %v4939_v17, %s3803_s16 }
 0x4dc   :  { %1578 = vrot.lane.b32.xlu2 %v4939_v17, %s3802_s15 }
 0x4de   :  { %v1425_v8 = vpop.permute.xlu2 %1424 }
 0x4df   :  { %1472 = vst.msk [vmem:[#allocation2 + $0x22] sm:$0xff] %vm394_vm6, %v1425_v8  ;;  %v4967_v8 = vpop.permute.xlu1 %1370 }
 0x4e3   :  { %1496 = vrot.lane.b32.xlu0 %v4906_v28, %s3801_s3  ;;  %1770 = vrot.lane.b32.xlu1 %v4939_v17, %s3804_s17 }
 0x4e4   :  { %1704 = vrot.lane.b32.xlu2 %v4906_v28, %s3800_s2 }
 0x4e6   :  { %v1571_v49 = vpop.permute.xlu2 %1570 }
 0x4eb   :  { %1640 = vrot.lane.b32.xlu0 %v4906_v28, %s3803_s16  ;;  %1836 = vrot.lane.b32.xlu1 %v4959_v18, %s3806_s19 }
 0x4ec   :  { %1772 = vrot.lane.b32.xlu2 %v4959_v18, %s3804_s17 }
 0x4ee   :  { %v1697_v2 = vpop.permute.xlu2 %1696 }
 0x4f3   :  { %1706 = vrot.lane.b32.xlu0 %v4939_v17, %s3800_s2  ;;  %1498 = vrot.lane.b32.xlu1 %v4939_v17, %s3801_s3 }
 0x4f4   :  { %1898 = vrot.lane.b32.xlu2 %v4939_v17, %s3805_s18 }
 0x4f5   :  { %v1489_v57 = vpop.permute.xlu0 %1488  ;;  %v1569_v44 = vpop.permute.xlu1 %1568 }
 0x4f6   :  { %1536 = vst.msk [vmem:[#allocation2 + $0x21] sm:$0xff] %vm492_vm9, %v1489_v57  ;;  %v1765_v7 = vpop.permute.xlu2 %1764 }
 0x4f7   :  { %1552 = vst.msk [vmem:[#allocation2 + $0x20] sm:$0xff] %vm557_vm11, %v4848_v13 }
 0x4f8   :  { %1617 = vst.msk [vmem:[#allocation2 + $0x22] sm:$0xff] %vm623_vm12, %v1571_v49 }
 0x4f9   :  { %1616 = vst.msk [vmem:[#allocation2 + $0x12] sm:$0xff] %vm623_vm12, %v1569_v44 }
 0x4fb   :  { %1834 = vrot.lane.b32.xlu0 %v4939_v17, %s3806_s19  ;;  %1500 = vrot.lane.b32.xlu1 %v4959_v18, %s3801_s3 }
 0x4fc   :  { %1436 = vrot.lane.b32.xlu2 %v4959_v18, %s3809_s30 }
 0x4fd   :  { %v1633_v25 = vpop.permute.xlu0 %1632  ;;  %v1635_v57 = vpop.permute.xlu1 %1634 }
 0x4fe   :  { %1680 = vst.msk [vmem:[#allocation2 + $0x11] sm:$0xff] %vm688_vm13, %v1633_v25  ;;  %v1891_v44 = vpop.permute.xlu2 %1890 }
 0x4ff   :  { %1744 = vst.msk [vmem:[#allocation2 + $0x10] sm:$0xff] %vm753_vm14, %v1697_v2 }
 0x500   :  { %1681 = vst.msk [vmem:[#allocation2 + $0x21] sm:$0xff] %vm688_vm13, %v1635_v57 }
 0x503   :  { %1900 = vrot.lane.b32.xlu0 %v4959_v18, %s3805_s18  ;;  %1582 = vrot.lane.b32.xlu1 %v5000_v0, %s3802_s15 }
 0x504   :  { %1644 = vrot.lane.b32.xlu2 %v4959_v18, %s3803_s16 }
 0x505   :  { %v1699_v50 = vpop.permute.xlu0 %1698  ;;  %v1763_v49 = vpop.permute.xlu1 %1762 }
 0x506   :  { %1745 = vst.msk [vmem:[#allocation2 + $0x20] sm:$0xff] %vm753_vm14, %v1699_v50  ;;  %v1427_v2 = vpop.permute.xlu2 %1426 }
 0x507   :  { %1810 = vst.msk [vmem:[#allocation2 + $0x22] sm:$0xff] %vm818_vm15, %v1765_v7  ;;  %v5023_v7 = vadd.f32 %v4895_v37, %v4093_v48 }
 0x508   :  { %1473 = vst.msk [vmem:[#allocation2 + $0x32] sm:$0xff] %vm394_vm6, %v1427_v2 }
 0x509   :  { %1809 = vst.msk [vmem:[#allocation2 + $0x12] sm:$0xff] %vm818_vm15, %v1763_v49 }
 0x50a   :  { %6797 = vst [vmem:[#allocation14_spill] sm:$0xff] %v5023_v7 }
 0x50b   :  { %1434 = vrot.lane.b32.xlu0 %v4939_v17, %s3809_s30  ;;  %1838 = vrot.lane.b32.xlu1 %v5000_v0, %s3806_s19 }
 0x50c   :  { %1774 = vrot.lane.b32.xlu2 %v5000_v0, %s3804_s17 }
 0x50d   :  { %v1827_v5 = vpop.permute.xlu0 %1826  ;;  %v1829_v19 = vpop.permute.xlu1 %1828 }
 0x50e   :  { %1873 = vst.msk [vmem:[#allocation2 + $0x11] sm:$0xff] %vm883_vm2, %v1827_v5  ;;  %v1493_v25 = vpop.permute.xlu2 %1492 }
 0x50f   :  { %1937 = vst.msk [vmem:[#allocation2 + $0x10] sm:$0xff] %vm948_vm3, %v1891_v44 }
 0x510   :  { %1874 = vst.msk [vmem:[#allocation2 + $0x21] sm:$0xff] %vm883_vm2, %v1829_v19 }
 0x513   :  { %1580 = vrot.lane.b32.xlu0 %v4959_v18, %s3802_s15  ;;  %1504 = vrot.lane.b32.xlu1 %v5023_v7, %s3801_s3 }
 0x514   :  { %1710 = vrot.lane.b32.xlu2 %v5000_v0, %s3800_s2 }
 0x515   :  { %v1893_v57 = vpop.permute.xlu0 %1892  ;;  %v1491_v32 = vpop.permute.xlu1 %1490 }
 0x516   :  { %1938 = vst.msk [vmem:[#allocation2 + $0x20] sm:$0xff] %vm948_vm3, %v1893_v57  ;;  %v1637_v44 = vpop.permute.xlu2 %1636  ;;  %v1952_v49 = vld [vmem:[#allocation2 + $0x11] sm:$0xff] }
 0x517   :  { %1537 = vst.msk [vmem:[#allocation2 + $0x31] sm:$0xff] %vm492_vm9, %v1491_v32 }
 0x518   :  { %1553 = vst.msk [vmem:[#allocation2 + $0x30] sm:$0xff] %vm557_vm11, %v4857_v6  ;;  %v5048_v6 = vadd.f32 %v4941_v15, %v4098_v51 }
 0x51b   :  { %1708 = vrot.lane.b32.xlu0 %v4959_v18, %s3800_s2  ;;  %1648 = vrot.lane.b32.xlu1 %v5023_v7, %s3803_s16 }
 0x51c   :  { %1584 = vrot.lane.b32.xlu2 %v5023_v7, %s3802_s15 }
 0x51d   :  { %v1429_v37 = vpop.permute.xlu0 %1428  ;;  %v1575_v50 = vpop.permute.xlu1 %1574  ;;  %v1953_v2 = vld [vmem:[#allocation2 + $0x21] sm:$0xff] }
 0x51e   :  { %1474 = vst.msk [vmem:[#allocation2 + $0x42] sm:$0xff] %vm394_vm6, %v1429_v37  ;;  %v1703_v5 = vpop.permute.xlu2 %1702  ;;  %v1968_v19 = vpack.c.bf16 %v1953_v2, %v1952_v49 }
 0x51f   :  { %1538 = vst.msk [vmem:[#allocation2 + $0x41] sm:$0xff] %vm492_vm9, %v1493_v25 }
 0x520   :  { %1554 = vst.msk [vmem:[#allocation2 + $0x40] sm:$0xff] %vm557_vm11, %v4872_v14  ;;  %3710 = vmatmul.msk.bf16.vlgmr.msrb.gmra.mxu2 %vm352_vm7, %v1968_v19 }
 0x521   :  { %1619 = vst.msk [vmem:[#allocation2 + $0x42] sm:$0xff] %vm623_vm12, %v1575_v50 }
 0x523   :  { %1646 = vrot.lane.b32.xlu0 %v5000_v0, %s3803_s16  ;;  %1714 = vrot.lane.b32.xlu1 %v5048_v6, %s3800_s2 }
 0x524   :  { %1650 = vrot.lane.b32.xlu2 %v5048_v6, %s3803_s16 }
 0x525   :  { %v1573_v25 = vpop.permute.xlu0 %1572  ;;  %v1701_v57 = vpop.permute.xlu1 %1700 }
 0x526   :  { %1618 = vst.msk [vmem:[#allocation2 + $0x32] sm:$0xff] %vm623_vm12, %v1573_v25  ;;  %v1895_v14 = vpop.permute.xlu2 %1894  ;;  %v5092_v25 = vadd.f32 %v4950_v10, %v4108_v56 }
 0x527   :  { %1682 = vst.msk [vmem:[#allocation2 + $0x31] sm:$0xff] %vm688_vm13, %v1637_v44  ;;  %v5071_v44 = vadd.f32 %v4903_v12, %v4103_v52 }
 0x528   :  { %1746 = vst.msk [vmem:[#allocation2 + $0x30] sm:$0xff] %vm753_vm14, %v1701_v57 }
 0x52b   :  { %1902 = vrot.lane.b32.xlu0 %v5000_v0, %s3805_s18  ;;  %1842 = vrot.lane.b32.xlu1 %v5048_v6, %s3806_s19 }
 0x52c   :  { %1778 = vrot.lane.b32.xlu2 %v5048_v6, %s3804_s17 }
 0x52d   :  { %v1639_v15 = vpop.permute.xlu0 %1638  ;;  %v1769_v32 = vpop.permute.xlu1 %1768 }
 0x52e   :  { %v1495_v37 = vpop.permute.xlu2 %1494  ;;  %1683 = vst.msk [vmem:[#allocation2 + $0x41] sm:$0xff] %vm688_vm13, %v1639_v15 }
 0x52f   :  { %1747 = vst.msk [vmem:[#allocation2 + $0x40] sm:$0xff] %vm753_vm14, %v1703_v5 }
 0x530   :  { %1812 = vst.msk [vmem:[#allocation2 + $0x42] sm:$0xff] %vm818_vm15, %v1769_v32 }
 0x533   :  { %1440 = vrot.lane.b32.xlu0 %v5023_v7, %s3809_s30  ;;  %1908 = vrot.lane.b32.xlu1 %v5071_v44, %s3805_s18 }
 0x534   :  { %1844 = vrot.lane.b32.xlu2 %v5071_v44, %s3806_s19 }
 0x535   :  { %v1767_v50 = vpop.permute.xlu0 %1766  ;;  %v1833_v49 = vpop.permute.xlu1 %1832 }
 0x536   :  { %v1579_v2 = vpop.permute.xlu2 %1578  ;;  %1811 = vst.msk [vmem:[#allocation2 + $0x32] sm:$0xff] %vm818_vm15, %v1767_v50 }
 0x537   :  { %1876 = vst.msk [vmem:[#allocation2 + $0x41] sm:$0xff] %vm883_vm2, %v1833_v49 }
 0x53b   :  { %1444 = vrot.lane.b32.xlu1 %v5071_v44, %s3809_s30  ;;  %1586 = vrot.lane.b32.xlu0 %v5048_v6, %s3802_s15 }
 0x53c   :  { %1506 = vrot.lane.b32.xlu2 %v5048_v6, %s3801_s3 }
 0x53d   :  { %v1831_v12 = vpop.permute.xlu0 %1830  ;;  %v1433_v5 = vpop.permute.xlu1 %1432 }
 0x53e   :  { %v1705_v19 = vpop.permute.xlu2 %1704  ;;  %1875 = vst.msk [vmem:[#allocation2 + $0x31] sm:$0xff] %vm883_vm2, %v1831_v12 }
 0x53f   :  { %1939 = vst.msk [vmem:[#allocation2 + $0x30] sm:$0xff] %vm948_vm3, %v1895_v14 }
 0x540   :  { %1476 = vst.msk [vmem:[#allocation2 + $0x62] sm:$0xff] %vm394_vm6, %v1433_v5 }
 0x543   :  { %1588 = vrot.lane.b32.xlu1 %v5071_v44, %s3802_s15  ;;  %1712 = vrot.lane.b32.xlu0 %v5023_v7, %s3800_s2 }
 0x544   :  { %1590 = vrot.lane.b32.xlu2 %v5092_v25, %s3802_s15 }
 0x545   :  { %v1897_v57 = vpop.permute.xlu0 %1896  ;;  %v1577_v15 = vpop.permute.xlu1 %1576 }
 0x546   :  { %1940 = vst.msk [vmem:[#allocation2 + $0x40] sm:$0xff] %vm948_vm3, %v1897_v57  ;;  %v1773_v14 = vpop.permute.xlu2 %1772  ;;  %v1954_v50 = vld [vmem:[#allocation2 + $0x31] sm:$0xff]  ;;  %v5115_v57 = vadd.f32 %v4914_v26, %v4113_v58 }
 0x54b   :  { %1780 = vrot.lane.b32.xlu0 %v5071_v44, %s3804_s17  ;;  %1654 = vrot.lane.b32.xlu1 %v5092_v25, %s3803_s16 }
 0x54c   :  { %1716 = vrot.lane.b32.xlu2 %v5071_v44, %s3800_s2 }
 0x54d   :  { %v1431_v10 = vpop.permute.xlu0 %1430  ;;  %v1643_v32 = vpop.permute.xlu1 %1642  ;;  %v1955_v49 = vld [vmem:[#allocation2 + $0x41] sm:$0xff] }
 0x54e   :  { %1475 = vst.msk [vmem:[#allocation2 + $0x52] sm:$0xff] %vm394_vm6, %v1431_v10  ;;  %v1899_v12 = vpop.permute.xlu2 %1898  ;;  %v1969_v5 = vpack.c.bf16 %v1955_v49, %v1954_v50 }
 0x54f   :  { %1539 = vst.msk [vmem:[#allocation2 + $0x51] sm:$0xff] %vm492_vm9, %v1495_v37 }
 0x550   :  { %1555 = vst.msk [vmem:[#allocation2 + $0x50] sm:$0xff] %vm557_vm11, %v4887_v9  ;;  %3711 = vmatmul.msk.bf16.gmra.mxu2 %vm352_vm7, %v1969_v5 }
 0x551   :  { %1620 = vst.msk [vmem:[#allocation2 + $0x52] sm:$0xff] %vm623_vm12, %v1577_v15 }
 0x553   :  { %1906 = vrot.lane.b32.xlu0 %v5048_v6, %s3805_s18  ;;  %1782 = vrot.lane.b32.xlu1 %v5092_v25, %s3804_s17 }
 0x554   :  { %1784 = vrot.lane.b32.xlu2 %v5115_v57, %s3804_s17 }
 0x555   :  { %v1497_v37 = vpop.permute.xlu0 %1496  ;;  %v1771_v10 = vpop.permute.xlu1 %1770 }
 0x556   :  { %1540 = vst.msk [vmem:[#allocation2 + $0x61] sm:$0xff] %vm492_vm9, %v1497_v37  ;;  %v1437_v9 = vpop.permute.xlu2 %1436 }
 0x557   :  { %1556 = vst.msk [vmem:[#allocation2 + $0x60] sm:$0xff] %vm557_vm11, %v4906_v28 }
 0x558   :  { %1478 = vst.msk [vmem:[#allocation2 + $0x82] sm:$0xff] %vm394_vm6, %v1437_v9 }
 0x559   :  { %1621 = vst.msk [vmem:[#allocation2 + $0x62] sm:$0xff] %vm623_vm12, %v1579_v2 }
 0x55a   :  { %1685 = vst.msk [vmem:[#allocation2 + $0x61] sm:$0xff] %vm688_vm13, %v1643_v32 }
 0x55b   :  { %1442 = vrot.lane.b32.xlu0 %v5048_v6, %s3809_s30  ;;  %1848 = vrot.lane.b32.xlu1 %v5115_v57, %s3806_s19 }
 0x55c   :  { %1910 = vrot.lane.b32.xlu2 %v5092_v25, %s3805_s18 }
 0x55d   :  { %v1641_v26 = vpop.permute.xlu0 %1640  ;;  %v1837_v15 = vpop.permute.xlu1 %1836 }
 0x55e   :  { %1684 = vst.msk [vmem:[#allocation2 + $0x51] sm:$0xff] %vm688_vm13, %v1641_v26  ;;  %v1645_v28 = vpop.permute.xlu2 %1644 }
 0x55f   :  { %1748 = vst.msk [vmem:[#allocation2 + $0x50] sm:$0xff] %vm753_vm14, %v1705_v19 }
 0x560   :  { %1813 = vst.msk [vmem:[#allocation2 + $0x52] sm:$0xff] %vm818_vm15, %v1771_v10 }
 0x563   :  { %1508 = vrot.lane.b32.xlu0 %v5071_v44, %s3801_s3  ;;  %1446 = vrot.lane.b32.xlu1 %v5092_v25, %s3809_s30 }
 0x564   :  { %1448 = vrot.lane.b32.xlu2 %v5115_v57, %s3809_s30 }
 0x565   :  { %v1707_v2 = vpop.permute.xlu0 %1706  ;;  %v1499_v32 = vpop.permute.xlu1 %1498 }
 0x566   :  { %1749 = vst.msk [vmem:[#allocation2 + $0x60] sm:$0xff] %vm753_vm14, %v1707_v2  ;;  %v1775_v50 = vpop.permute.xlu2 %1774 }
 0x567   :  { %1814 = vst.msk [vmem:[#allocation2 + $0x62] sm:$0xff] %vm818_vm15, %v1773_v14  ;;  %v5160_v14 = vadd.f32 %v4967_v8, %v4137_v61 }
 0x568   :  { %1878 = vst.msk [vmem:[#allocation2 + $0x61] sm:$0xff] %vm883_vm2, %v1837_v15 }
 0x56b   :  { %1652 = vrot.lane.b32.xlu0 %v5071_v44, %s3803_s16  ;;  %1512 = vrot.lane.b32.xlu1 %v5115_v57, %s3801_s3 }
 0x56c   :  { %1592 = vrot.lane.b32.xlu2 %v5115_v57, %s3802_s15 }
 0x56d   :  { %v1835_v19 = vpop.permute.xlu0 %1834  ;;  %v1501_v49 = vpop.permute.xlu1 %1500 }
 0x56e   :  { %1877 = vst.msk [vmem:[#allocation2 + $0x51] sm:$0xff] %vm883_vm2, %v1835_v19  ;;  %v1711_v5 = vpop.permute.xlu2 %1710  ;;  %v5184_v19 = vadd.f32 %v4926_v46, %v4141_v62 }
 0x56f   :  { %1941 = vst.msk [vmem:[#allocation2 + $0x50] sm:$0xff] %vm948_vm3, %v1899_v12 }
 0x570   :  { %1542 = vst.msk [vmem:[#allocation2 + $0x81] sm:$0xff] %vm492_vm9, %v1501_v49 }
 0x571   :  { %1558 = vst.msk [vmem:[#allocation2 + $0x80] sm:$0xff] %vm557_vm11, %v4959_v18 }
 0x573   :  { %1718 = vrot.lane.b32.xlu0 %v5092_v25, %s3800_s2  ;;  %1656 = vrot.lane.b32.xlu1 %v5115_v57, %s3803_s16 }
 0x574   :  { %1658 = vrot.lane.b32.xlu2 %v5160_v14, %s3803_s16 }
 0x575   :  { %v1901_v37 = vpop.permute.xlu0 %1900  ;;  %v1583_v12 = vpop.permute.xlu1 %1582 }
 0x576   :  { %1942 = vst.msk [vmem:[#allocation2 + $0x60] sm:$0xff] %vm948_vm3, %v1901_v37  ;;  %v1585_v10 = vpop.permute.xlu2 %1584  ;;  %v1956_v9 = vld [vmem:[#allocation2 + $0x51] sm:$0xff] }
 0x577   :  { %1624 = vst.msk [vmem:[#allocation2 + $0xb2] sm:$0xff] %vm623_vm12, %v1585_v10 }
 0x578   :  { %1623 = vst.msk [vmem:[#allocation2 + $0x82] sm:$0xff] %vm623_vm12, %v1583_v12 }
 0x57b   :  { %1846 = vrot.lane.b32.xlu0 %v5092_v25, %s3806_s19  ;;  %1722 = vrot.lane.b32.xlu1 %v5160_v14, %s3800_s2 }
 0x57c   :  { %1786 = vrot.lane.b32.xlu2 %v5160_v14, %s3804_s17 }
 0x57d   :  { %v1435_v18 = vpop.permute.xlu0 %1434  ;;  %v1839_v8 = vpop.permute.xlu1 %1838  ;;  %v1957_v26 = vld [vmem:[#allocation2 + $0x61] sm:$0xff] }
 0x57e   :  { %1477 = vst.msk [vmem:[#allocation2 + $0x72] sm:$0xff] %vm394_vm6, %v1435_v18  ;;  %v1651_v15 = vpop.permute.xlu2 %1650  ;;  %v1970_v2 = vpack.c.bf16 %v1957_v26, %v1956_v9  ;;  %v5221_v26 = vadd.f32 %v4936_v16, %v4117_v59 }
 0x57f   :  { %1541 = vst.msk [vmem:[#allocation2 + $0x71] sm:$0xff] %vm492_vm9, %v1499_v32 }
 0x580   :  { %1557 = vst.msk [vmem:[#allocation2 + $0x70] sm:$0xff] %vm557_vm11, %v4939_v17  ;;  %3712 = vmatmul.msk.bf16.gmra.mxu2 %vm352_vm7, %v1970_v2 }
 0x581   :  { %6798 = vst [vmem:[#allocation15_spill] sm:$0xff] %v5221_v26 }
 0x583   :  { %1912 = vrot.lane.b32.xlu0 %v5115_v57, %s3805_s18  ;;  %1850 = vrot.lane.b32.xlu1 %v5160_v14, %s3806_s19 }
 0x584   :  { %1852 = vrot.lane.b32.xlu2 %v5184_v19, %s3806_s19 }
 0x585   :  { %v1581_v49 = vpop.permute.xlu0 %1580  ;;  %v1505_v32 = vpop.permute.xlu1 %1504 }
 0x586   :  { %1622 = vst.msk [vmem:[#allocation2 + $0x72] sm:$0xff] %vm623_vm12, %v1581_v49  ;;  %v1779_v17 = vpop.permute.xlu2 %1778 }
 0x587   :  { %1686 = vst.msk [vmem:[#allocation2 + $0x71] sm:$0xff] %vm688_vm13, %v1645_v28 }
 0x58b   :  { %1510 = vrot.lane.b32.xlu0 %v5092_v25, %s3801_s3  ;;  %1916 = vrot.lane.b32.xlu1 %v5184_v19, %s3805_s18 }
 0x58c   :  { %1450 = vrot.lane.b32.xlu2 %v5160_v14, %s3809_s30 }
 0x58d   :  { %v1709_v46 = vpop.permute.xlu0 %1708  ;;  %v1649_v37 = vpop.permute.xlu1 %1648 }
 0x58e   :  { %1750 = vst.msk [vmem:[#allocation2 + $0x70] sm:$0xff] %vm753_vm14, %v1709_v46  ;;  %v1845_v12 = vpop.permute.xlu2 %1844 }
 0x58f   :  { %1815 = vst.msk [vmem:[#allocation2 + $0x72] sm:$0xff] %vm818_vm15, %v1775_v50 }
 0x590   :  { %1879 = vst.msk [vmem:[#allocation2 + $0x71] sm:$0xff] %vm883_vm2, %v1839_v8 }
 0x591   :  { %1688 = vst.msk [vmem:[#allocation2 + $0xb1] sm:$0xff] %vm688_vm13, %v1649_v37 }
 0x593   :  { %1452 = vrot.lane.b32.xlu1 %v5184_v19, %s3809_s30  ;;  %1594 = vrot.lane.b32.xlu0 %v5160_v14, %s3802_s15 }
 0x594   :  { %1596 = vrot.lane.b32.xlu2 %v5184_v19, %s3802_s15 }
 0x595   :  { %v1647_v28 = vpop.permute.xlu0 %1646  ;;  %v1715_v10 = vpop.permute.xlu1 %1714 }
 0x596   :  { %1687 = vst.msk [vmem:[#allocation2 + $0x81] sm:$0xff] %vm688_vm13, %v1647_v28  ;;  %v1507_v18 = vpop.permute.xlu2 %1506 }
 0x597   :  { %1751 = vst.msk [vmem:[#allocation2 + $0x80] sm:$0xff] %vm753_vm14, %v1711_v5 }
 0x59b   :  { %1660 = vrot.lane.b32.xlu1 %v5184_v19, %s3803_s16  ;;  %1720 = vrot.lane.b32.xlu0 %v5115_v57, %s3800_s2 }
 0x59c   :  { %1724 = vrot.lane.b32.xlu2 %v5184_v19, %s3800_s2 }
 0x59d   :  { %v1903_v50 = vpop.permute.xlu0 %1902  ;;  %v1843_v8 = vpop.permute.xlu1 %1842 }
 0x59e   :  { %1943 = vst.msk [vmem:[#allocation2 + $0x70] sm:$0xff] %vm948_vm3, %v1903_v50  ;;  %v1591_v9 = vpop.permute.xlu2 %1590  ;;  %v1959_v46 = vld [vmem:[#allocation2 + $0x81] sm:$0xff] }
 0x5a3   :  { %1790 = vrot.lane.b32.xlu1 %v5221_v26, %s3804_s17  ;;  %1788 = vrot.lane.b32.xlu0 %v5184_v19, %s3804_s17 }
 0x5a4   :  { %1662 = vrot.lane.b32.xlu2 %v5221_v26, %s3803_s16 }
 0x5a5   :  { %v1441_v5 = vpop.permute.xlu0 %1440  ;;  %v1909_v2 = vpop.permute.xlu1 %1908  ;;  %v1958_v49 = vld [vmem:[#allocation2 + $0x71] sm:$0xff] }
 0x5a6   :  { %1480 = vst.msk [vmem:[#allocation2 + $0xc2] sm:$0xff] %vm394_vm6, %v1441_v5  ;;  %v1717_v37 = vpop.permute.xlu2 %1716  ;;  %v1971_v28 = vpack.c.bf16 %v1959_v46, %v1958_v49 }
 0x5a7   :  { %1544 = vst.msk [vmem:[#allocation2 + $0xc1] sm:$0xff] %vm492_vm9, %v1505_v32 }
 0x5a8   :  { %1560 = vst.msk [vmem:[#allocation2 + $0xc0] sm:$0xff] %vm557_vm11, %v5023_v7  ;;  %3713 = vmatmul.msk.bf16.gmra.mxu2 %vm352_vm7, %v1971_v28 }
 0x5ab   :  { %1726 = vrot.lane.b32.xlu1 %v5221_v26, %s3800_s2  ;;  %1914 = vrot.lane.b32.xlu0 %v5160_v14, %s3805_s18 }
 0x5ac   :  { %1918 = vrot.lane.b32.xlu2 %v5221_v26, %s3805_s18 }
 0x5ad   :  { %v1587_v16 = vpop.permute.xlu0 %1586  ;;  %v1445_v50 = vpop.permute.xlu1 %1444 }
 0x5ae   :  { %1625 = vst.msk [vmem:[#allocation2 + $0xc2] sm:$0xff] %vm623_vm12, %v1587_v16  ;;  %v1785_v5 = vpop.permute.xlu2 %1784 }
 0x5af   :  { %1689 = vst.msk [vmem:[#allocation2 + $0xc1] sm:$0xff] %vm688_vm13, %v1651_v15 }
 0x5b0   :  { %1753 = vst.msk [vmem:[#allocation2 + $0xc0] sm:$0xff] %vm753_vm14, %v1715_v10 }
 0x5b1   :  { %1482 = vst.msk [vmem:[#allocation2 + $0xe2] sm:$0xff] %vm394_vm6, %v1445_v50 }
 0x5b3   :  { %1514 = vrot.lane.b32.xlu0 %v5160_v14, %s3801_s3 }
 0x5b5   :  { %v1713_v32 = vpop.permute.xlu0 %1712  ;;  %v1589_v49 = vpop.permute.xlu1 %1588 }
 0x5b6   :  { %1752 = vst.msk [vmem:[#allocation2 + $0xb0] sm:$0xff] %vm753_vm14, %v1713_v32  ;;  %v1911_v46 = vpop.permute.xlu2 %1910 }
 0x5b7   :  { %1817 = vst.msk [vmem:[#allocation2 + $0xb2] sm:$0xff] %vm818_vm15, %v1779_v17 }
 0x5b8   :  { %1881 = vst.msk [vmem:[#allocation2 + $0xb1] sm:$0xff] %vm883_vm2, %v1843_v8 }
 0x5bb   :  { %1516 = vrot.lane.b32.xlu0 %v5184_v19, %s3801_s3 }
 0x5bd   :  { %v1781_v15 = vpop.permute.xlu0 %1780  ;;  %v1655_v28 = vpop.permute.xlu1 %1654 }
 0x5be   :  { %1818 = vst.msk [vmem:[#allocation2 + $0xc2] sm:$0xff] %vm818_vm15, %v1781_v15  ;;  %v1449_v10 = vpop.permute.xlu2 %1448 }
 0x5bf   :  { %1882 = vst.msk [vmem:[#allocation2 + $0xc1] sm:$0xff] %vm883_vm2, %v1845_v12 }
 0x5c0   :  { %1946 = vst.msk [vmem:[#allocation2 + $0xc0] sm:$0xff] %vm948_vm3, %v1909_v2 }
 0x5c1   :  { %1484 = vst.msk [vmem:[#allocation2 + $0x102] sm:$0xff] %vm394_vm6, %v1449_v10 }
 0x5c3   :  { %1598 = vrot.lane.b32.xlu0 %v5221_v26, %s3802_s15 }
 0x5c5   :  { %v1907_v17 = vpop.permute.xlu0 %1906  ;;  %v1783_v16 = vpop.permute.xlu1 %1782 }
 0x5c6   :  { %1945 = vst.msk [vmem:[#allocation2 + $0xb0] sm:$0xff] %vm948_vm3, %v1907_v17  ;;  %v1593_v8 = vpop.permute.xlu2 %1592 }
 0x5c7   :  { %v1961_v11 = vld [vmem:[#allocation2 + $0xc1] sm:$0xff] }
 0x5cb   :  { %1854 = vrot.lane.b32.xlu0 %v5221_v26, %s3806_s19 }
 0x5cd   :  { %v1443_v50 = vpop.permute.xlu0 %1442  ;;  %v1849_v32 = vpop.permute.xlu1 %1848  ;;  %v1960_v15 = vld [vmem:[#allocation2 + $0xb1] sm:$0xff] }
 0x5ce   :  { %1481 = vst.msk [vmem:[#allocation2 + $0xd2] sm:$0xff] %vm394_vm6, %v1443_v50  ;;  %v1659_v12 = vpop.permute.xlu2 %1658  ;;  %v1972_v2 = vpack.c.bf16 %v1961_v11, %v1960_v15 }
 0x5cf   :  { %1545 = vst.msk [vmem:[#allocation2 + $0xd1] sm:$0xff] %vm492_vm9, %v1507_v18 }
 0x5d0   :  { %1561 = vst.msk [vmem:[#allocation2 + $0xd0] sm:$0xff] %vm557_vm11, %v5048_v6  ;;  %3714 = vmatmul.msk.bf16.gmra.mxu2 %vm352_vm7, %v1972_v2 }
 0x5d1   :  { %1626 = vst.msk [vmem:[#allocation2 + $0xd2] sm:$0xff] %vm623_vm12, %v1589_v49 }
 0x5d5   :  { %v1509_v10 = vpop.permute.xlu0 %1508  ;;  %v1447_v17 = vpop.permute.xlu1 %1446 }
 0x5d6   :  { %1546 = vst.msk [vmem:[#allocation2 + $0xe1] sm:$0xff] %vm492_vm9, %v1509_v10  ;;  %v1787_v34 = vpop.permute.xlu2 %1786 }
 0x5d7   :  { %1562 = vst.msk [vmem:[#allocation2 + $0xe0] sm:$0xff] %vm557_vm11, %v5071_v44 }
 0x5d8   :  { %1627 = vst.msk [vmem:[#allocation2 + $0xe2] sm:$0xff] %vm623_vm12, %v1591_v9 }
 0x5d9   :  { %1483 = vst.msk [vmem:[#allocation2 + $0xf2] sm:$0xff] %vm394_vm6, %v1447_v17 }
 0x5da   :  { %1691 = vst.msk [vmem:[#allocation2 + $0xe1] sm:$0xff] %vm688_vm13, %v1655_v28 }
 0x5dd   :  { %v1653_v11 = vpop.permute.xlu0 %1652  ;;  %v1513_v6 = vpop.permute.xlu1 %1512 }
 0x5de   :  { %1690 = vst.msk [vmem:[#allocation2 + $0xd1] sm:$0xff] %vm688_vm13, %v1653_v11  ;;  %v1853_v18 = vpop.permute.xlu2 %1852 }
 0x5df   :  { %1754 = vst.msk [vmem:[#allocation2 + $0xd0] sm:$0xff] %vm753_vm14, %v1717_v37 }
 0x5e0   :  { %1819 = vst.msk [vmem:[#allocation2 + $0xd2] sm:$0xff] %vm818_vm15, %v1783_v16 }
 0x5e1   :  { %1548 = vst.msk [vmem:[#allocation2 + $0x101] sm:$0xff] %vm492_vm9, %v1513_v6 }
 0x5e2   :  { %1564 = vst.msk [vmem:[#allocation2 + $0x100] sm:$0xff] %vm557_vm11, %v5115_v57 }
 0x5e5   :  { %v1719_v44 = vpop.permute.xlu0 %1718  ;;  %v1657_v9 = vpop.permute.xlu1 %1656 }
 0x5e6   :  { %1755 = vst.msk [vmem:[#allocation2 + $0xe0] sm:$0xff] %vm753_vm14, %v1719_v44  ;;  %v1451_v49 = vpop.permute.xlu2 %1450 }
 0x5e7   :  { %1820 = vst.msk [vmem:[#allocation2 + $0xe2] sm:$0xff] %vm818_vm15, %v1785_v5 }
 0x5e8   :  { %1884 = vst.msk [vmem:[#allocation2 + $0xe1] sm:$0xff] %vm883_vm2, %v1849_v32 }
 0x5e9   :  { %1485 = vst.msk [vmem:[#allocation2 + $0x112] sm:$0xff] %vm394_vm6, %v1451_v49 }
 0x5ed   :  { %v1847_v28 = vpop.permute.xlu0 %1846  ;;  %v1723_v37 = vpop.permute.xlu1 %1722 }
 0x5ee   :  { %1883 = vst.msk [vmem:[#allocation2 + $0xd1] sm:$0xff] %vm883_vm2, %v1847_v28 }
 0x5ef   :  { %1947 = vst.msk [vmem:[#allocation2 + $0xd0] sm:$0xff] %vm948_vm3, %v1911_v46 }
 0x5f5   :  { %v1913_v16 = vpop.permute.xlu0 %1912  ;;  %v1851_v50 = vpop.permute.xlu1 %1850 }
 0x5f6   :  { %1948 = vst.msk [vmem:[#allocation2 + $0xe0] sm:$0xff] %vm948_vm3, %v1913_v16  ;;  %v1962_v2 = vld [vmem:[#allocation2 + $0xd1] sm:$0xff] }
 0x5fd   :  { %v1511_v57 = vpop.permute.xlu0 %1510  ;;  %v1917_v15 = vpop.permute.xlu1 %1916  ;;  %v1963_v10 = vld [vmem:[#allocation2 + $0xe1] sm:$0xff] }
 0x5fe   :  { %1547 = vst.msk [vmem:[#allocation2 + $0xf1] sm:$0xff] %vm492_vm9, %v1511_v57  ;;  %v1973_v5 = vpack.c.bf16 %v1963_v10, %v1962_v2 }
 0x5ff   :  { %1563 = vst.msk [vmem:[#allocation2 + $0xf0] sm:$0xff] %vm557_vm11, %v5092_v25 }
 0x600   :  { %1628 = vst.msk [vmem:[#allocation2 + $0xf2] sm:$0xff] %vm623_vm12, %v1593_v8  ;;  %3715 = vmatmul.msk.bf16.gmra.mxu2 %vm352_vm7, %v1973_v5 }
 0x601   :  { %1692 = vst.msk [vmem:[#allocation2 + $0xf1] sm:$0xff] %vm688_vm13, %v1657_v9 }
 0x605   :  { %v1595_v46 = vpop.permute.xlu0 %1594  ;;  %v1453_v32 = vpop.permute.xlu1 %1452 }
 0x606   :  { %1629 = vst.msk [vmem:[#allocation2 + $0x102] sm:$0xff] %vm623_vm12, %v1595_v46 }
 0x607   :  { %1693 = vst.msk [vmem:[#allocation2 + $0x101] sm:$0xff] %vm688_vm13, %v1659_v12  ;;  %v1597_v12 = vpop.permute.xlu2 %1596 }
 0x608   :  { %1757 = vst.msk [vmem:[#allocation2 + $0x100] sm:$0xff] %vm753_vm14, %v1723_v37 }
 0x609   :  { %1486 = vst.msk [vmem:[#allocation2 + $0x122] sm:$0xff] %vm394_vm6, %v1453_v32 }
 0x60d   :  { %v1721_v17 = vpop.permute.xlu0 %1720  ;;  %v1661_v11 = vpop.permute.xlu1 %1660 }
 0x60e   :  { %1756 = vst.msk [vmem:[#allocation2 + $0xf0] sm:$0xff] %vm753_vm14, %v1721_v17 }
 0x60f   :  { %1821 = vst.msk [vmem:[#allocation2 + $0xf2] sm:$0xff] %vm818_vm15, %v1787_v34 }
 0x610   :  { %1885 = vst.msk [vmem:[#allocation2 + $0xf1] sm:$0xff] %vm883_vm2, %v1851_v50 }
 0x615   :  { %v1789_v25 = vpop.permute.xlu0 %1788  ;;  %v1791_v49 = vpop.permute.xlu1 %1790 }
 0x616   :  { %1822 = vst.msk [vmem:[#allocation2 + $0x102] sm:$0xff] %vm818_vm15, %v1789_v25 }
 0x617   :  { %1886 = vst.msk [vmem:[#allocation2 + $0x101] sm:$0xff] %vm883_vm2, %v1853_v18  ;;  %v1725_v18 = vpop.permute.xlu2 %1724 }
 0x618   :  { %1950 = vst.msk [vmem:[#allocation2 + $0x100] sm:$0xff] %vm948_vm3, %v1917_v15 }
 0x61d   :  { %v1915_v8 = vpop.permute.xlu0 %1914  ;;  %v1727_v16 = vpop.permute.xlu1 %1726 }
 0x61e   :  { %1949 = vst.msk [vmem:[#allocation2 + $0xf0] sm:$0xff] %vm948_vm3, %v1915_v8 }
 0x61f   :  { %v1965_v9 = vld [vmem:[#allocation2 + $0x101] sm:$0xff]  ;;  %v1663_v37 = vpop.permute.xlu2 %1662 }
 0x625   :  { %v1515_v6 = vpop.permute.xlu0 %1514  ;;  %v1964_v44 = vld [vmem:[#allocation2 + $0xf1] sm:$0xff] }
 0x626   :  { %1549 = vst.msk [vmem:[#allocation2 + $0x111] sm:$0xff] %vm492_vm9, %v1515_v6  ;;  %v1974_v34 = vpack.c.bf16 %v1965_v9, %v1964_v44 }
 0x627   :  { %1565 = vst.msk [vmem:[#allocation2 + $0x110] sm:$0xff] %vm557_vm11, %v5160_v14  ;;  %v1919_v57 = vpop.permute.xlu2 %1918 }
 0x628   :  { %1630 = vst.msk [vmem:[#allocation2 + $0x112] sm:$0xff] %vm623_vm12, %v1597_v12  ;;  %3716 = vmatmul.msk.bf16.gmra.mxu2 %vm352_vm7, %v1974_v34 }
 0x629   :  { %1694 = vst.msk [vmem:[#allocation2 + $0x111] sm:$0xff] %vm688_vm13, %v1661_v11 }
 0x62a   :  { %1758 = vst.msk [vmem:[#allocation2 + $0x110] sm:$0xff] %vm753_vm14, %v1725_v18 }
 0x62b   :  { %1823 = vst.msk [vmem:[#allocation2 + $0x112] sm:$0xff] %vm818_vm15, %v1791_v49 }
 0x62d   :  { %v1517_v28 = vpop.permute.xlu0 %1516 }
 0x62e   :  { %1550 = vst.msk [vmem:[#allocation2 + $0x121] sm:$0xff] %vm492_vm9, %v1517_v28 }
 0x62f   :  { %1566 = vst.msk [vmem:[#allocation2 + $0x120] sm:$0xff] %vm557_vm11, %v5184_v19  ;;  %v5319_v19 = vpop.f32.mrf.mxu2 }
 0x630   :  { %v2077_v18 = vsel %vm394_vm6, %v5319_v19, 0.0 }
 0x635   :  { %v1599_v14 = vpop.permute.xlu0 %1598 }
 0x636   :  { %1631 = vst.msk [vmem:[#allocation2 + $0x122] sm:$0xff] %vm623_vm12, %v1599_v14 }
 0x637   :  { %1695 = vst.msk [vmem:[#allocation2 + $0x121] sm:$0xff] %vm688_vm13, %v1663_v37  ;;  %v5321_v5 = vpop.f32.mrf.mxu2 }
 0x638   :  { %1759 = vst.msk [vmem:[#allocation2 + $0x120] sm:$0xff] %vm753_vm14, %v1727_v16  ;;  %v2078_v34 = vsel %vm394_vm6, %v5321_v5, 0.0 }
 0x639   :  { %v2079_v28 = vadd.f32 %v2078_v34, %v2077_v18 }
 0x63d   :  { %v1855_v50 = vpop.permute.xlu0 %1854 }
 0x63e   :  { %1887 = vst.msk [vmem:[#allocation2 + $0x111] sm:$0xff] %vm883_vm2, %v1855_v50 }
 0x63f   :  { %1951 = vst.msk [vmem:[#allocation2 + $0x110] sm:$0xff] %vm948_vm3, %v1919_v57  ;;  %v1967_v2 = vld [vmem:[#allocation2 + $0x121] sm:$0xff]  ;;  %v5323_v46 = vpop.f32.mrf.mxu2 }
 0x640   :  { %v2080_v49 = vsel %vm394_vm6, %v5323_v46, 0.0 }
 0x641   :  { %v2081_v16 = vadd.f32 %v2080_v49, %v2079_v28 }
 0x646   :  { %v1966_v15 = vld [vmem:[#allocation2 + $0x111] sm:$0xff] }
 0x647   :  { %v1975_v10 = vpack.c.bf16 %v1967_v2, %v1966_v15  ;;  %v5325_v32 = vpop.f32.mrf.mxu2 }
 0x648   :  { %v2082_v14 = vsel %vm394_vm6, %v5325_v32, 0.0 }
 0x649   :  { %3717 = vmatmul.msk.bf16.gmra.mxu2 %vm352_vm7, %v1975_v10  ;;  %v2083_v57 = vadd.f32 %v2082_v14, %v2081_v16 }
 0x64f   :  { %v5327_v17 = vpop.f32.mrf.mxu2 }
 0x650   :  { %v2084_v50 = vsel %vm394_vm6, %v5327_v17, 0.0 }
 0x651   :  { %v2085_v2 = vadd.f32 %v2084_v50, %v2083_v57 }
 0x657   :  { %v5329_v25 = vpop.f32.mrf.mxu2 }
 0x658   :  { %v2086_v15 = vsel %vm394_vm6, %v5329_v25, 0.0 }
 0x659   :  { %v2087_v38 = vadd.f32 %v2086_v15, %v2085_v2 }
 0x65f   :  { %v5331_v8 = vpop.f32.mrf.mxu2 }
 0x660   :  { %v2088_v10 = vsel %vm394_vm6, %v5331_v8, 0.0 }
 0x661   :  { %v2089_v18 = vadd.f32 %v2088_v10, %v2087_v38 }
 0x667   :  { %v5333_v12 = vpop.f32.mrf.mxu2 }
 0x668   :  { %v2090_v34 = vsel %vm394_vm6, %v5333_v12, 0.0 }
 0x669   :  { %v2091_v28 = vadd.f32 %v2090_v34, %v2089_v18 }
 0x66f   :  { %v5335_v11 = vpop.f32.mrf.mxu2 }
 0x670   :  { %v2092_v49 = vsel %vm394_vm6, %v5335_v11, 0.0 }
 0x671   :  { %v2093_v16 = vadd.f32 %v2092_v49, %v2091_v28 }
 0x677   :  { %v5337_v6 = vpop.f32.mrf.mxu2 }
 0x678   :  { %v2094_v14 = vsel %vm394_vm6, %v5337_v6, 0.0 }
 0x679   :  { %v2095_v57 = vadd.f32 %v2094_v14, %v2093_v16 }
 0x683   :  { %v5339_v44 = vpop.f32.mrf.mxu2 }
 0x684   :  { %v2096_v50 = vsel %vm394_vm6, %v5339_v44, 0.0 }
 0x685   :  { %v2097_v2 = vadd.f32 %v2096_v50, %v2095_v57 }
 0x68b   :  { %v5341_v9 = vpop.f32.mrf.mxu2 }
 0x68c   :  { %v2098_v15 = vsel %vm394_vm6, %v5341_v9, 0.0 }
 0x68d   :  { %v2099_v10 = vadd.f32 %v2098_v15, %v2097_v2 }
 0x6ab   :  { %v5349_v37 = vpop.f32.mrf.mxu2 }
 0x6ac   :  { %v2100_v38 = vsel %vm394_vm6, %v5349_v37, 0.0 }
 0x6ad   :  { %v2101_v18 = vadd.f32 %v2100_v38, %v2099_v10 }
 0x6b3   :  { %v5361_v40 = vpop.f32.mrf.mxu2 }
 0x6b4   :  { %v2102_v34 = vsel %vm394_vm6, %v5361_v40, 0.0 }
 0x6b5   :  { %v2103_v28 = vadd.f32 %v2102_v34, %v2101_v18 }
 0x6cc   :  { %v5371_v24 = vpop.f32.mrf.mxu2 }
 0x6cd   :  { %v2104_v49 = vsel %vm394_vm6, %v5371_v24, 0.0 }
 0x6ce   :  { %v2105_v26 = vadd.f32 %v2104_v49, %v2103_v28 }
 0x6d4   :  { %v5379_v14 = vpop.f32.mrf.mxu2 }
 0x6d5   :  { %v2106_v16 = vsel %vm394_vm6, %v5379_v14, 0.0 }
 0x6d6   :  { %v2107_v50 = vadd.f32 %v2106_v16, %v2105_v26 }
 0x6d8   :  { %v2108_v57 = vrot.slane %v2107_v50, 4 }
 0x6da   :  { %v2109_v31 = vadd.f32 %v2108_v57, %v2107_v50 }
 0x6dc   :  { %v2110_v20 = vrot.slane %v2109_v31, 2 }
 0x6de   :  { %v2111_v4 = vadd.f32 %v2110_v20, %v2109_v31 }
 0x6e0   :  { %v2112_v15 = vrot.slane %v2111_v4, 1 }
 0x6e2   :  { %v2113_v2 = vadd.f32 %v2112_v15, %v2111_v4 }
 0x6e4   :  { %v5384_v63 = vmul.f32 %v2113_v2, %v3998_v22 }
 0x6e6   :  { %v2115_v38 = vsub.f32 %v5319_v19, %v5384_v63  ;;  %v2116_v10 = vsub.f32 %v5321_v5, %v5384_v63  ;;  %v2117_v34 = vsub.f32 %v5323_v46, %v5384_v63  ;;  %v2118_v26 = vsub.f32 %v5325_v32, %v5384_v63 }
 0x6e7   :  { %v2119_v4 = vsub.f32 %v5327_v17, %v5384_v63  ;;  %v2120_v20 = vsub.f32 %v5329_v25, %v5384_v63  ;;  %v2121_v15 = vsub.f32 %v5331_v8, %v5384_v63  ;;  %v2122_v54 = vsub.f32 %v5333_v12, %v5384_v63 }
 0x6e8   :  { %v2131_v18 = vmul.f32 %v2115_v38, %v2115_v38  ;;  %v2132_v49 = vmul.f32 %v2116_v10, %v2116_v10  ;;  %v2133_v31 = vmul.f32 %v2117_v34, %v2117_v34  ;;  %v2134_v28 = vmul.f32 %v2118_v26, %v2118_v26 }
 0x6e9   :  { %v2135_v2 = vmul.f32 %v2119_v4, %v2119_v4  ;;  %v2136_v34 = vmul.f32 %v2120_v20, %v2120_v20  ;;  %v2123_v26 = vsub.f32 %v5335_v11, %v5384_v63  ;;  %v2124_v4 = vsub.f32 %v5337_v6, %v5384_v63 }
 0x6ea   :  { %v2147_v16 = vsel %vm394_vm6, %v2131_v18, 0.0  ;;  %v2148_v50 = vsel %vm394_vm6, %v2132_v49, 0.0  ;;  %v2150_v38 = vsel %vm394_vm6, %v2133_v31, 0.0  ;;  %v2152_v41 = vsel %vm394_vm6, %v2134_v28, 0.0 }
 0x6eb   :  { %v2149_v57 = vadd.f32 %v2148_v50, %v2147_v16  ;;  %v2137_v18 = vmul.f32 %v2121_v15, %v2121_v15  ;;  %v2154_v49 = vsel %vm394_vm6, %v2135_v2, 0.0  ;;  %v2138_v50 = vmul.f32 %v2122_v54, %v2122_v54 }
 0x6ec   :  { %v2156_v31 = vsel %vm394_vm6, %v2136_v34, 0.0  ;;  %v2125_v20 = vsub.f32 %v5339_v44, %v5384_v63  ;;  %v2126_v15 = vsub.f32 %v5341_v9, %v5384_v63  ;;  %v2127_v54 = vsub.f32 %v5349_v37, %v5384_v63 }
 0x6ed   :  { %v2151_v10 = vadd.f32 %v2150_v38, %v2149_v57  ;;  %v2139_v38 = vmul.f32 %v2123_v26, %v2123_v26  ;;  %v2128_v26 = vsub.f32 %v5361_v40, %v5384_v63 }
 0x6ef   :  { %v2153_v36 = vadd.f32 %v2152_v41, %v2151_v10  ;;  %v2158_v41 = vsel %vm394_vm6, %v2137_v18, 0.0  ;;  %v2140_v10 = vmul.f32 %v2124_v4, %v2124_v4  ;;  %v2162_v34 = vsel %vm394_vm6, %v2139_v38, 0.0 }
 0x6f0   :  { %v2129_v4 = vsub.f32 %v5371_v24, %v5384_v63 }
 0x6f1   :  { %v2155_v16 = vadd.f32 %v2154_v49, %v2153_v36  ;;  %v2160_v36 = vsel %vm394_vm6, %v2138_v50, 0.0  ;;  %v2141_v49 = vmul.f32 %v2125_v20, %v2125_v20  ;;  %v2164_v18 = vsel %vm394_vm6, %v2140_v10, 0.0 }
 0x6f2   :  { %v2130_v20 = vsub.f32 %v5379_v14, %v5384_v63 }
 0x6f3   :  { %v2157_v57 = vadd.f32 %v2156_v31, %v2155_v16  ;;  %v2142_v31 = vmul.f32 %v2126_v15, %v2126_v15  ;;  %v2166_v50 = vsel %vm394_vm6, %v2141_v49, 0.0 }
 0x6f4   :  { %v2146_v10 = vmul.f32 %v2130_v20, %v2130_v20 }
 0x6f5   :  { %v2159_v28 = vadd.f32 %v2158_v41, %v2157_v57  ;;  %v2143_v41 = vmul.f32 %v2127_v54, %v2127_v54  ;;  %v2168_v38 = vsel %vm394_vm6, %v2142_v31, 0.0 }
 0x6f6   :  { %v2176_v49 = vsel %vm394_vm6, %v2146_v10, 0.0 }
 0x6f7   :  { %v2161_v2 = vadd.f32 %v2160_v36, %v2159_v28  ;;  %v2144_v36 = vmul.f32 %v2128_v26, %v2128_v26  ;;  %v2170_v15 = vsel %vm394_vm6, %v2143_v41, 0.0 }
 0x6f9   :  { %v2163_v16 = vadd.f32 %v2162_v34, %v2161_v2  ;;  %v2145_v34 = vmul.f32 %v2129_v4, %v2129_v4 }
 0x6fb   :  { %v2165_v57 = vadd.f32 %v2164_v18, %v2163_v16  ;;  %v2172_v16 = vsel %vm394_vm6, %v2144_v36, 0.0  ;;  %v2174_v54 = vsel %vm394_vm6, %v2145_v34, 0.0 }
 0x6fd   :  { %v2167_v28 = vadd.f32 %v2166_v50, %v2165_v57 }
 0x6ff   :  { %v2169_v2 = vadd.f32 %v2168_v38, %v2167_v28 }
 0x701   :  { %v2171_v13 = vadd.f32 %v2170_v15, %v2169_v2 }
 0x703   :  { %v2173_v18 = vadd.f32 %v2172_v16, %v2171_v13 }
 0x705   :  { %v2175_v7 = vadd.f32 %v2174_v54, %v2173_v18 }
 0x707   :  { %v2177_v57 = vadd.f32 %v2176_v49, %v2175_v7  ;;  %v3718_v7 = vld [vmem:[%s6735_s5 + $0x1] sm:$0x1] }
 0x709   :  { %v2178_v50 = vrot.slane %v2177_v57, 4 }
 0x70b   :  { %v2179_v0 = vadd.f32 %v2178_v50, %v2177_v57 }
 0x70d   :  { %v2180_v26 = vrot.slane %v2179_v0, 2 }
 0x70f   :  { %v2181_v3 = vadd.f32 %v2180_v26, %v2179_v0 }
 0x711   :  { %v2182_v31 = vrot.slane %v2181_v3, 1 }
 0x713   :  { %v2183_v28 = vadd.f32 %v2182_v31, %v2181_v3  ;;  %v3719_v3 = vld [vmem:[%s6736_s6 + $0x1] sm:$0x1] }
 0x715   :  { %v2184_v4 = vmul.f32 %v2183_v28, %v3998_v22 }
 0x717   :  { %v2185_v41 = vadd.f32 1e-05, %v2184_v4 }
 0x719   :  { %3793 = vrsqrt.f32 %v2185_v41  ;;  %vm2192_vm5 = vweird.f32 %v2185_v41 }
 0x71f   :  { %v3794_v20 = vpop.eup %3793 }
 0x720   :  { %v2187_v38 = vmul.f32 %v3794_v20, %v2185_v41  ;;  %vm2193_vm4 = vweird.f32 %v3794_v20 }
 0x721   :  { %vm2194_vm8 = vmor %vm2192_vm5, %vm2193_vm4 }
 0x722   :  { %v2188_v36 = vmul.f32 %v3794_v20, %v2187_v38 }
 0x724   :  { %v2189_v13 = vmul.f32 0.5, %v2188_v36 }
 0x726   :  { %v2190_v2 = vsub.f32 1.5, %v2189_v13 }
 0x728   :  { %v2191_v34 = vmul.f32 %v3794_v20, %v2190_v2 }
 0x72a   :  { %v2195_v0 = vsel %vm2194_vm8, %v3794_v20, %v2191_v34 }
 0x72b   :  { %v2196_v15 = vmul.f32 %v3718_v7, %v2195_v0 }
 0x72d   :  { %v2197_v10 = vmul.f32 %v2196_v15, %v5384_v63  ;;  %v2200_v16 = vperm.slane %v2196_v15, 0 }
 0x72f   :  { %v2198_v18 = vsub.f32 %v3719_v3, %v2197_v10  ;;  %v2204_v49 = vmul.f32 %v2200_v16, %v5323_v46  ;;  %v2203_v57 = vmul.f32 %v2200_v16, %v5321_v5  ;;  %v2202_v50 = vmul.f32 %v2200_v16, %v5319_v19 }
 0x730   :  { %v2207_v19 = vmul.f32 %v2200_v16, %v5329_v25  ;;  %v2206_v5 = vmul.f32 %v2200_v16, %v5327_v17  ;;  %v2205_v46 = vmul.f32 %v2200_v16, %v5325_v32  ;;  %v2209_v32 = vmul.f32 %v2200_v16, %v5333_v12 }
 0x731   :  { %v2219_v54 = vperm.slane %v2198_v18, 0  ;;  %v2208_v17 = vmul.f32 %v2200_v16, %v5331_v8  ;;  %v2211_v12 = vmul.f32 %v2200_v16, %v5337_v6  ;;  %v2210_v8 = vmul.f32 %v2200_v16, %v5335_v11 }
 0x732   :  { %v2213_v6 = vmul.f32 %v2200_v16, %v5341_v9  ;;  %v2212_v11 = vmul.f32 %v2200_v16, %v5339_v44  ;;  %v2215_v9 = vmul.f32 %v2200_v16, %v5361_v40  ;;  %v2214_v44 = vmul.f32 %v2200_v16, %v5349_v37 }
 0x733   :  { %v5445_v26 = vadd.f32 %v2219_v54, %v2204_v49  ;;  %v5447_v31 = vadd.f32 %v2219_v54, %v2203_v57  ;;  %v5449_v28 = vadd.f32 %v2219_v54, %v2202_v50  ;;  %v5466_v20 = vadd.f32 %v2219_v54, %v2207_v19 }
 0x734   :  { %v5468_v38 = vadd.f32 %v2219_v54, %v2206_v5  ;;  %v5470_v36 = vadd.f32 %v2219_v54, %v2205_v46  ;;  %v5486_v7 = vadd.f32 %v2219_v54, %v2209_v32  ;;  %v5488_v34 = vadd.f32 %v2219_v54, %v2208_v17 }
 0x735   :  { %v6779_v4 = vmax.f32 %v5445_v26, 0.0  ;;  %v2238_v41 = vmax.f32 %v5447_v31, 0.0  ;;  %v2237_v63 = vmax.f32 %v5449_v28, 0.0  ;;  %v6785_v13 = vmax.f32 %v5466_v20, 0.0 }
 0x736   :  { %v6778_v2 = vmax.f32 %v5468_v38, 0.0  ;;  %v6786_v25 = vmax.f32 %v5470_v36, 0.0  ;;  %v6784_v0 = vmax.f32 %v5486_v7, 0.0  ;;  %v6777_v15 = vmax.f32 %v5488_v34, 0.0 }
 0x737   :  { %2337 = vrot.lane.b32.xlu2 %v6779_v4, %s3800_s2  ;;  %2335 = vrot.lane.b32.xlu1 %v2238_v41, %s3800_s2  ;;  %v5500_v3 = vadd.f32 %v2219_v54, %v2211_v12  ;;  %v5502_v10 = vadd.f32 %v2219_v54, %v2210_v8  ;;  %v5514_v57 = vadd.f32 %v2219_v54, %v2213_v6 }
 0x738   :  { %2333 = vrot.lane.b32.xlu0 %v2237_v63, %s3800_s2  ;;  %v5516_v50 = vadd.f32 %v2219_v54, %v2212_v11  ;;  %v5528_v46 = vadd.f32 %v2219_v54, %v2215_v9  ;;  %v5530_v32 = vadd.f32 %v2219_v54, %v2214_v44  ;;  %v2217_v8 = vmul.f32 %v2200_v16, %v5379_v14 }
 0x739   :  { %v6783_v18 = vmax.f32 %v5500_v3, 0.0  ;;  %v6776_v49 = vmax.f32 %v5502_v10, 0.0  ;;  %v6782_v19 = vmax.f32 %v5514_v57, 0.0  ;;  %v2216_v40 = vmul.f32 %v2200_v16, %v5371_v24 }
 0x73a   :  { %v6775_v5 = vmax.f32 %v5516_v50, 0.0  ;;  %v6781_v17 = vmax.f32 %v5528_v46, 0.0  ;;  %v6774_v12 = vmax.f32 %v5530_v32, 0.0  ;;  %v5542_v37 = vadd.f32 %v2219_v54, %v2217_v8 }
 0x73b   :  { %v5544_v6 = vadd.f32 %v2219_v54, %v2216_v40 }
 0x73c   :  { %v6780_v11 = vmax.f32 %v5542_v37, 0.0 }
 0x73d   :  { %v6773_v9 = vmax.f32 %v5544_v6, 0.0 }
 0x73f   :  { %2343 = vrot.lane.b32.xlu2 %v6785_v13, %s3800_s2  ;;  %2341 = vrot.lane.b32.xlu1 %v6778_v2, %s3800_s2 }
 0x740   :  { %2339 = vrot.lane.b32.xlu0 %v6786_v25, %s3800_s2  ;;  %v3764_v25 = vld [vmem:[%s6734_s4 + $0x30] sm:$0xff] }
 0x747   :  { %2347 = vrot.lane.b32.xlu2 %v6784_v0, %s3800_s2 }
 0x748   :  { %2345 = vrot.lane.b32.xlu0 %v6777_v15, %s3800_s2 }
 0x74f   :  { %2351 = vrot.lane.b32.xlu2 %v6783_v18, %s3800_s2 }
 0x750   :  { %2349 = vrot.lane.b32.xlu0 %v6776_v49, %s3800_s2 }
 0x757   :  { %2355 = vrot.lane.b32.xlu2 %v6782_v19, %s3800_s2 }
 0x758   :  { %2353 = vrot.lane.b32.xlu0 %v6775_v5, %s3800_s2 }
 0x75f   :  { %2359 = vrot.lane.b32.xlu2 %v6781_v17, %s3800_s2 }
 0x760   :  { %2357 = vrot.lane.b32.xlu0 %v6774_v12, %s3800_s2 }
 0x767   :  { %2363 = vrot.lane.b32.xlu2 %v6780_v11, %s3800_s2 }
 0x768   :  { %2361 = vrot.lane.b32.xlu0 %v6773_v9, %s3800_s2 }
 0x791   :  { %v2338_v8 = vpop.permute.xlu2 %2337 }
 0x7a9   :  { %v2336_v24 = vpop.permute.xlu1 %2335 }
 0x7aa   :  { %v2334_v14 = vpop.permute.xlu0 %2333  ;;  %v5566_v54 = vadd.f32 %v2336_v24, %v4074_v30 }
 0x7ab   :  { %v5555_v44 = vadd.f32 %v2334_v14, %v4072_v29  ;;  %v5575_v14 = vadd.f32 %v2338_v8, %v4076_v43  ;;  %v2344_v43 = vpop.permute.xlu2 %2343 }
 0x7ad   :  { %2605 = vst.msk [vmem:[#allocation2 + $0x12] sm:$0xff] %vm623_vm12, %v5555_v44  ;;  %2541 = vrot.lane.b32.xlu0 %v5555_v44, %s3801_s3  ;;  %2477 = vrot.lane.b32.xlu2 %v5555_v44, %s3809_s30 }
 0x7ae   :  { %2413 = vrot.lane.b32.xlu1 %v5555_v44, %s3810_s27 }
 0x7b2   :  { %v2340_v16 = vpop.permute.xlu0 %2339 }
 0x7b3   :  { %v5606_v8 = vpop.permute.xlu2 %2347  ;;  %v5620_v5 = vadd.f32 %v2340_v16, %v4133_v60  ;;  %v5653_v16 = vadd.f32 %v2344_v43, %v4069_v42  ;;  %v3724_v43 = vld [vmem:[%s6734_s4 + $0x38] sm:$0x3] }
 0x7b4   :  { %v2980_v19 = vunpack.c.l.b16 %v3724_v43 }
 0x7b5   :  { %2685 = vrot.lane.b32.xlu0 %v5555_v44, %s3803_s16  ;;  %2623 = vrot.lane.b32.xlu2 %v5566_v54, %s3802_s15 }
 0x7b6   :  { %2621 = vrot.lane.b32.xlu1 %v5555_v44, %s3802_s15  ;;  %v2983_v0 = vpack.c.b16 %v2980_v19, %v2980_v19  ;;  %v5714_v19 = vadd.f32 %v5606_v8, %v4089_v39 }
 0x7b8   :  { %v3011_v13 = vsel %vm1033_vm10, %v2983_v0, 0 }
 0x7b9   :  { %3018 = vmatpush.bf16.msrb.mxu3 %v3011_v13  ;;  %v3763_v13 = vld [vmem:[%s6734_s4 + $0x28] sm:$0xff] }
 0x7ba   :  { %v2346_v40 = vpop.permute.xlu0 %2345 }
 0x7bb   :  { %v5614_v9 = vpop.permute.xlu2 %2351  ;;  %v5664_v2 = vadd.f32 %v2346_v40, %v4067_v33 }
 0x7bd   :  { %2753 = vrot.lane.b32.xlu0 %v5575_v14, %s3800_s2  ;;  %2751 = vrot.lane.b32.xlu2 %v5566_v54, %s3800_s2 }
 0x7be   :  { %2687 = vrot.lane.b32.xlu1 %v5566_v54, %s3803_s16  ;;  %3019 = vmatpush.bf16.msrb.mxu3 %v3764_v25 }
 0x7c2   :  { %v2350_v30 = vpop.permute.xlu0 %2349  ;;  %3020 = vmatpush.bf16.msrb.mxu3 %v3763_v13 }
 0x7c3   :  { %v5584_v24 = vadd.f32 %v2350_v30, %v4093_v48  ;;  %v2342_v30 = vpop.permute.xlu1 %2341  ;;  %v5628_v49 = vpop.permute.xlu2 %2355 }
 0x7c4   :  { %v5617_v12 = vadd.f32 %v2342_v30, %v4127_v1 }
 0x7c5   :  { %2613 = vst.msk [vmem:[#allocation2 + $0xb2] sm:$0xff] %vm623_vm12, %v5584_v24  ;;  %2879 = vrot.lane.b32.xlu0 %v5566_v54, %s3806_s19  ;;  %2817 = vrot.lane.b32.xlu2 %v5575_v14, %s3804_s17 }
 0x7c6   :  { %2815 = vrot.lane.b32.xlu1 %v5566_v54, %s3804_s17 }
 0x7ca   :  { %v5655_v30 = vpop.permute.xlu0 %2353 }
 0x7cb   :  { %v5636_v1 = vpop.permute.xlu2 %2359 }
 0x7cd   :  { %2415 = vrot.lane.b32.xlu0 %v5566_v54, %s3810_s27  ;;  %2479 = vrot.lane.b32.xlu2 %v5566_v54, %s3809_s30 }
 0x7ce   :  { %2881 = vrot.lane.b32.xlu1 %v5575_v14, %s3806_s19 }
 0x7d2   :  { %v5666_v4 = vpop.permute.xlu0 %2357 }
 0x7d3   :  { %v5650_v60 = vpop.permute.xlu2 %2363 }
 0x7d5   :  { %2481 = vrot.lane.b32.xlu0 %v5575_v14, %s3809_s30  ;;  %2545 = vrot.lane.b32.xlu2 %v5575_v14, %s3801_s3 }
 0x7d6   :  { %2417 = vrot.lane.b32.xlu1 %v5575_v14, %s3810_s27 }
 0x7da   :  { %v5680_v33 = vpop.permute.xlu0 %2361 }
 0x7dd   :  { %2625 = vrot.lane.b32.xlu0 %v5575_v14, %s3802_s15  ;;  %2689 = vrot.lane.b32.xlu2 %v5575_v14, %s3803_s16 }
 0x7de   :  { %2543 = vrot.lane.b32.xlu1 %v5566_v54, %s3801_s3 }
 0x7e5   :  { %2757 = vrot.lane.b32.xlu2 %v5617_v12, %s3800_s2  ;;  %2691 = vrot.lane.b32.xlu0 %v5620_v5, %s3803_s16 }
 0x7e6   :  { %2627 = vrot.lane.b32.xlu1 %v5620_v5, %s3802_s15 }
 0x7ed   :  { %2821 = vrot.lane.b32.xlu2 %v5617_v12, %s3804_s17  ;;  %2883 = vrot.lane.b32.xlu0 %v5620_v5, %s3806_s19 }
 0x7ee   :  { %2755 = vrot.lane.b32.xlu1 %v5620_v5, %s3800_s2 }
 0x7f5   :  { %2421 = vrot.lane.b32.xlu2 %v5617_v12, %s3810_s27  ;;  %2483 = vrot.lane.b32.xlu0 %v5620_v5, %s3809_s30 }
 0x7f6   :  { %2819 = vrot.lane.b32.xlu1 %v5620_v5, %s3804_s17 }
 0x7fd   :  { %2547 = vrot.lane.b32.xlu2 %v5620_v5, %s3801_s3  ;;  %2549 = vrot.lane.b32.xlu0 %v5617_v12, %s3801_s3 }
 0x7fe   :  { %2885 = vrot.lane.b32.xlu1 %v5617_v12, %s3806_s19 }
 0x805   :  { %2631 = vrot.lane.b32.xlu2 %v5653_v16, %s3802_s15  ;;  %2693 = vrot.lane.b32.xlu0 %v5617_v12, %s3803_s16 }
 0x806   :  { %2419 = vrot.lane.b32.xlu1 %v5620_v5, %s3810_s27 }
 0x807   :  { %v2478_v15 = vpop.permute.xlu2 %2477 }
 0x80d   :  { %2759 = vrot.lane.b32.xlu2 %v5653_v16, %s3800_s2  ;;  %2761 = vrot.lane.b32.xlu0 %v5664_v2, %s3800_s2 }
 0x80e   :  { %2485 = vrot.lane.b32.xlu1 %v5617_v12, %s3809_s30 }
 0x80f   :  { %v2624_v42 = vpop.permute.xlu2 %2623 }
 0x815   :  { %2825 = vrot.lane.b32.xlu2 %v5664_v2, %s3804_s17  ;;  %2887 = vrot.lane.b32.xlu0 %v5653_v16, %s3806_s19 }
 0x816   :  { %2629 = vrot.lane.b32.xlu1 %v5617_v12, %s3802_s15 }
 0x817   :  { %v2752_v40 = vpop.permute.xlu2 %2751 }
 0x81d   :  { %2487 = vrot.lane.b32.xlu2 %v5653_v16, %s3809_s30  ;;  %2551 = vrot.lane.b32.xlu0 %v5653_v16, %s3801_s3 }
 0x81e   :  { %2695 = vrot.lane.b32.xlu1 %v5653_v16, %s3803_s16 }
 0x81f   :  { %v2818_v11 = vpop.permute.xlu2 %2817  ;;  %v2542_v17 = vpop.permute.xlu0 %2541 }
 0x820   :  { %v2414_v18 = vpop.permute.xlu1 %2413 }
 0x821   :  { %2461 = vst.msk [vmem:[#allocation2 + $0x22] sm:$0xff] %vm394_vm6, %v2414_v18 }
 0x822   :  { %2525 = vst.msk [vmem:[#allocation2 + $0x21] sm:$0xff] %vm492_vm9, %v2478_v15 }
 0x823   :  { %2589 = vst.msk [vmem:[#allocation2 + $0x20] sm:$0xff] %vm557_vm11, %v2542_v17 }
 0x824   :  { %2606 = vst.msk [vmem:[#allocation2 + $0x22] sm:$0xff] %vm623_vm12, %v5566_v54 }
 0x825   :  { %2670 = vst.msk [vmem:[#allocation2 + $0x21] sm:$0xff] %vm688_vm13, %v2624_v42  ;;  %2489 = vrot.lane.b32.xlu2 %v5664_v2, %s3809_s30  ;;  %2633 = vrot.lane.b32.xlu0 %v5664_v2, %s3802_s15 }
 0x826   :  { %2823 = vrot.lane.b32.xlu1 %v5653_v16, %s3804_s17 }
 0x827   :  { %v2480_v0 = vpop.permute.xlu2 %2479  ;;  %v2686_v15 = vpop.permute.xlu0 %2685 }
 0x828   :  { %v2622_v18 = vpop.permute.xlu1 %2621 }
 0x829   :  { %2669 = vst.msk [vmem:[#allocation2 + $0x11] sm:$0xff] %vm688_vm13, %v2622_v18  ;;  %v5745_v18 = vadd.f32 %v5614_v9, %v4098_v51  ;;  %v5757_v51 = vadd.f32 %v5655_v30, %v4103_v52 }
 0x82a   :  { %2733 = vst.msk [vmem:[#allocation2 + $0x10] sm:$0xff] %vm753_vm14, %v2686_v15 }
 0x82b   :  { %2798 = vst.msk [vmem:[#allocation2 + $0x12] sm:$0xff] %vm818_vm15, %v2752_v40 }
 0x82d   :  { %2697 = vrot.lane.b32.xlu2 %v5664_v2, %s3803_s16  ;;  %2763 = vrot.lane.b32.xlu0 %v5714_v19, %s3800_s2 }
 0x82e   :  { %2889 = vrot.lane.b32.xlu1 %v5664_v2, %s3806_s19 }
 0x82f   :  { %v2546_v25 = vpop.permute.xlu2 %2545  ;;  %v2754_v17 = vpop.permute.xlu0 %2753 }
 0x830   :  { %v2688_v54 = vpop.permute.xlu1 %2687 }
 0x831   :  { %2734 = vst.msk [vmem:[#allocation2 + $0x20] sm:$0xff] %vm753_vm14, %v2688_v54 }
 0x832   :  { %2799 = vst.msk [vmem:[#allocation2 + $0x22] sm:$0xff] %vm818_vm15, %v2754_v17 }
 0x833   :  { %2863 = vst.msk [vmem:[#allocation2 + $0x21] sm:$0xff] %vm883_vm2, %v2818_v11 }
 0x835   :  { %2827 = vrot.lane.b32.xlu2 %v5714_v19, %s3804_s17  ;;  %2699 = vrot.lane.b32.xlu0 %v5714_v19, %s3803_s16 }
 0x836   :  { %2423 = vrot.lane.b32.xlu1 %v5653_v16, %s3810_s27 }
 0x837   :  { %v2690_v8 = vpop.permute.xlu2 %2689  ;;  %v2880_v42 = vpop.permute.xlu0 %2879 }
 0x838   :  { %v2816_v40 = vpop.permute.xlu1 %2815 }
 0x839   :  { %2862 = vst.msk [vmem:[#allocation2 + $0x11] sm:$0xff] %vm883_vm2, %v2816_v40 }
 0x83a   :  { %2926 = vst.msk [vmem:[#allocation2 + $0x10] sm:$0xff] %vm948_vm3, %v2880_v42 }
 0x83d   :  { %2557 = vrot.lane.b32.xlu0 %v5584_v24, %s3801_s3  ;;  %2493 = vrot.lane.b32.xlu2 %v5584_v24, %s3809_s30 }
 0x83e   :  { %2425 = vrot.lane.b32.xlu1 %v5664_v2, %s3810_s27 }
 0x83f   :  { %v2758_v11 = vpop.permute.xlu2 %2757  ;;  %v2416_v43 = vpop.permute.xlu0 %2415 }
 0x840   :  { %v2882_v15 = vpop.permute.xlu1 %2881  ;;  %2462 = vst.msk [vmem:[#allocation2 + $0x32] sm:$0xff] %vm394_vm6, %v2416_v43 }
 0x841   :  { %2927 = vst.msk [vmem:[#allocation2 + $0x20] sm:$0xff] %vm948_vm3, %v2882_v15  ;;  %v2941_v42 = vld [vmem:[#allocation2 + $0x11] sm:$0xff] }
 0x842   :  { %2526 = vst.msk [vmem:[#allocation2 + $0x31] sm:$0xff] %vm492_vm9, %v2480_v0 }
 0x845   :  { %2701 = vrot.lane.b32.xlu0 %v5584_v24, %s3803_s16  ;;  %2639 = vrot.lane.b32.xlu2 %v5745_v18, %s3802_s15 }
 0x846   :  { %2553 = vrot.lane.b32.xlu1 %v5664_v2, %s3801_s3 }
 0x847   :  { %v2822_v13 = vpop.permute.xlu2 %2821  ;;  %v2482_v17 = vpop.permute.xlu0 %2481 }
 0x848   :  { %v2418_v54 = vpop.permute.xlu1 %2417  ;;  %v2942_v40 = vld [vmem:[#allocation2 + $0x21] sm:$0xff] }
 0x849   :  { %2463 = vst.msk [vmem:[#allocation2 + $0x42] sm:$0xff] %vm394_vm6, %v2418_v54  ;;  %v2957_v0 = vpack.c.bf16 %v2942_v40, %v2941_v42 }
 0x84a   :  { %2527 = vst.msk [vmem:[#allocation2 + $0x41] sm:$0xff] %vm492_vm9, %v2482_v17 }
 0x84b   :  { %2591 = vst.msk [vmem:[#allocation2 + $0x40] sm:$0xff] %vm557_vm11, %v2546_v25  ;;  %3733 = vmatmul.msk.bf16.vlgmr.msrb.gmra.mxu3 %vm352_vm7, %v2957_v0  ;;  %v5809_v0 = vadd.f32 %v5628_v49, %v4108_v56 }
 0x84c   :  { %2608 = vst.msk [vmem:[#allocation2 + $0x42] sm:$0xff] %vm623_vm12, %v5620_v5 }
 0x84d   :  { %2767 = vrot.lane.b32.xlu2 %v5745_v18, %s3800_s2  ;;  %2769 = vrot.lane.b32.xlu0 %v5757_v51, %s3800_s2 }
 0x84e   :  { %2635 = vrot.lane.b32.xlu1 %v5714_v19, %s3802_s15 }
 0x84f   :  { %v2422_v9 = vpop.permute.xlu2 %2421  ;;  %v2626_v43 = vpop.permute.xlu0 %2625 }
 0x850   :  { %2465 = vst.msk [vmem:[#allocation2 + $0x62] sm:$0xff] %vm394_vm6, %v2422_v9  ;;  %v2544_v52 = vpop.permute.xlu1 %2543  ;;  %v5813_v9 = vadd.f32 %v5666_v4, %v4113_v58 }
 0x851   :  { %2590 = vst.msk [vmem:[#allocation2 + $0x30] sm:$0xff] %vm557_vm11, %v2544_v52 }
 0x852   :  { %2607 = vst.msk [vmem:[#allocation2 + $0x32] sm:$0xff] %vm623_vm12, %v5575_v14 }
 0x853   :  { %2671 = vst.msk [vmem:[#allocation2 + $0x31] sm:$0xff] %vm688_vm13, %v2626_v43 }
 0x854   :  { %2735 = vst.msk [vmem:[#allocation2 + $0x30] sm:$0xff] %vm753_vm14, %v2690_v8 }
 0x855   :  { %2833 = vrot.lane.b32.xlu2 %v5757_v51, %s3804_s17  ;;  %2895 = vrot.lane.b32.xlu0 %v5745_v18, %s3806_s19 }
 0x856   :  { %2891 = vrot.lane.b32.xlu1 %v5714_v19, %s3806_s19 }
 0x857   :  { %v2548_v5 = vpop.permute.xlu2 %2547  ;;  %v2692_v30 = vpop.permute.xlu0 %2691 }
 0x858   :  { %v2628_v25 = vpop.permute.xlu1 %2627 }
 0x859   :  { %2672 = vst.msk [vmem:[#allocation2 + $0x41] sm:$0xff] %vm688_vm13, %v2628_v25 }
 0x85a   :  { %2736 = vst.msk [vmem:[#allocation2 + $0x40] sm:$0xff] %vm753_vm14, %v2692_v30 }
 0x85b   :  { %2801 = vst.msk [vmem:[#allocation2 + $0x42] sm:$0xff] %vm818_vm15, %v2758_v11 }
 0x85c   :  { %2865 = vst.msk [vmem:[#allocation2 + $0x41] sm:$0xff] %vm883_vm2, %v2822_v13 }
 0x85d   :  { %2495 = vrot.lane.b32.xlu2 %v5745_v18, %s3809_s30  ;;  %2431 = vrot.lane.b32.xlu0 %v5745_v18, %s3810_s27 }
 0x85e   :  { %2429 = vrot.lane.b32.xlu1 %v5584_v24, %s3810_s27 }
 0x85f   :  { %v2632_v14 = vpop.permute.xlu2 %2631  ;;  %v2884_v8 = vpop.permute.xlu0 %2883 }
 0x860   :  { %v2756_v15 = vpop.permute.xlu1 %2755 }
 0x861   :  { %2800 = vst.msk [vmem:[#allocation2 + $0x32] sm:$0xff] %vm818_vm15, %v2756_v15 }
 0x865   :  { %2561 = vrot.lane.b32.xlu2 %v5757_v51, %s3801_s3  ;;  %2497 = vrot.lane.b32.xlu0 %v5757_v51, %s3809_s30 }
 0x866   :  { %2637 = vrot.lane.b32.xlu1 %v5584_v24, %s3802_s15 }
 0x867   :  { %v2760_v11 = vpop.permute.xlu2 %2759  ;;  %v2484_v13 = vpop.permute.xlu0 %2483 }
 0x868   :  { %v2820_v17 = vpop.permute.xlu1 %2819 }
 0x869   :  { %2864 = vst.msk [vmem:[#allocation2 + $0x31] sm:$0xff] %vm883_vm2, %v2820_v17  ;;  %v5861_v17 = vadd.f32 %v5636_v1, %v4137_v61 }
 0x86a   :  { %2928 = vst.msk [vmem:[#allocation2 + $0x30] sm:$0xff] %vm948_vm3, %v2884_v8 }
 0x86d   :  { %2705 = vrot.lane.b32.xlu2 %v5757_v51, %s3803_s16  ;;  %2641 = vrot.lane.b32.xlu0 %v5757_v51, %s3802_s15 }
 0x86e   :  { %2703 = vrot.lane.b32.xlu1 %v5745_v18, %s3803_s16 }
 0x86f   :  { %v2826_v54 = vpop.permute.xlu2 %2825  ;;  %v2550_v42 = vpop.permute.xlu0 %2549 }
 0x870   :  { %v2886_v40 = vpop.permute.xlu1 %2885 }
 0x871   :  { %2929 = vst.msk [vmem:[#allocation2 + $0x40] sm:$0xff] %vm948_vm3, %v2886_v40  ;;  %v2943_v25 = vld [vmem:[#allocation2 + $0x31] sm:$0xff] }
 0x875   :  { %2707 = vrot.lane.b32.xlu0 %v5809_v0, %s3803_s16  ;;  %2773 = vrot.lane.b32.xlu2 %v5813_v9, %s3800_s2 }
 0x876   :  { %2831 = vrot.lane.b32.xlu1 %v5745_v18, %s3804_s17 }
 0x877   :  { %v5821_v43 = vpop.permute.xlu2 %2487  ;;  %v2694_v52 = vpop.permute.xlu0 %2693 }
 0x878   :  { %v2420_v30 = vpop.permute.xlu1 %2419  ;;  %v2944_v56 = vld [vmem:[#allocation2 + $0x41] sm:$0xff] }
 0x879   :  { %2464 = vst.msk [vmem:[#allocation2 + $0x52] sm:$0xff] %vm394_vm6, %v2420_v30  ;;  %v2958_v49 = vpack.c.bf16 %v2944_v56, %v2943_v25 }
 0x87a   :  { %2528 = vst.msk [vmem:[#allocation2 + $0x51] sm:$0xff] %vm492_vm9, %v2484_v13 }
 0x87b   :  { %2592 = vst.msk [vmem:[#allocation2 + $0x50] sm:$0xff] %vm557_vm11, %v2548_v5  ;;  %3734 = vmatmul.msk.bf16.gmra.mxu3 %vm352_vm7, %v2958_v49 }
 0x87c   :  { %2609 = vst.msk [vmem:[#allocation2 + $0x52] sm:$0xff] %vm623_vm12, %v5617_v12 }
 0x87d   :  { %2835 = vrot.lane.b32.xlu0 %v5809_v0, %s3804_s17  ;;  %2899 = vrot.lane.b32.xlu2 %v5809_v0, %s3806_s19 }
 0x87e   :  { %2897 = vrot.lane.b32.xlu1 %v5757_v51, %s3806_s19 }
 0x87f   :  { %v5835_v58 = vpop.permute.xlu2 %2489  ;;  %v2762_v4 = vpop.permute.xlu0 %2761 }
 0x880   :  { %v2486_v8 = vpop.permute.xlu1 %2485 }
 0x881   :  { %2529 = vst.msk [vmem:[#allocation2 + $0x61] sm:$0xff] %vm492_vm9, %v2486_v8 }
 0x882   :  { %2593 = vst.msk [vmem:[#allocation2 + $0x60] sm:$0xff] %vm557_vm11, %v2550_v42 }
 0x883   :  { %2610 = vst.msk [vmem:[#allocation2 + $0x62] sm:$0xff] %vm623_vm12, %v5653_v16 }
 0x884   :  { %2674 = vst.msk [vmem:[#allocation2 + $0x61] sm:$0xff] %vm688_vm13, %v2632_v14 }
 0x885   :  { %2901 = vrot.lane.b32.xlu0 %v5813_v9, %s3806_s19  ;;  %2437 = vrot.lane.b32.xlu2 %v5813_v9, %s3810_s27 }
 0x886   :  { %2433 = vrot.lane.b32.xlu1 %v5757_v51, %s3810_s27 }
 0x887   :  { %v2698_v12 = vpop.permute.xlu2 %2697  ;;  %v2888_v5 = vpop.permute.xlu0 %2887 }
 0x888   :  { %v2630_v15 = vpop.permute.xlu1 %2629 }
 0x889   :  { %2673 = vst.msk [vmem:[#allocation2 + $0x51] sm:$0xff] %vm688_vm13, %v2630_v15 }
 0x88a   :  { %2737 = vst.msk [vmem:[#allocation2 + $0x50] sm:$0xff] %vm753_vm14, %v2694_v52  ;;  %v5885_v52 = vadd.f32 %v5680_v33, %v4141_v62 }
 0x88b   :  { %2802 = vst.msk [vmem:[#allocation2 + $0x52] sm:$0xff] %vm818_vm15, %v2760_v11 }
 0x88d   :  { %2499 = vrot.lane.b32.xlu0 %v5809_v0, %s3809_s30  ;;  %2563 = vrot.lane.b32.xlu2 %v5809_v0, %s3801_s3 }
 0x88e   :  { %2559 = vrot.lane.b32.xlu1 %v5745_v18, %s3801_s3 }
 0x88f   :  { %v2828_v16 = vpop.permute.xlu2 %2827  ;;  %v2552_v14 = vpop.permute.xlu0 %2551 }
 0x890   :  { %v2696_v13 = vpop.permute.xlu1 %2695 }
 0x891   :  { %2738 = vst.msk [vmem:[#allocation2 + $0x60] sm:$0xff] %vm753_vm14, %v2696_v13 }
 0x892   :  { %2803 = vst.msk [vmem:[#allocation2 + $0x62] sm:$0xff] %vm818_vm15, %v2762_v4 }
 0x893   :  { %2867 = vst.msk [vmem:[#allocation2 + $0x61] sm:$0xff] %vm883_vm2, %v2826_v54 }
 0x895   :  { %2565 = vrot.lane.b32.xlu0 %v5813_v9, %s3801_s3  ;;  %2647 = vrot.lane.b32.xlu2 %v5861_v17, %s3802_s15 }
 0x896   :  { %2643 = vrot.lane.b32.xlu1 %v5809_v0, %s3802_s15 }
 0x897   :  { %v5870_v11 = vpop.permute.xlu2 %2493  ;;  %v2634_v42 = vpop.permute.xlu0 %2633 }
 0x898   :  { %v2824_v40 = vpop.permute.xlu1 %2823 }
 0x899   :  { %2866 = vst.msk [vmem:[#allocation2 + $0x51] sm:$0xff] %vm883_vm2, %v2824_v40 }
 0x89a   :  { %2930 = vst.msk [vmem:[#allocation2 + $0x50] sm:$0xff] %vm948_vm3, %v2888_v5 }
 0x89d   :  { %2709 = vrot.lane.b32.xlu0 %v5813_v9, %s3803_s16  ;;  %2775 = vrot.lane.b32.xlu2 %v5861_v17, %s3800_s2 }
 0x89e   :  { %2771 = vrot.lane.b32.xlu1 %v5809_v0, %s3800_s2 }
 0x89f   :  { %v5880_v61 = vpop.permute.xlu2 %2639  ;;  %v2764_v1 = vpop.permute.xlu0 %2763 }
 0x8a0   :  { %v2890_v54 = vpop.permute.xlu1 %2889 }
 0x8a1   :  { %2931 = vst.msk [vmem:[#allocation2 + $0x60] sm:$0xff] %vm948_vm3, %v2890_v54  ;;  %v2945_v49 = vld [vmem:[#allocation2 + $0x51] sm:$0xff] }
 0x8a5   :  { %2841 = vrot.lane.b32.xlu2 %v5885_v52, %s3804_s17  ;;  %2777 = vrot.lane.b32.xlu0 %v5885_v52, %s3800_s2 }
 0x8a6   :  { %2837 = vrot.lane.b32.xlu1 %v5813_v9, %s3804_s17 }
 0x8a7   :  { %v5893_v30 = vpop.permute.xlu2 %2767  ;;  %v2700_v25 = vpop.permute.xlu0 %2699 }
 0x8a8   :  { %v2424_v56 = vpop.permute.xlu1 %2423  ;;  %v2946_v4 = vld [vmem:[#allocation2 + $0x61] sm:$0xff] }
 0x8a9   :  { %2466 = vst.msk [vmem:[#allocation2 + $0x72] sm:$0xff] %vm394_vm6, %v2424_v56  ;;  %v2959_v8 = vpack.c.bf16 %v2946_v4, %v2945_v49  ;;  %v6799_v4 = vmax.f32 %v4742_v27, 0.0 }
 0x8aa   :  { %2530 = vst.msk [vmem:[#allocation2 + $0x71] sm:$0xff] %vm492_vm9, %v5821_v43 }
 0x8ab   :  { %2594 = vst.msk [vmem:[#allocation2 + $0x70] sm:$0xff] %vm557_vm11, %v2552_v14  ;;  %3735 = vmatmul.msk.bf16.gmra.mxu3 %vm352_vm7, %v2959_v8  ;;  %v5938_v14 = vadd.f32 %v5650_v60, %v4117_v59 }
 0x8ac   :  { %2611 = vst.msk [vmem:[#allocation2 + $0x72] sm:$0xff] %vm623_vm12, %v5664_v2 }
 0x8ad   :  { %2675 = vst.msk [vmem:[#allocation2 + $0x71] sm:$0xff] %vm688_vm13, %v2634_v42  ;;  %2439 = vrot.lane.b32.xlu2 %v5861_v17, %s3810_s27  ;;  %2903 = vrot.lane.b32.xlu0 %v5861_v17, %s3806_s19 }
 0x8ae   :  { %2739 = vst.msk [vmem:[#allocation2 + $0x70] sm:$0xff] %vm753_vm14, %v2698_v12  ;;  %2435 = vrot.lane.b32.xlu1 %v5809_v0, %s3810_s27 }
 0x8af   :  { %2804 = vst.msk [vmem:[#allocation2 + $0x72] sm:$0xff] %vm818_vm15, %v2764_v1  ;;  %v5911_v62 = vpop.permute.xlu2 %2833  ;;  %v2558_v33 = vpop.permute.xlu0 %2557 }
 0x8b0   :  { %2868 = vst.msk [vmem:[#allocation2 + $0x71] sm:$0xff] %vm883_vm2, %v2828_v16  ;;  %v2426_v2 = vpop.permute.xlu1 %2425 }
 0x8b1   :  { %2467 = vst.msk [vmem:[#allocation2 + $0x82] sm:$0xff] %vm394_vm6, %v2426_v2 }
 0x8b2   :  { %2531 = vst.msk [vmem:[#allocation2 + $0x81] sm:$0xff] %vm492_vm9, %v5835_v58 }
 0x8b5   :  { %2441 = vrot.lane.b32.xlu2 %v5885_v52, %s3810_s27  ;;  %2503 = vrot.lane.b32.xlu0 %v5861_v17, %s3809_s30 }
 0x8b6   :  { %2501 = vrot.lane.b32.xlu1 %v5813_v9, %s3809_s30 }
 0x8b7   :  { %v2496_v43 = vpop.permute.xlu2 %2495  ;;  %v2702_v12 = vpop.permute.xlu0 %2701 }
 0x8b8   :  { %v2554_v5 = vpop.permute.xlu1 %2553 }
 0x8b9   :  { %2595 = vst.msk [vmem:[#allocation2 + $0x80] sm:$0xff] %vm557_vm11, %v2554_v5 }
 0x8ba   :  { %2612 = vst.msk [vmem:[#allocation2 + $0x82] sm:$0xff] %vm623_vm12, %v5714_v19 }
 0x8bd   :  { %2569 = vrot.lane.b32.xlu2 %v5885_v52, %s3801_s3  ;;  %2505 = vrot.lane.b32.xlu0 %v5885_v52, %s3809_s30 }
 0x8be   :  { %2645 = vrot.lane.b32.xlu1 %v5813_v9, %s3802_s15 }
 0x8bf   :  { %v5932_v58 = vpop.permute.xlu2 %2561  ;;  %v2770_v15 = vpop.permute.xlu0 %2769 }
 0x8c0   :  { %v2636_v16 = vpop.permute.xlu1 %2635 }
 0x8c1   :  { %2676 = vst.msk [vmem:[#allocation2 + $0x81] sm:$0xff] %vm688_vm13, %v2636_v16 }
 0x8c2   :  { %2740 = vst.msk [vmem:[#allocation2 + $0x80] sm:$0xff] %vm753_vm14, %v2700_v25 }
 0x8c5   :  { %2651 = vrot.lane.b32.xlu2 %v5938_v14, %s3802_s15  ;;  %2713 = vrot.lane.b32.xlu0 %v5885_v52, %s3803_s16 }
 0x8c6   :  { %2711 = vrot.lane.b32.xlu1 %v5861_v17, %s3803_s16 }
 0x8c7   :  { %v5946_v13 = vpop.permute.xlu2 %2705  ;;  %v2896_v42 = vpop.permute.xlu0 %2895 }
 0x8c8   :  { %v2892_v40 = vpop.permute.xlu1 %2891 }
 0x8c9   :  { %2932 = vst.msk [vmem:[#allocation2 + $0x70] sm:$0xff] %vm948_vm3, %v2892_v40  ;;  %v2948_v56 = vld [vmem:[#allocation2 + $0x81] sm:$0xff]  ;;  %v6804_v40 = vmax.f32 %v4740_v23, 0.0 }
 0x8cd   :  { %2907 = vrot.lane.b32.xlu2 %v5938_v14, %s3806_s19  ;;  %2843 = vrot.lane.b32.xlu0 %v5938_v14, %s3804_s17 }
 0x8ce   :  { %2839 = vrot.lane.b32.xlu1 %v5861_v17, %s3804_s17 }
 0x8cf   :  { %v5955_v60 = vpop.permute.xlu2 %2773  ;;  %v2432_v1 = vpop.permute.xlu0 %2431 }
 0x8d0   :  { %v2430_v54 = vpop.permute.xlu1 %2429  ;;  %2470 = vst.msk [vmem:[#allocation2 + $0xd2] sm:$0xff] %vm394_vm6, %v2432_v1  ;;  %v2947_v25 = vld [vmem:[#allocation2 + $0x71] sm:$0xff] }
 0x8d1   :  { %2469 = vst.msk [vmem:[#allocation2 + $0xc2] sm:$0xff] %vm394_vm6, %v2430_v54  ;;  %v2960_v49 = vpack.c.bf16 %v2948_v56, %v2947_v25 }
 0x8d2   :  { %2533 = vst.msk [vmem:[#allocation2 + $0xc1] sm:$0xff] %vm492_vm9, %v5870_v11 }
 0x8d3   :  { %2597 = vst.msk [vmem:[#allocation2 + $0xc0] sm:$0xff] %vm557_vm11, %v2558_v33  ;;  %3736 = vmatmul.msk.bf16.gmra.mxu3 %vm352_vm7, %v2960_v49  ;;  %v6807_v49 = vmax.f32 %v4779_v45, 0.0 }
 0x8d4   :  { %2534 = vst.msk [vmem:[#allocation2 + $0xd1] sm:$0xff] %vm492_vm9, %v2496_v43  ;;  %v6802_v43 = vmax.f32 %v4761_v35, 0.0  ;;  %v6803_v35 = vmax.f32 %v5466_v20, 0.0  ;;  %v6805_v20 = vmax.f32 %v4781_v47, 0.0 }
 0x8d5   :  { %2614 = vst.msk [vmem:[#allocation2 + $0xc2] sm:$0xff] %vm623_vm12, %v5745_v18  ;;  %2269 = vrot.lane.b32.xlu2 %v2237_v63, %s3803_s16  ;;  %1280 = vrot.lane.b32.xlu0 %v6799_v4, %s3802_s15  ;;  %v6800_v18 = vmax.f32 %v4738_v21, 0.0 }
 0x8d6   :  { %2678 = vst.msk [vmem:[#allocation2 + $0xc1] sm:$0xff] %vm688_vm13, %v5880_v61  ;;  %2905 = vrot.lane.b32.xlu1 %v5885_v52, %s3806_s19 }
 0x8d7   :  { %v5976_v11 = vpop.permute.xlu2 %2899  ;;  %v2498_v8 = vpop.permute.xlu0 %2497 }
 0x8d8   :  { %v2638_v33 = vpop.permute.xlu1 %2637 }
 0x8d9   :  { %2677 = vst.msk [vmem:[#allocation2 + $0xb1] sm:$0xff] %vm688_vm13, %v2638_v33 }
 0x8da   :  { %2741 = vst.msk [vmem:[#allocation2 + $0xb0] sm:$0xff] %vm753_vm14, %v2702_v12 }
 0x8db   :  { %2806 = vst.msk [vmem:[#allocation2 + $0xb2] sm:$0xff] %vm818_vm15, %v5893_v30  ;;  %v6801_v30 = vmax.f32 %v5470_v36, 0.0 }
 0x8dd   :  { %2271 = vrot.lane.b32.xlu0 %v2238_v41, %s3803_s16 }
 0x8de   :  { %2567 = vrot.lane.b32.xlu1 %v5861_v17, %s3801_s3 }
 0x8df   :  { %v2438_v27 = vpop.permute.xlu2 %2437  ;;  %v2642_v28 = vpop.permute.xlu0 %2641 }
 0x8e0   :  { %v2704_v63 = vpop.permute.xlu1 %2703  ;;  %2473 = vst.msk [vmem:[#allocation2 + $0x102] sm:$0xff] %vm394_vm6, %v2438_v27 }
 0x8e1   :  { %2742 = vst.msk [vmem:[#allocation2 + $0xc0] sm:$0xff] %vm753_vm14, %v2704_v63 }
 0x8e2   :  { %2807 = vst.msk [vmem:[#allocation2 + $0xc2] sm:$0xff] %vm818_vm15, %v2770_v15 }
 0x8e3   :  { %2871 = vst.msk [vmem:[#allocation2 + $0xc1] sm:$0xff] %vm883_vm2, %v5911_v62 }
 0x8e5   :  { %1284 = vrot.lane.b32.xlu0 %v6800_v18, %s3802_s15 }
 0x8e6   :  { %2649 = vrot.lane.b32.xlu1 %v5885_v52, %s3802_s15 }
 0x8e7   :  { %v2564_v31 = vpop.permute.xlu2 %2563  ;;  %v2708_v41 = vpop.permute.xlu0 %2707 }
 0x8e8   :  { %v2832_v61 = vpop.permute.xlu1 %2831 }
 0x8e9   :  { %2870 = vst.msk [vmem:[#allocation2 + $0xb1] sm:$0xff] %vm883_vm2, %v2832_v61 }
 0x8ea   :  { %2934 = vst.msk [vmem:[#allocation2 + $0xb0] sm:$0xff] %vm948_vm3, %v2896_v42 }
 0x8ed   :  { %2275 = vrot.lane.b32.xlu0 %v6801_v30, %s3803_s16  ;;  %v6812_v30 = vmax.f32 %v5528_v46, 0.0  ;;  %v6815_v46 = vmax.f32 %v5542_v37, 0.0 }
 0x8ee   :  { %2779 = vrot.lane.b32.xlu1 %v5938_v14, %s3800_s2 }
 0x8ef   :  { %v6004_v62 = vpop.permute.xlu2 %2647  ;;  %v2836_v21 = vpop.permute.xlu0 %2835 }
 0x8f0   :  { %v2898_v2 = vpop.permute.xlu1 %2897 }
 0x8f1   :  { %2935 = vst.msk [vmem:[#allocation2 + $0xc0] sm:$0xff] %vm948_vm3, %v2898_v2  ;;  %v2949_v15 = vld [vmem:[#allocation2 + $0xb1] sm:$0xff]  ;;  %v6813_v2 = vld [vmem:[#allocation8_spill] sm:$0xff] }
 0x8f5   :  { %1288 = vrot.lane.b32.xlu0 %v6802_v43, %s3802_s15  ;;  %v6814_v43 = vmax.f32 %v6813_v2, 0.0 }
 0x8f6   :  { %2715 = vrot.lane.b32.xlu1 %v5938_v14, %s3803_s16 }
 0x8f7   :  { %v6012_v12 = vpop.permute.xlu2 %2775  ;;  %v2902_v36 = vpop.permute.xlu0 %2901 }
 0x8f8   :  { %v2434_v5 = vpop.permute.xlu1 %2433  ;;  %v2950_v16 = vld [vmem:[#allocation2 + $0xc1] sm:$0xff] }
 0x8f9   :  { %2471 = vst.msk [vmem:[#allocation2 + $0xe2] sm:$0xff] %vm394_vm6, %v2434_v5  ;;  %v2961_v42 = vpack.c.bf16 %v2950_v16, %v2949_v15 }
 0x8fa   :  { %2535 = vst.msk [vmem:[#allocation2 + $0xe1] sm:$0xff] %vm492_vm9, %v2498_v8 }
 0x8fb   :  { %2599 = vst.msk [vmem:[#allocation2 + $0xe0] sm:$0xff] %vm557_vm11, %v5932_v58  ;;  %3737 = vmatmul.msk.bf16.gmra.mxu3 %vm352_vm7, %v2961_v42 }
 0x8fc   :  { %2616 = vst.msk [vmem:[#allocation2 + $0xe2] sm:$0xff] %vm623_vm12, %v5809_v0 }
 0x8fd   :  { %2279 = vrot.lane.b32.xlu0 %v6803_v35, %s3803_s16 }
 0x8fe   :  { %1282 = vrot.lane.b32.xlu1 %v6804_v40, %s3802_s15 }
 0x8ff   :  { %v6027_v1 = vpop.permute.xlu2 %2841  ;;  %v2500_v54 = vpop.permute.xlu0 %2499 }
 0x900   :  { %v2560_v25 = vpop.permute.xlu1 %2559 }
 0x901   :  { %2598 = vst.msk [vmem:[#allocation2 + $0xd0] sm:$0xff] %vm557_vm11, %v2560_v25 }
 0x902   :  { %2615 = vst.msk [vmem:[#allocation2 + $0xd2] sm:$0xff] %vm623_vm12, %v5757_v51  ;;  %v6806_v51 = vmax.f32 %v5486_v7, 0.0  ;;  %v6808_v7 = vmax.f32 %v5500_v3, 0.0  ;;  %v6809_v3 = vmax.f32 %v4793_v53, 0.0 }
 0x903   :  { %2679 = vst.msk [vmem:[#allocation2 + $0xd1] sm:$0xff] %vm688_vm13, %v2642_v28 }
 0x904   :  { %2743 = vst.msk [vmem:[#allocation2 + $0xd0] sm:$0xff] %vm753_vm14, %v5946_v13 }
 0x905   :  { %1292 = vrot.lane.b32.xlu0 %v6805_v20, %s3802_s15 }
 0x907   :  { %v2440_v23 = vpop.permute.xlu2 %2439  ;;  %v2566_v0 = vpop.permute.xlu0 %2565 }
 0x908   :  { %v2644_v58 = vpop.permute.xlu1 %2643  ;;  %2474 = vst.msk [vmem:[#allocation2 + $0x112] sm:$0xff] %vm394_vm6, %v2440_v23 }
 0x909   :  { %2680 = vst.msk [vmem:[#allocation2 + $0xe1] sm:$0xff] %vm688_vm13, %v2644_v58 }
 0x90a   :  { %2744 = vst.msk [vmem:[#allocation2 + $0xe0] sm:$0xff] %vm753_vm14, %v2708_v41  ;;  %v6811_v41 = vmax.f32 %v4807_v55, 0.0 }
 0x90b   :  { %2809 = vst.msk [vmem:[#allocation2 + $0xe2] sm:$0xff] %vm818_vm15, %v5955_v60 }
 0x90d   :  { %2283 = vrot.lane.b32.xlu0 %v6806_v51, %s3803_s16 }
 0x90f   :  { %v2442_v13 = vpop.permute.xlu2 %2441  ;;  %v2710_v56 = vpop.permute.xlu0 %2709 }
 0x910   :  { %v2772_v47 = vpop.permute.xlu1 %2771  ;;  %2475 = vst.msk [vmem:[#allocation2 + $0x122] sm:$0xff] %vm394_vm6, %v2442_v13 }
 0x911   :  { %2808 = vst.msk [vmem:[#allocation2 + $0xd2] sm:$0xff] %vm818_vm15, %v2772_v47 }
 0x912   :  { %2872 = vst.msk [vmem:[#allocation2 + $0xd1] sm:$0xff] %vm883_vm2, %v2836_v21 }
 0x913   :  { %2936 = vst.msk [vmem:[#allocation2 + $0xd0] sm:$0xff] %vm948_vm3, %v5976_v11 }
 0x915   :  { %1296 = vrot.lane.b32.xlu0 %v6807_v49, %s3802_s15  ;;  %v6137_v49 = vpop.f32.mrf.mxu3 }
 0x917   :  { %v2778_v60 = vpop.permute.xlu0 %2777  ;;  %v2570_v18 = vpop.permute.xlu2 %2569 }
 0x918   :  { %v2838_v4 = vpop.permute.xlu1 %2837 }
 0x919   :  { %2873 = vst.msk [vmem:[#allocation2 + $0xe1] sm:$0xff] %vm883_vm2, %v2838_v4 }
 0x91a   :  { %2937 = vst.msk [vmem:[#allocation2 + $0xe0] sm:$0xff] %vm948_vm3, %v2902_v36  ;;  %v2951_v27 = vld [vmem:[#allocation2 + $0xd1] sm:$0xff] }
 0x91d   :  { %2287 = vrot.lane.b32.xlu0 %v6808_v7, %s3803_s16  ;;  %v6144_v7 = vpop.f32.mrf.mxu3 }
 0x91e   :  { %v3067_v2 = vsel %vm394_vm6, %v6144_v7, 0.0 }
 0x91f   :  { %v2904_v8 = vpop.permute.xlu0 %2903 }
 0x920   :  { %v2436_v33 = vpop.permute.xlu1 %2435 }
 0x921   :  { %2472 = vst.msk [vmem:[#allocation2 + $0xf2] sm:$0xff] %vm394_vm6, %v2436_v33  ;;  %v2952_v11 = vld [vmem:[#allocation2 + $0xe1] sm:$0xff] }
 0x922   :  { %2536 = vst.msk [vmem:[#allocation2 + $0xf1] sm:$0xff] %vm492_vm9, %v2500_v54  ;;  %v2962_v45 = vpack.c.bf16 %v2952_v11, %v2951_v27 }
 0x923   :  { %2600 = vst.msk [vmem:[#allocation2 + $0xf0] sm:$0xff] %vm557_vm11, %v2564_v31 }
 0x924   :  { %2617 = vst.msk [vmem:[#allocation2 + $0xf2] sm:$0xff] %vm623_vm12, %v5813_v9  ;;  %3738 = vmatmul.msk.bf16.gmra.mxu3 %vm352_vm7, %v2962_v45  ;;  %v6810_v9 = vmax.f32 %v5514_v57, 0.0 }
 0x925   :  { %1300 = vrot.lane.b32.xlu0 %v6809_v3, %s3802_s15  ;;  %v6149_v27 = vpop.f32.mrf.mxu3 }
 0x927   :  { %v2504_v28 = vpop.permute.xlu0 %2503 }
 0x928   :  { %v2502_v63 = vpop.permute.xlu1 %2501  ;;  %2538 = vst.msk [vmem:[#allocation2 + $0x111] sm:$0xff] %vm492_vm9, %v2504_v28 }
 0x929   :  { %2537 = vst.msk [vmem:[#allocation2 + $0x101] sm:$0xff] %vm492_vm9, %v2502_v63 }
 0x92a   :  { %2601 = vst.msk [vmem:[#allocation2 + $0x100] sm:$0xff] %vm557_vm11, %v2566_v0 }
 0x92b   :  { %2618 = vst.msk [vmem:[#allocation2 + $0x102] sm:$0xff] %vm623_vm12, %v5861_v17  ;;  %v2652_v17 = vpop.permute.xlu2 %2651 }
 0x92c   :  { %2682 = vst.msk [vmem:[#allocation2 + $0x101] sm:$0xff] %vm688_vm13, %v6004_v62 }
 0x92d   :  { %2291 = vrot.lane.b32.xlu0 %v6810_v9, %s3803_s16  ;;  %v6155_v45 = vpop.f32.mrf.mxu3 }
 0x92f   :  { %v2506_v53 = vpop.permute.xlu0 %2505 }
 0x930   :  { %v2646_v31 = vpop.permute.xlu1 %2645  ;;  %2539 = vst.msk [vmem:[#allocation2 + $0x121] sm:$0xff] %vm492_vm9, %v2506_v53 }
 0x931   :  { %2681 = vst.msk [vmem:[#allocation2 + $0xf1] sm:$0xff] %vm688_vm13, %v2646_v31 }
 0x932   :  { %2745 = vst.msk [vmem:[#allocation2 + $0xf0] sm:$0xff] %vm753_vm14, %v2710_v56  ;;  %v6816_v56 = vld [vmem:[#allocation13_spill] sm:$0xff] }
 0x933   :  { %2810 = vst.msk [vmem:[#allocation2 + $0xf2] sm:$0xff] %vm818_vm15, %v6012_v12  ;;  %v2908_v55 = vpop.permute.xlu2 %2907 }
 0x934   :  { %2603 = vst.msk [vmem:[#allocation2 + $0x120] sm:$0xff] %vm557_vm11, %v2570_v18 }
 0x935   :  { %1304 = vrot.lane.b32.xlu0 %v6811_v41, %s3802_s15  ;;  %2620 = vst.msk [vmem:[#allocation2 + $0x122] sm:$0xff] %vm623_vm12, %v5938_v14  ;;  %v6160_v28 = vpop.f32.mrf.mxu3 }
 0x936   :  { %2684 = vst.msk [vmem:[#allocation2 + $0x121] sm:$0xff] %vm688_vm13, %v2652_v17 }
 0x937   :  { %v2714_v57 = vpop.permute.xlu0 %2713 }
 0x938   :  { %v2712_v61 = vpop.permute.xlu1 %2711 }
 0x939   :  { %2746 = vst.msk [vmem:[#allocation2 + $0x100] sm:$0xff] %vm753_vm14, %v2712_v61 }
 0x93a   :  { %2811 = vst.msk [vmem:[#allocation2 + $0x102] sm:$0xff] %vm818_vm15, %v2778_v60  ;;  %v6817_v60 = vld [vmem:[#allocation14_spill] sm:$0xff] }
 0x93b   :  { %2875 = vst.msk [vmem:[#allocation2 + $0x101] sm:$0xff] %vm883_vm2, %v6027_v1  ;;  %v2270_v5 = vpop.permute.xlu2 %2269 }
 0x93d   :  { %2295 = vrot.lane.b32.xlu0 %v6812_v30, %s3803_s16  ;;  %v6168_v18 = vpop.f32.mrf.mxu3 }
 0x93f   :  { %v2844_v62 = vpop.permute.xlu0 %2843 }
 0x940   :  { %v2840_v21 = vpop.permute.xlu1 %2839 }
 0x941   :  { %2874 = vst.msk [vmem:[#allocation2 + $0xf1] sm:$0xff] %vm883_vm2, %v2840_v21 }
 0x942   :  { %2938 = vst.msk [vmem:[#allocation2 + $0xf0] sm:$0xff] %vm948_vm3, %v2904_v8  ;;  %v6818_v8 = vld [vmem:[#allocation12_spill] sm:$0xff] }
 0x945   :  { %1308 = vrot.lane.b32.xlu0 %v6814_v43, %s3802_s15  ;;  %v3066_v43 = vsel %vm394_vm6, %v6137_v49, 0.0 }
 0x947   :  { %v1281_v12 = vpop.permute.xlu0 %1280 }
 0x948   :  { %v2906_v36 = vpop.permute.xlu1 %2905  ;;  %1328 = vst.msk [vmem:[#allocation3] sm:$0xff] %vm492_vm9, %v1281_v12  ;;  %v3069_v12 = vsel %vm394_vm6, %v6149_v27, 0.0 }
 0x949   :  { %2939 = vst.msk [vmem:[#allocation2 + $0x100] sm:$0xff] %vm948_vm3, %v2906_v36  ;;  %v2953_v42 = vld [vmem:[#allocation2 + $0xf1] sm:$0xff]  ;;  %v3068_v36 = vadd.f32 %v3067_v2, %v3066_v43 }
 0x94a   :  { %2317 = vst.msk [vmem:[#allocation3] sm:$0xff] %vm557_vm11, %v2270_v5 }
 0x94d   :  { %2299 = vrot.lane.b32.xlu0 %v6815_v46, %s3803_s16  ;;  %v3071_v46 = vsel %vm394_vm6, %v6155_v45, 0.0 }
 0x94f   :  { %v2272_v15 = vpop.permute.xlu0 %2271 }
 0x950   :  { %v2568_v16 = vpop.permute.xlu1 %2567  ;;  %v2954_v35 = vld [vmem:[#allocation2 + $0x101] sm:$0xff] }
 0x951   :  { %2602 = vst.msk [vmem:[#allocation2 + $0x110] sm:$0xff] %vm557_vm11, %v2568_v16  ;;  %v2963_v40 = vpack.c.bf16 %v2954_v35, %v2953_v42  ;;  %v3073_v16 = vsel %vm394_vm6, %v6160_v28, 0.0  ;;  %v3075_v35 = vsel %vm394_vm6, %v6168_v18, 0.0 }
 0x952   :  { %2619 = vst.msk [vmem:[#allocation2 + $0x112] sm:$0xff] %vm623_vm12, %v5885_v52 }
 0x953   :  { %3739 = vmatmul.msk.bf16.gmra.mxu3 %vm352_vm7, %v2963_v40 }
 0x955   :  { %441 = vrot.lane.b32.xlu0 %v4089_v39, %s3801_s3 }
 0x956   :  { %v6171_v53 = vpop.f32.mrf.mxu3 }
 0x957   :  { %v1285_v1 = vpop.permute.xlu0 %1284 }
 0x958   :  { %v2650_v54 = vpop.permute.xlu1 %2649  ;;  %1330 = vst.msk [vmem:[#allocation3 + $0x10] sm:$0xff] %vm492_vm9, %v1285_v1  ;;  %v3077_v1 = vsel %vm394_vm6, %v6171_v53, 0.0 }
 0x959   :  { %2683 = vst.msk [vmem:[#allocation2 + $0x111] sm:$0xff] %vm688_vm13, %v2650_v54 }
 0x95a   :  { %2747 = vst.msk [vmem:[#allocation2 + $0x110] sm:$0xff] %vm753_vm14, %v2714_v57 }
 0x95d   :  { %539 = vrot.lane.b32.xlu0 %v4117_v59, %s3802_s15 }
 0x95e   :  { %v6175_v41 = vpop.f32.mrf.mxu3 }
 0x95f   :  { %v6119_v37 = vpop.permute.xlu0 %2275 }
 0x960   :  { %v2780_v25 = vpop.permute.xlu1 %2779 }
 0x961   :  { %2812 = vst.msk [vmem:[#allocation2 + $0x112] sm:$0xff] %vm818_vm15, %v2780_v25  ;;  %v3079_v25 = vsel %vm394_vm6, %v6175_v41, 0.0 }
 0x962   :  { %2876 = vst.msk [vmem:[#allocation2 + $0x111] sm:$0xff] %vm883_vm2, %v2844_v62 }
 0x963   :  { %2940 = vst.msk [vmem:[#allocation2 + $0x110] sm:$0xff] %vm948_vm3, %v2908_v55 }
 0x965   :  { %835 = vrot.lane.b32.xlu0 %v4072_v29, %s3805_s18 }
 0x967   :  { %v1289_v52 = vpop.permute.xlu0 %1288 }
 0x968   :  { %v2716_v20 = vpop.permute.xlu1 %2715  ;;  %1332 = vst.msk [vmem:[#allocation3 + $0x20] sm:$0xff] %vm492_vm9, %v1289_v52 }
 0x969   :  { %2748 = vst.msk [vmem:[#allocation2 + $0x120] sm:$0xff] %vm753_vm14, %v2716_v20 }
 0x96a   :  { %v2955_v58 = vld [vmem:[#allocation2 + $0x111] sm:$0xff] }
 0x96d   :  { %916 = vrot.lane.b32.xlu0 %v4093_v48, %s3807_s20 }
 0x96f   :  { %v6130_v23 = vpop.permute.xlu0 %2279 }
 0x970   :  { %v1283_v0 = vpop.permute.xlu1 %1282  ;;  %v2956_v51 = vld [vmem:[#allocation2 + $0x121] sm:$0xff] }
 0x971   :  { %1329 = vst.msk [vmem:[#allocation3 + $0x8] sm:$0xff] %vm492_vm9, %v1283_v0  ;;  %v2964_v13 = vpack.c.bf16 %v2956_v51, %v2955_v58 }
 0x972   :  { %2318 = vst.msk [vmem:[#allocation3 + $0x8] sm:$0xff] %vm557_vm11, %v2272_v15  ;;  %v3070_v15 = vadd.f32 %v3069_v12, %v3068_v36 }
 0x973   :  { %3740 = vmatmul.msk.bf16.gmra.mxu3 %vm352_vm7, %v2964_v13 }
 0x974   :  { %v3072_v42 = vadd.f32 %v3071_v46, %v3070_v15 }
 0x975   :  { %1502 = vrot.lane.b32.xlu0 %v6816_v56, %s3801_s3 }
 0x976   :  { %v3074_v40 = vadd.f32 %v3073_v16, %v3072_v42 }
 0x977   :  { %v1293_v47 = vpop.permute.xlu0 %1292 }
 0x978   :  { %1334 = vst.msk [vmem:[#allocation3 + $0x30] sm:$0xff] %vm492_vm9, %v1293_v47  ;;  %v3076_v54 = vadd.f32 %v3075_v35, %v3074_v40 }
 0x97a   :  { %v3078_v52 = vadd.f32 %v3077_v1, %v3076_v54 }
 0x97c   :  { %v3080_v58 = vadd.f32 %v3079_v25, %v3078_v52 }
 0x97d   :  { %1776 = vrot.lane.b32.xlu0 %v6817_v60, %s3804_s17 }
 0x97e   :  { %v6180_v61 = vpop.f32.mrf.mxu3 }
 0x97f   :  { %v6142_v4 = vpop.permute.xlu0 %2283  ;;  %v3081_v0 = vsel %vm394_vm6, %v6180_v61, 0.0 }
 0x980   :  { %v3082_v13 = vadd.f32 %v3081_v0, %v3080_v58 }
 0x985   :  { %1888 = vrot.lane.b32.xlu0 %v6818_v8, %s3805_s18 }
 0x986   :  { %v6182_v55 = vpop.f32.mrf.mxu3 }
 0x987   :  { %v1297_v33 = vpop.permute.xlu0 %1296  ;;  %v3083_v51 = vsel %vm394_vm6, %v6182_v55, 0.0 }
 0x988   :  { %1336 = vst.msk [vmem:[#allocation3 + $0x40] sm:$0xff] %vm492_vm9, %v1297_v33  ;;  %v3084_v33 = vadd.f32 %v3083_v51, %v3082_v13 }
 0x98d   :  { %2443 = vrot.lane.b32.xlu0 %v5938_v14, %s3810_s27 }
 0x98f   :  { %v6153_v11 = vpop.permute.xlu0 %2287 }
 0x995   :  { %2491 = vrot.lane.b32.xlu0 %v5714_v19, %s3809_s30 }
 0x997   :  { %v1301_v3 = vpop.permute.xlu0 %1300 }
 0x998   :  { %1338 = vst.msk [vmem:[#allocation3 + $0x50] sm:$0xff] %vm492_vm9, %v1301_v3 }
 0x99d   :  { %2829 = vrot.lane.b32.xlu0 %v5584_v24, %s3804_s17 }
 0x99f   :  { %v6164_v63 = vpop.permute.xlu0 %2291 }
 0x9a5   :  { %2877 = vrot.lane.b32.xlu0 %v5555_v44, %s3806_s19 }
 0x9a7   :  { %v1305_v9 = vpop.permute.xlu0 %1304  ;;  %v6184_v62 = vpop.f32.mrf.mxu3 }
 0x9a8   :  { %1340 = vst.msk [vmem:[#allocation3 + $0x60] sm:$0xff] %vm492_vm9, %v1305_v9  ;;  %v3085_v47 = vsel %vm394_vm6, %v6184_v62, 0.0 }
 0x9a9   :  { %v3086_v9 = vadd.f32 %v3085_v47, %v3084_v33 }
 0x9af   :  { %v6173_v31 = vpop.permute.xlu0 %2295  ;;  %v6186_v21 = vpop.f32.mrf.mxu3 }
 0x9b0   :  { %v3087_v3 = vsel %vm394_vm6, %v6186_v21, 0.0 }
 0x9b1   :  { %v3088_v2 = vadd.f32 %v3087_v3, %v3086_v9 }
 0x9b7   :  { %v1309_v17 = vpop.permute.xlu0 %1308 }
 0x9b8   :  { %1342 = vst.msk [vmem:[#allocation3 + $0x70] sm:$0xff] %vm492_vm9, %v1309_v17 }
 0x9bf   :  { %v6178_v57 = vpop.permute.xlu0 %2299 }
 0x9c0   :  { %6819 = vst [vmem:[#allocation8_spill] sm:$0xff] %v6178_v57 }
 0x9c7   :  { %v442_v30 = vpop.permute.xlu0 %441 }
 0x9d6   :  { %v6194_v5 = vpop.f32.mrf.mxu3 }
 0x9d7   :  { %v3089_v30 = vsel %vm394_vm6, %v6194_v5, 0.0 }
 0x9d8   :  { %v3090_v12 = vadd.f32 %v3089_v30, %v3088_v2 }
 0x9de   :  { %v6206_v20 = vpop.f32.mrf.mxu3 }
 0x9df   :  { %v3091_v43 = vsel %vm394_vm6, %v6206_v20, 0.0 }
 0x9e0   :  { %v3092_v46 = vadd.f32 %v3091_v43, %v3090_v12 }
 0x9f6   :  { %v6216_v17 = vpop.f32.mrf.mxu3 }
 0x9f7   :  { %v3093_v36 = vsel %vm394_vm6, %v6216_v17, 0.0 }
 0x9f8   :  { %v3094_v15 = vadd.f32 %v3093_v36, %v3092_v46 }
 0x9fe   :  { %v6224_v16 = vpop.f32.mrf.mxu3 }
 0x9ff   :  { %v3095_v42 = vsel %vm394_vm6, %v6224_v16, 0.0 }
 0xa00   :  { %v3096_v35 = vadd.f32 %v3095_v42, %v3094_v15 }
 0xa02   :  { %v3097_v40 = vrot.slane %v3096_v35, 4 }
 0xa04   :  { %v3098_v1 = vadd.f32 %v3097_v40, %v3096_v35 }
 0xa06   :  { %v3099_v54 = vrot.slane %v3098_v1, 2 }
 0xa08   :  { %v3100_v25 = vadd.f32 %v3099_v54, %v3098_v1 }
 0xa0a   :  { %v3101_v52 = vrot.slane %v3100_v25, 1 }
 0xa0c   :  { %v3102_v0 = vadd.f32 %v3101_v52, %v3100_v25 }
 0xa0e   :  { %v6229_v58 = vmul.f32 %v3102_v0, %v3998_v22 }
 0xa10   :  { %v3104_v51 = vsub.f32 %v6137_v49, %v6229_v58  ;;  %v3105_v13 = vsub.f32 %v6144_v7, %v6229_v58  ;;  %v3106_v47 = vsub.f32 %v6149_v27, %v6229_v58  ;;  %v3107_v33 = vsub.f32 %v6155_v45, %v6229_v58 }
 0xa11   :  { %v3108_v30 = vsub.f32 %v6160_v28, %v6229_v58  ;;  %v3109_v43 = vsub.f32 %v6168_v18, %v6229_v58  ;;  %v3110_v42 = vsub.f32 %v6171_v53, %v6229_v58  ;;  %v3111_v54 = vsub.f32 %v6175_v41, %v6229_v58 }
 0xa12   :  { %v3120_v3 = vmul.f32 %v3104_v51, %v3104_v51  ;;  %v3121_v9 = vmul.f32 %v3105_v13, %v3105_v13  ;;  %v3122_v2 = vmul.f32 %v3106_v47, %v3106_v47  ;;  %v3123_v12 = vmul.f32 %v3107_v33, %v3107_v33 }
 0xa13   :  { %v3124_v35 = vmul.f32 %v3108_v30, %v3108_v30  ;;  %v3125_v25 = vmul.f32 %v3109_v43, %v3109_v43  ;;  %v3112_v51 = vsub.f32 %v6180_v61, %v6229_v58  ;;  %v3126_v13 = vmul.f32 %v3110_v42, %v3110_v42 }
 0xa14   :  { %v3136_v36 = vsel %vm394_vm6, %v3120_v3, 0.0  ;;  %v3137_v46 = vsel %vm394_vm6, %v3121_v9, 0.0  ;;  %v3139_v40 = vsel %vm394_vm6, %v3122_v2, 0.0  ;;  %v3141_v52 = vsel %vm394_vm6, %v3123_v12, 0.0 }
 0xa15   :  { %v3138_v15 = vadd.f32 %v3137_v46, %v3136_v36  ;;  %v3143_v47 = vsel %vm394_vm6, %v3124_v35, 0.0  ;;  %v3113_v3 = vsub.f32 %v6182_v55, %v6229_v58  ;;  %v3127_v9 = vmul.f32 %v3111_v54, %v3111_v54 }
 0xa16   :  { %v3145_v30 = vsel %vm394_vm6, %v3125_v25, 0.0  ;;  %v3114_v43 = vsub.f32 %v6184_v62, %v6229_v58  ;;  %v3128_v36 = vmul.f32 %v3112_v51, %v3112_v51  ;;  %v3147_v12 = vsel %vm394_vm6, %v3126_v13, 0.0 }
 0xa17   :  { %v3140_v1 = vadd.f32 %v3139_v40, %v3138_v15  ;;  %v3115_v15 = vsub.f32 %v6186_v21, %v6229_v58  ;;  %v3129_v42 = vmul.f32 %v3113_v3, %v3113_v3  ;;  %v3149_v35 = vsel %vm394_vm6, %v3127_v9, 0.0 }
 0xa18   :  { %v3130_v54 = vmul.f32 %v3114_v43, %v3114_v43  ;;  %v3151_v25 = vsel %vm394_vm6, %v3128_v36, 0.0 }
 0xa19   :  { %v3142_v0 = vadd.f32 %v3141_v52, %v3140_v1  ;;  %v3116_v1 = vsub.f32 %v6194_v5, %v6229_v58  ;;  %v3131_v51 = vmul.f32 %v3115_v15, %v3115_v15  ;;  %v3153_v13 = vsel %vm394_vm6, %v3129_v42, 0.0 }
 0xa1a   :  { %v3155_v9 = vsel %vm394_vm6, %v3130_v54, 0.0 }
 0xa1b   :  { %v3144_v33 = vadd.f32 %v3143_v47, %v3142_v0  ;;  %v3117_v0 = vsub.f32 %v6206_v20, %v6229_v58  ;;  %v3132_v3 = vmul.f32 %v3116_v1, %v3116_v1  ;;  %v3157_v36 = vsel %vm394_vm6, %v3131_v51, 0.0 }
 0xa1d   :  { %v3146_v2 = vadd.f32 %v3145_v30, %v3144_v33  ;;  %v3118_v33 = vsub.f32 %v6216_v17, %v6229_v58  ;;  %v3133_v43 = vmul.f32 %v3117_v0, %v3117_v0  ;;  %v3159_v15 = vsel %vm394_vm6, %v3132_v3, 0.0 }
 0xa1f   :  { %v3148_v46 = vadd.f32 %v3147_v12, %v3146_v2  ;;  %v3119_v2 = vsub.f32 %v6224_v16, %v6229_v58 }
 0xa21   :  { %v3150_v40 = vadd.f32 %v3149_v35, %v3148_v46  ;;  %v3134_v46 = vmul.f32 %v3118_v33, %v3118_v33  ;;  %v3135_v42 = vmul.f32 %v3119_v2, %v3119_v2 }
 0xa23   :  { %v3152_v52 = vadd.f32 %v3151_v25, %v3150_v40  ;;  %v3161_v40 = vsel %vm394_vm6, %v3133_v43, 0.0  ;;  %v3163_v1 = vsel %vm394_vm6, %v3134_v46, 0.0  ;;  %v3165_v54 = vsel %vm394_vm6, %v3135_v42, 0.0  ;;  %v3741_v46 = vld [vmem:[%s6735_s5 + $0x2] sm:$0x1] }
 0xa25   :  { %v3154_v47 = vadd.f32 %v3153_v13, %v3152_v52 }
 0xa27   :  { %v3156_v30 = vadd.f32 %v3155_v9, %v3154_v47 }
 0xa29   :  { %v3158_v12 = vadd.f32 %v3157_v36, %v3156_v30 }
 0xa2b   :  { %v3160_v35 = vadd.f32 %v3159_v15, %v3158_v12 }
 0xa2d   :  { %v3162_v25 = vadd.f32 %v3161_v40, %v3160_v35 }
 0xa2f   :  { %v3164_v52 = vadd.f32 %v3163_v1, %v3162_v25 }
 0xa31   :  { %v3166_v13 = vadd.f32 %v3165_v54, %v3164_v52 }
 0xa33   :  { %v3167_v47 = vrot.slane %v3166_v13, 4 }
 0xa35   :  { %v3168_v9 = vadd.f32 %v3167_v47, %v3166_v13 }
 0xa37   :  { %v3169_v0 = vrot.slane %v3168_v9, 2 }
 0xa39   :  { %v3170_v57 = vadd.f32 %v3169_v0, %v3168_v9 }
 0xa3b   :  { %v3171_v51 = vrot.slane %v3170_v57, 1 }
 0xa3d   :  { %v3172_v30 = vadd.f32 %v3171_v51, %v3170_v57  ;;  %v3742_v57 = vld [vmem:[%s6736_s6 + $0x2] sm:$0x1] }
 0xa3f   :  { %v3173_v33 = vmul.f32 %v3172_v30, %v3998_v22 }
 0xa41   :  { %v3174_v3 = vadd.f32 1e-05, %v3173_v33 }
 0xa43   :  { %3795 = vrsqrt.f32 %v3174_v3  ;;  %vm3181_vm6 = vweird.f32 %v3174_v3 }
 0xa49   :  { %v3796_v2 = vpop.eup %3795 }
 0xa4a   :  { %v3176_v36 = vmul.f32 %v3796_v2, %v3174_v3  ;;  %vm3182_vm7 = vweird.f32 %v3796_v2 }
 0xa4b   :  { %vm3183_vm10 = vmor %vm3181_vm6, %vm3182_vm7 }
 0xa4c   :  { %v3177_v43 = vmul.f32 %v3796_v2, %v3176_v36 }
 0xa4e   :  { %v3178_v12 = vmul.f32 0.5, %v3177_v43 }
 0xa50   :  { %v3179_v15 = vsub.f32 1.5, %v3178_v12 }
 0xa52   :  { %v3180_v35 = vmul.f32 %v3796_v2, %v3179_v15 }
 0xa54   :  { %v3184_v42 = vsel %vm3183_vm10, %v3796_v2, %v3180_v35 }
 0xa55   :  { %v3185_v40 = vmul.f32 %v3741_v46, %v3184_v42 }
 0xa57   :  { %v3186_v25 = vmul.f32 %v3185_v40, %v6229_v58  ;;  %v3189_v1 = vperm.slane %v3185_v40, 0 }
 0xa59   :  { %v3187_v52 = vsub.f32 %v3742_v57, %v3186_v25  ;;  %v3206_v54 = vmul.f32 %v3189_v1, %v6224_v16  ;;  %v3192_v47 = vmul.f32 %v3189_v1, %v6144_v7  ;;  %v3191_v9 = vmul.f32 %v3189_v1, %v6137_v49 }
 0xa5a   :  { %v3200_v2 = vmul.f32 %v3189_v1, %v6182_v55  ;;  %v3199_v36 = vmul.f32 %v3189_v1, %v6180_v61  ;;  %v3202_v58 = vmul.f32 %v3189_v1, %v6186_v21  ;;  %v3201_v43 = vmul.f32 %v3189_v1, %v6184_v62  ;;  %v6821_v21 = vld [vmem:[#allocation5_spill] sm:$0xff] }
 0xa5b   :  { %v3208_v13 = vperm.slane %v3187_v52, 0  ;;  %v3204_v16 = vmul.f32 %v3189_v1, %v6206_v20  ;;  %v3203_v35 = vmul.f32 %v3189_v1, %v6194_v5  ;;  %v3205_v55 = vmul.f32 %v3189_v1, %v6216_v17  ;;  %v6824_v17 = vld [vmem:[#allocation4_spill] sm:$0xff] }
 0xa5c   :  { %v6820_v62 = vmax.f32 %v5445_v26, 0.0  ;;  %v6822_v20 = vmax.f32 %v6821_v21, 0.0  ;;  %v3194_v40 = vmul.f32 %v3189_v1, %v6155_v45  ;;  %v3193_v57 = vmul.f32 %v3189_v1, %v6149_v27 }
 0xa5d   :  { %v6290_v0 = vadd.f32 %v3208_v13, %v3206_v54  ;;  %v3211_v51 = vadd.f32 %v3208_v13, %v3192_v47  ;;  %v3210_v30 = vadd.f32 %v3208_v13, %v3191_v9  ;;  %v3219_v49 = vadd.f32 %v3208_v13, %v3200_v2 }
 0xa5e   :  { %v3218_v7 = vadd.f32 %v3208_v13, %v3199_v36  ;;  %v3221_v12 = vadd.f32 %v3208_v13, %v3202_v58  ;;  %v3220_v15 = vadd.f32 %v3208_v13, %v3201_v43  ;;  %v3223_v46 = vadd.f32 %v3208_v13, %v3204_v16 }
 0xa5f   :  { %v3227_v33 = vmax.f32 %v3211_v51, 0.0  ;;  %v3226_v3 = vmax.f32 %v3210_v30, 0.0  ;;  %v3222_v61 = vadd.f32 %v3208_v13, %v3203_v35  ;;  %v3224_v42 = vadd.f32 %v3208_v13, %v3205_v55  ;;  %v6830_v35 = vld [vmem:[#allocation7_spill] sm:$0xff] }
 0xa60   :  { %v3213_v25 = vadd.f32 %v3208_v13, %v3194_v40  ;;  %v3212_v52 = vadd.f32 %v3208_v13, %v3193_v57  ;;  %v6823_v26 = vmax.f32 %v5468_v38, 0.0  ;;  %v6825_v47 = vmax.f32 %v6824_v17, 0.0 }
 0xa61   :  { %3260 = vrot.lane.b32.xlu2 %v3227_v33, %s3800_s2  ;;  %3258 = vrot.lane.b32.xlu1 %v3226_v3, %s3800_s2  ;;  %v3196_v45 = vmul.f32 %v3189_v1, %v6168_v18  ;;  %v3195_v27 = vmul.f32 %v3189_v1, %v6160_v28  ;;  %v6826_v38 = vmax.f32 %v5488_v34, 0.0  ;;  %v6827_v3 = vld [vmem:[#allocation6_spill] sm:$0xff]  ;;  %v3198_v18 = vmul.f32 %v3189_v1, %v6175_v41 }
 0xa62   :  { %v3229_v54 = vmax.f32 %v3213_v25, 0.0  ;;  %v3228_v5 = vmax.f32 %v3212_v52, 0.0  ;;  %v6828_v2 = vmax.f32 %v6827_v3, 0.0  ;;  %v3197_v28 = vmul.f32 %v3189_v1, %v6171_v53  ;;  %v6833_v1 = vld [vmem:[#allocation9_spill] sm:$0xff] }
 0xa63   :  { %v3215_v9 = vadd.f32 %v3208_v13, %v3196_v45  ;;  %v3214_v51 = vadd.f32 %v3208_v13, %v3195_v27  ;;  %v3217_v36 = vadd.f32 %v3208_v13, %v3198_v18  ;;  %v6829_v34 = vmax.f32 %v5502_v10, 0.0  ;;  %v3765_v10 = vld [vmem:[%s6737_s7] sm:$0xff] }
 0xa64   :  { %v3216_v58 = vadd.f32 %v3208_v13, %v3197_v28  ;;  %v6831_v55 = vmax.f32 %v6830_v35, 0.0  ;;  %v3234_v41 = vmax.f32 %v3218_v7, 0.0  ;;  %v6832_v53 = vmax.f32 %v5516_v50, 0.0  ;;  %3385 = vmatpush.bf16.msrb.mxu1 %v3765_v10  ;;  %v6836_v50 = vld [vmem:[#allocation11_spill] sm:$0xff] }
 0xa65   :  { %v3231_v30 = vmax.f32 %v3215_v9, 0.0  ;;  %v3230_v33 = vmax.f32 %v3214_v51, 0.0  ;;  %v3233_v43 = vmax.f32 %v3217_v36, 0.0  ;;  %v6834_v13 = vmax.f32 %v6833_v1, 0.0 }
 0xa66   :  { %v3232_v16 = vmax.f32 %v3216_v58, 0.0  ;;  %v3237_v21 = vmax.f32 %v3221_v12, 0.0  ;;  %v6835_v7 = vmax.f32 %v5530_v32, 0.0  ;;  %v3239_v57 = vmax.f32 %v3223_v46, 0.0 }
 0xa67   :  { %v3238_v25 = vmax.f32 %v3222_v61, 0.0  ;;  %v6838_v32 = vmax.f32 %v5544_v6, 0.0  ;;  %v3240_v46 = vmax.f32 %v3224_v42, 0.0 }
 0xa69   :  { %2273 = vrot.lane.b32.xlu2 %v6820_v62, %s3803_s16  ;;  %1286 = vrot.lane.b32.xlu1 %v6822_v20, %s3802_s15  ;;  %v3235_v62 = vmax.f32 %v3219_v49, 0.0  ;;  %v3236_v49 = vmax.f32 %v3220_v15, 0.0  ;;  %v6837_v20 = vmax.f32 %v6836_v50, 0.0  ;;  %v6839_v15 = vld [vmem:[#allocation10_spill] sm:$0xff] }
 0xa6a   :  { %v6840_v52 = vmax.f32 %v6839_v15, 0.0 }
 0xa71   :  { %3264 = vrot.lane.b32.xlu2 %v3229_v54, %s3800_s2  ;;  %3262 = vrot.lane.b32.xlu1 %v3228_v5, %s3800_s2  ;;  %v3241_v5 = vmax.f32 %v6290_v0, 0.0 }
 0xa79   :  { %2277 = vrot.lane.b32.xlu2 %v6823_v26, %s3803_s16  ;;  %1290 = vrot.lane.b32.xlu1 %v6825_v47, %s3802_s15 }
 0xa81   :  { %3268 = vrot.lane.b32.xlu2 %v3231_v30, %s3800_s2  ;;  %3266 = vrot.lane.b32.xlu1 %v3230_v33, %s3800_s2  ;;  %v6841_v30 = vld [vmem:[#allocation15_spill] sm:$0xff] }
 0xa89   :  { %2281 = vrot.lane.b32.xlu2 %v6826_v38, %s3803_s16  ;;  %1294 = vrot.lane.b32.xlu1 %v6828_v2, %s3802_s15 }
 0xa91   :  { %3272 = vrot.lane.b32.xlu2 %v3233_v43, %s3800_s2  ;;  %3270 = vrot.lane.b32.xlu1 %v3232_v16, %s3800_s2 }
 0xa99   :  { %2285 = vrot.lane.b32.xlu2 %v6829_v34, %s3803_s16  ;;  %1298 = vrot.lane.b32.xlu1 %v6831_v55, %s3802_s15 }
 0xaa1   :  { %3276 = vrot.lane.b32.xlu2 %v3235_v62, %s3800_s2  ;;  %3274 = vrot.lane.b32.xlu1 %v3234_v41, %s3800_s2  ;;  %v540_v62 = vpop.permute.xlu0 %539 }
 0xaa9   :  { %2289 = vrot.lane.b32.xlu2 %v6832_v53, %s3803_s16  ;;  %1302 = vrot.lane.b32.xlu1 %v6834_v13, %s3802_s15 }
 0xab1   :  { %3280 = vrot.lane.b32.xlu2 %v3237_v21, %s3800_s2  ;;  %3278 = vrot.lane.b32.xlu1 %v3236_v49, %s3800_s2 }
 0xab9   :  { %2293 = vrot.lane.b32.xlu2 %v6835_v7, %s3803_s16  ;;  %1306 = vrot.lane.b32.xlu1 %v6837_v20, %s3802_s15 }
 0xabb   :  { %v3261_v40 = vpop.permute.xlu2 %3260 }
 0xabc   :  { %3307 = vst.msk [vmem:[#allocation3 + $0x8] sm:$0xff] %vm623_vm12, %v3261_v40 }
 0xac1   :  { %3284 = vrot.lane.b32.xlu2 %v3239_v57, %s3800_s2  ;;  %3282 = vrot.lane.b32.xlu1 %v3238_v25, %s3800_s2  ;;  %v6842_v25 = vld [vmem:[#allocation8_spill] sm:$0xff] }
 0xac3   :  { %v2274_v12 = vpop.permute.xlu2 %2273  ;;  %v3323_v42 = vld [vmem:[#allocation3 + $0x8] sm:$0xff] }
 0xac4   :  { %2319 = vst.msk [vmem:[#allocation3 + $0x10] sm:$0xff] %vm557_vm11, %v2274_v12 }
 0xac9   :  { %2297 = vrot.lane.b32.xlu2 %v6838_v32, %s3803_s16  ;;  %1310 = vrot.lane.b32.xlu1 %v6840_v52, %s3802_s15 }
 0xacb   :  { %v3265_v54 = vpop.permute.xlu2 %3264 }
 0xad1   :  { %3288 = vrot.lane.b32.xlu2 %v3241_v5, %s3800_s2  ;;  %3286 = vrot.lane.b32.xlu1 %v3240_v46, %s3800_s2 }
 0xad3   :  { %v2278_v61 = vpop.permute.xlu2 %2277  ;;  %v3259_v26 = vpop.permute.xlu1 %3258 }
 0xad4   :  { %2321 = vst.msk [vmem:[#allocation3 + $0x20] sm:$0xff] %vm557_vm11, %v2278_v61 }
 0xad5   :  { %3306 = vst.msk [vmem:[#allocation3] sm:$0xff] %vm623_vm12, %v3259_v26 }
 0xad9   :  { %523 = vrot.lane.b32.xlu2 %v4089_v39, %s3802_s15  ;;  %457 = vrot.lane.b32.xlu1 %v4117_v59, %s3801_s3 }
 0xadb   :  { %v3269_v6 = vpop.permute.xlu2 %3268  ;;  %v1287_v17 = vpop.permute.xlu1 %1286 }
 0xadc   :  { %1331 = vst.msk [vmem:[#allocation3 + $0x18] sm:$0xff] %vm492_vm9, %v1287_v17  ;;  %v3322_v0 = vld [vmem:[#allocation3] sm:$0xff] }
 0xadd   :  { %2320 = vst.msk [vmem:[#allocation3 + $0x18] sm:$0xff] %vm557_vm11, %v6119_v37  ;;  %v3338_v47 = vpack.c.bf16 %v3323_v42, %v3322_v0 }
 0xade   :  { %3309 = vst.msk [vmem:[#allocation3 + $0x18] sm:$0xff] %vm623_vm12, %v3265_v54 }
 0xadf   :  { %3747 = vmatmul.msk.bf16.vlgmr.msrb.gmra.mxu1 %vm168_vm1, %v3338_v47 }
 0xae1   :  { %786 = vrot.lane.b32.xlu2 %v4093_v48, %s3806_s19  ;;  %770 = vrot.lane.b32.xlu1 %v4072_v29, %s3806_s19 }
 0xae3   :  { %v2282_v39 = vpop.permute.xlu2 %2281  ;;  %v3263_v59 = vpop.permute.xlu1 %3262 }
 0xae4   :  { %2323 = vst.msk [vmem:[#allocation3 + $0x30] sm:$0xff] %vm557_vm11, %v2282_v39 }
 0xae5   :  { %3308 = vst.msk [vmem:[#allocation3 + $0x10] sm:$0xff] %vm623_vm12, %v3263_v59  ;;  %v3325_v9 = vld [vmem:[#allocation3 + $0x18] sm:$0xff] }
 0xae9   :  { %900 = vrot.lane.b32.xlu2 %v4072_v29, %s3807_s20  ;;  %851 = vrot.lane.b32.xlu1 %v4093_v48, %s3805_s18 }
 0xaeb   :  { %v3273_v37 = vpop.permute.xlu2 %3272  ;;  %v1291_v45 = vpop.permute.xlu1 %1290 }
 0xaec   :  { %1333 = vst.msk [vmem:[#allocation3 + $0x28] sm:$0xff] %vm492_vm9, %v1291_v45  ;;  %v3324_v27 = vld [vmem:[#allocation3 + $0x10] sm:$0xff] }
 0xaed   :  { %2322 = vst.msk [vmem:[#allocation3 + $0x28] sm:$0xff] %vm557_vm11, %v6130_v23  ;;  %v3339_v51 = vpack.c.bf16 %v3325_v9, %v3324_v27 }
 0xaee   :  { %3311 = vst.msk [vmem:[#allocation3 + $0x28] sm:$0xff] %vm623_vm12, %v3269_v6 }
 0xaef   :  { %3748 = vmatmul.msk.bf16.gmra.mxu1 %vm168_vm1, %v3339_v51 }
 0xaf1   :  { %1454 = vrot.lane.b32.xlu2 %v6841_v30, %s3809_s30  ;;  %1438 = vrot.lane.b32.xlu1 %v6816_v56, %s3809_s30 }
 0xaf3   :  { %v2286_v29 = vpop.permute.xlu2 %2285  ;;  %v3267_v48 = vpop.permute.xlu1 %3266 }
 0xaf4   :  { %2325 = vst.msk [vmem:[#allocation3 + $0x40] sm:$0xff] %vm557_vm11, %v2286_v29 }
 0xaf5   :  { %3310 = vst.msk [vmem:[#allocation3 + $0x20] sm:$0xff] %vm623_vm12, %v3267_v48  ;;  %v3327_v3 = vld [vmem:[#allocation3 + $0x28] sm:$0xff] }
 0xaf9   :  { %1760 = vrot.lane.b32.xlu2 %v6818_v8, %s3804_s17  ;;  %1518 = vrot.lane.b32.xlu1 %v6841_v30, %s3801_s3 }
 0xafb   :  { %v3277_v23 = vpop.permute.xlu2 %3276  ;;  %v1295_v33 = vpop.permute.xlu1 %1294 }
 0xafc   :  { %1335 = vst.msk [vmem:[#allocation3 + $0x38] sm:$0xff] %vm492_vm9, %v1295_v33  ;;  %v3326_v38 = vld [vmem:[#allocation3 + $0x20] sm:$0xff] }
 0xafd   :  { %2324 = vst.msk [vmem:[#allocation3 + $0x38] sm:$0xff] %vm557_vm11, %v6142_v4  ;;  %v3340_v56 = vpack.c.bf16 %v3327_v3, %v3326_v38 }
 0xafe   :  { %3313 = vst.msk [vmem:[#allocation3 + $0x38] sm:$0xff] %vm623_vm12, %v3273_v37 }
 0xaff   :  { %3749 = vmatmul.msk.bf16.gmra.mxu1 %vm168_vm1, %v3340_v56 }
 0xb01   :  { %1840 = vrot.lane.b32.xlu2 %v6817_v60, %s3806_s19  ;;  %1824 = vrot.lane.b32.xlu1 %v6818_v8, %s3806_s19 }
 0xb03   :  { %v2290_v2 = vpop.permute.xlu2 %2289  ;;  %v3271_v18 = vpop.permute.xlu1 %3270 }
 0xb04   :  { %2327 = vst.msk [vmem:[#allocation3 + $0x50] sm:$0xff] %vm557_vm11, %v2290_v2 }
 0xb05   :  { %3312 = vst.msk [vmem:[#allocation3 + $0x30] sm:$0xff] %vm623_vm12, %v3271_v18  ;;  %v3329_v58 = vld [vmem:[#allocation3 + $0x38] sm:$0xff] }
 0xb09   :  { %2427 = vrot.lane.b32.xlu2 %v5714_v19, %s3810_s27  ;;  %1904 = vrot.lane.b32.xlu1 %v6817_v60, %s3805_s18 }
 0xb0b   :  { %v3281_v4 = vpop.permute.xlu2 %3280  ;;  %v1299_v28 = vpop.permute.xlu1 %1298 }
 0xb0c   :  { %1337 = vst.msk [vmem:[#allocation3 + $0x48] sm:$0xff] %vm492_vm9, %v1299_v28  ;;  %v3328_v36 = vld [vmem:[#allocation3 + $0x30] sm:$0xff] }
 0xb0d   :  { %2326 = vst.msk [vmem:[#allocation3 + $0x48] sm:$0xff] %vm557_vm11, %v6153_v11  ;;  %v3341_v8 = vpack.c.bf16 %v3329_v58, %v3328_v36 }
 0xb0e   :  { %3315 = vst.msk [vmem:[#allocation3 + $0x48] sm:$0xff] %vm623_vm12, %v3277_v23 }
 0xb0f   :  { %3750 = vmatmul.msk.bf16.gmra.mxu1 %vm168_vm1, %v3341_v8 }
 0xb11   :  { %2765 = vrot.lane.b32.xlu2 %v5584_v24, %s3800_s2  ;;  %2749 = vrot.lane.b32.xlu1 %v5555_v44, %s3800_s2 }
 0xb13   :  { %v2294_v60 = vpop.permute.xlu2 %2293  ;;  %v3275_v43 = vpop.permute.xlu1 %3274 }
 0xb14   :  { %2329 = vst.msk [vmem:[#allocation3 + $0x60] sm:$0xff] %vm557_vm11, %v2294_v60 }
 0xb15   :  { %3314 = vst.msk [vmem:[#allocation3 + $0x40] sm:$0xff] %vm623_vm12, %v3275_v43  ;;  %v3331_v35 = vld [vmem:[#allocation3 + $0x48] sm:$0xff] }
 0xb19   :  { %2813 = vrot.lane.b32.xlu2 %v5555_v44, %s3804_s17  ;;  %2507 = vrot.lane.b32.xlu1 %v5938_v14, %s3809_s30 }
 0xb1b   :  { %v3285_v11 = vpop.permute.xlu2 %3284  ;;  %v1303_v16 = vpop.permute.xlu1 %1302 }
 0xb1c   :  { %1339 = vst.msk [vmem:[#allocation3 + $0x58] sm:$0xff] %vm492_vm9, %v1303_v16  ;;  %v3330_v34 = vld [vmem:[#allocation3 + $0x40] sm:$0xff] }
 0xb1d   :  { %2328 = vst.msk [vmem:[#allocation3 + $0x58] sm:$0xff] %vm557_vm11, %v6164_v63  ;;  %v3342_v55 = vpack.c.bf16 %v3331_v35, %v3330_v34  ;;  %v836_v63 = vpop.permute.xlu0 %835 }
 0xb1e   :  { %3317 = vst.msk [vmem:[#allocation3 + $0x58] sm:$0xff] %vm623_vm12, %v3281_v4 }
 0xb1f   :  { %3751 = vmatmul.msk.bf16.gmra.mxu1 %vm168_vm1, %v3342_v55 }
 0xb21   :  { %2571 = vrot.lane.b32.xlu2 %v5938_v14, %s3801_s3  ;;  %2555 = vrot.lane.b32.xlu1 %v5714_v19, %s3801_s3 }
 0xb23   :  { %v2298_v44 = vpop.permute.xlu2 %2297  ;;  %v3279_v41 = vpop.permute.xlu1 %3278 }
 0xb24   :  { %2331 = vst.msk [vmem:[#allocation3 + $0x70] sm:$0xff] %vm557_vm11, %v2298_v44 }
 0xb25   :  { %3316 = vst.msk [vmem:[#allocation3 + $0x50] sm:$0xff] %vm623_vm12, %v3279_v41  ;;  %v3333_v10 = vld [vmem:[#allocation3 + $0x58] sm:$0xff]  ;;  %v917_v49 = vpop.permute.xlu0 %916 }
 0xb29   :  { %2893 = vrot.lane.b32.xlu1 %v5584_v24, %s3806_s19 }
 0xb2b   :  { %v3289_v53 = vpop.permute.xlu2 %3288  ;;  %v1307_v1 = vpop.permute.xlu1 %1306 }
 0xb2c   :  { %1341 = vst.msk [vmem:[#allocation3 + $0x68] sm:$0xff] %vm492_vm9, %v1307_v1  ;;  %v3332_v13 = vld [vmem:[#allocation3 + $0x50] sm:$0xff] }
 0xb2d   :  { %2330 = vst.msk [vmem:[#allocation3 + $0x68] sm:$0xff] %vm557_vm11, %v6173_v31  ;;  %v3343_v19 = vpack.c.bf16 %v3333_v10, %v3332_v13  ;;  %v1503_v57 = vpop.permute.xlu0 %1502 }
 0xb2e   :  { %3319 = vst.msk [vmem:[#allocation3 + $0x68] sm:$0xff] %vm623_vm12, %v3285_v11 }
 0xb2f   :  { %3752 = vmatmul.msk.bf16.gmra.mxu1 %vm168_vm1, %v3343_v19 }
 0xb33   :  { %v524_v14 = vpop.permute.xlu2 %523  ;;  %v3283_v21 = vpop.permute.xlu1 %3282 }
 0xb34   :  { %3318 = vst.msk [vmem:[#allocation3 + $0x60] sm:$0xff] %vm623_vm12, %v3283_v21 }
 0xb35   :  { %v3335_v20 = vld [vmem:[#allocation3 + $0x68] sm:$0xff]  ;;  %v1777_v32 = vpop.permute.xlu0 %1776 }
 0xb3b   :  { %v787_v24 = vpop.permute.xlu2 %786  ;;  %v1311_v7 = vpop.permute.xlu1 %1310  ;;  %v3334_v50 = vld [vmem:[#allocation3 + $0x60] sm:$0xff] }
 0xb3c   :  { %1343 = vst.msk [vmem:[#allocation3 + $0x78] sm:$0xff] %vm492_vm9, %v1311_v7  ;;  %v3344_v40 = vpack.c.bf16 %v3335_v20, %v3334_v50 }
 0xb3d   :  { %2332 = vst.msk [vmem:[#allocation3 + $0x78] sm:$0xff] %vm557_vm11, %v6842_v25  ;;  %v1889_v61 = vpop.permute.xlu0 %1888 }
 0xb3e   :  { %3321 = vst.msk [vmem:[#allocation3 + $0x78] sm:$0xff] %vm623_vm12, %v3289_v53 }
 0xb3f   :  { %3753 = vmatmul.msk.bf16.gmra.mxu1 %vm168_vm1, %v3344_v40 }
 0xb43   :  { %v901_v31 = vpop.permute.xlu2 %900  ;;  %v3287_v12 = vpop.permute.xlu1 %3286 }
 0xb44   :  { %3320 = vst.msk [vmem:[#allocation3 + $0x70] sm:$0xff] %vm623_vm12, %v3287_v12 }
 0xb45   :  { %v3337_v5 = vld [vmem:[#allocation3 + $0x78] sm:$0xff]  ;;  %v2444_v47 = vpop.permute.xlu0 %2443 }
 0xb4b   :  { %v1455_v15 = vpop.permute.xlu2 %1454  ;;  %v458_v52 = vpop.permute.xlu1 %457  ;;  %v3336_v54 = vld [vmem:[#allocation3 + $0x70] sm:$0xff] }
 0xb4c   :  { %v3345_v46 = vpack.c.bf16 %v3337_v5, %v3336_v54 }
 0xb4d   :  { %v2492_v45 = vpop.permute.xlu0 %2491 }
 0xb4f   :  { %3754 = vmatmul.msk.bf16.gmra.mxu1 %vm168_vm1, %v3345_v46 }
 0xb53   :  { %v1761_v26 = vpop.permute.xlu2 %1760  ;;  %v771_v6 = vpop.permute.xlu1 %770 }
 0xb55   :  { %v2830_v48 = vpop.permute.xlu0 %2829 }
 0xb5b   :  { %v852_v17 = vpop.permute.xlu1 %851  ;;  %v1841_v0 = vpop.permute.xlu2 %1840 }
 0xb5c   :  { %v6461_v42 = vpop.f32.mrf.mxu1 }
 0xb5d   :  { %v2878_v2 = vpop.permute.xlu0 %2877  ;;  %v3429_v35 = vsel %vm92_vm0, %v6461_v42, 0.0 }
 0xb63   :  { %v1439_v39 = vpop.permute.xlu1 %1438  ;;  %v2428_v37 = vpop.permute.xlu2 %2427 }
 0xb64   :  { %v6463_v59 = vpop.f32.mrf.mxu1 }
 0xb65   :  { %v3430_v34 = vsel %vm92_vm0, %v6463_v59, 0.0 }
 0xb66   :  { %v3431_v62 = vadd.f32 %v3430_v34, %v3429_v35 }
 0xb6b   :  { %v1519_v27 = vpop.permute.xlu1 %1518  ;;  %v2766_v29 = vpop.permute.xlu2 %2765 }
 0xb6c   :  { %v6465_v9 = vpop.f32.mrf.mxu1 }
 0xb6d   :  { %v3432_v55 = vsel %vm92_vm0, %v6465_v9, 0.0 }
 0xb6e   :  { %v3433_v41 = vadd.f32 %v3432_v55, %v3431_v62 }
 0xb73   :  { %v1825_v51 = vpop.permute.xlu1 %1824  ;;  %v2814_v38 = vpop.permute.xlu2 %2813 }
 0xb74   :  { %v6467_v30 = vpop.f32.mrf.mxu1 }
 0xb75   :  { %v3434_v44 = vsel %vm92_vm0, %v6467_v30, 0.0 }
 0xb76   :  { %v3435_v1 = vadd.f32 %v3434_v44, %v3433_v41 }
 0xb7b   :  { %v1905_v23 = vpop.permute.xlu1 %1904  ;;  %v2572_v4 = vpop.permute.xlu2 %2571 }
 0xb7c   :  { %v6469_v33 = vpop.f32.mrf.mxu1 }
 0xb7d   :  { %v3436_v53 = vsel %vm92_vm0, %v6469_v33, 0.0 }
 0xb7e   :  { %v3437_v10 = vadd.f32 %v3436_v53, %v3435_v1 }
 0xb83   :  { %v2750_v3 = vpop.permute.xlu1 %2749 }
 0xb84   :  { %v6471_v56 = vpop.f32.mrf.mxu1 }
 0xb85   :  { %v3438_v13 = vsel %vm92_vm0, %v6471_v56, 0.0 }
 0xb86   :  { %v3439_v14 = vadd.f32 %v3438_v13, %v3437_v10 }
 0xb8b   :  { %v2508_v18 = vpop.permute.xlu1 %2507 }
 0xb8c   :  { %v6473_v28 = vpop.f32.mrf.mxu1 }
 0xb8d   :  { %v3440_v19 = vsel %vm92_vm0, %v6473_v28, 0.0 }
 0xb8e   :  { %v3441_v49 = vadd.f32 %v3440_v19, %v3439_v14 }
 0xb93   :  { %v2556_v36 = vpop.permute.xlu1 %2555 }
 0xb94   :  { %v6475_v58 = vpop.f32.mrf.mxu1 }
 0xb95   :  { %v3442_v21 = vsel %vm92_vm0, %v6475_v58, 0.0 }
 0xb96   :  { %v3443_v50 = vadd.f32 %v3442_v21, %v3441_v49 }
 0xb9b   :  { %v2894_v8 = vpop.permute.xlu1 %2893 }
 0xb9c   :  { %v6477_v60 = vpop.f32.mrf.mxu1 }
 0xb9d   :  { %v3444_v7 = vsel %vm92_vm0, %v6477_v60, 0.0 }
 0xb9e   :  { %v3445_v40 = vadd.f32 %v3444_v7, %v3443_v50 }
 0xba4   :  { %v6479_v43 = vpop.f32.mrf.mxu1 }
 0xba5   :  { %v3446_v20 = vsel %vm92_vm0, %v6479_v43, 0.0 }
 0xba6   :  { %v3447_v25 = vadd.f32 %v3446_v20, %v3445_v40 }
 0xbac   :  { %v6481_v11 = vpop.f32.mrf.mxu1 }
 0xbad   :  { %v3448_v57 = vsel %vm92_vm0, %v6481_v11, 0.0 }
 0xbae   :  { %v3449_v12 = vadd.f32 %v3448_v57, %v3447_v25 }
 0xbb4   :  { %v6483_v16 = vpop.f32.mrf.mxu1 }
 0xbb5   :  { %v3450_v31 = vsel %vm92_vm0, %v6483_v16, 0.0 }
 0xbb6   :  { %v3451_v52 = vadd.f32 %v3450_v31, %v3449_v12 }
 0xbbc   :  { %v6493_v63 = vpop.f32.mrf.mxu1 }
 0xbbd   :  { %v3452_v15 = vsel %vm92_vm0, %v6493_v63, 0.0 }
 0xbbe   :  { %v3453_v5 = vadd.f32 %v3452_v15, %v3451_v52 }
 0xbc4   :  { %v6503_v24 = vpop.f32.mrf.mxu1 }
 0xbc5   :  { %v3454_v54 = vsel %vm92_vm0, %v6503_v24, 0.0 }
 0xbc6   :  { %v3455_v61 = vadd.f32 %v3454_v54, %v3453_v5 }
 0xbcc   :  { %v6513_v32 = vpop.f32.mrf.mxu1 }
 0xbcd   :  { %v3456_v46 = vsel %vm92_vm0, %v6513_v32, 0.0 }
 0xbce   :  { %v3457_v26 = vadd.f32 %v3456_v46, %v3455_v61 }
 0xbd4   :  { %v6521_v6 = vpop.f32.mrf.mxu1 }
 0xbd5   :  { %v3458_v17 = vsel %vm92_vm0, %v6521_v6, 0.0 }
 0xbd6   :  { %v3459_v0 = vadd.f32 %v3458_v17, %v3457_v26 }
 0xbd8   :  { %v3460_v47 = vrot.slane %v3459_v0, 4 }
 0xbda   :  { %v3461_v39 = vadd.f32 %v3460_v47, %v3459_v0 }
 0xbdc   :  { %v3462_v37 = vrot.slane %v3461_v39, 2 }
 0xbde   :  { %v3463_v45 = vadd.f32 %v3462_v37, %v3461_v39 }
 0xbe0   :  { %v3464_v27 = vrot.slane %v3463_v45, 1 }
 0xbe2   :  { %v3465_v51 = vadd.f32 %v3464_v27, %v3463_v45 }
 0xbe4   :  { %v6526_v29 = vmul.f32 %v3465_v51, %v3998_v22 }
 0xbe6   :  { %v3467_v48 = vsub.f32 %v6461_v42, %v6526_v29  ;;  %v3468_v23 = vsub.f32 %v6463_v59, %v6526_v29  ;;  %v3469_v38 = vsub.f32 %v6465_v9, %v6526_v29  ;;  %v3470_v3 = vsub.f32 %v6467_v30, %v6526_v29 }
 0xbe7   :  { %v3471_v4 = vsub.f32 %v6469_v33, %v6526_v29  ;;  %v3472_v8 = vsub.f32 %v6471_v56, %v6526_v29  ;;  %v3473_v44 = vsub.f32 %v6473_v28, %v6526_v29  ;;  %v3474_v13 = vsub.f32 %v6475_v58, %v6526_v29 }
 0xbe8   :  { %v3483_v2 = vmul.f32 %v3467_v48, %v3467_v48  ;;  %v3484_v18 = vmul.f32 %v3468_v23, %v3468_v23  ;;  %v3485_v36 = vmul.f32 %v3469_v38, %v3469_v38  ;;  %v3486_v34 = vmul.f32 %v3470_v3, %v3470_v3 }
 0xbe9   :  { %v3487_v41 = vmul.f32 %v3471_v4, %v3471_v4  ;;  %v3488_v10 = vmul.f32 %v3472_v8, %v3472_v8  ;;  %v3475_v21 = vsub.f32 %v6477_v60, %v6526_v29  ;;  %v3489_v49 = vmul.f32 %v3473_v44, %v3473_v44 }
 0xbea   :  { %v3499_v35 = vsel %vm92_vm0, %v3483_v2, 0.0  ;;  %v3500_v55 = vsel %vm92_vm0, %v3484_v18, 0.0  ;;  %v3502_v53 = vsel %vm92_vm0, %v3485_v36, 0.0  ;;  %v3504_v19 = vsel %vm92_vm0, %v3486_v34, 0.0 }
 0xbeb   :  { %v3501_v62 = vadd.f32 %v3500_v55, %v3499_v35  ;;  %v3506_v7 = vsel %vm92_vm0, %v3487_v41, 0.0  ;;  %v3476_v20 = vsub.f32 %v6479_v43, %v6526_v29  ;;  %v3490_v40 = vmul.f32 %v3474_v13, %v3474_v13 }
 0xbec   :  { %v3508_v57 = vsel %vm92_vm0, %v3488_v10, 0.0  ;;  %v3477_v31 = vsub.f32 %v6481_v11, %v6526_v29  ;;  %v3491_v12 = vmul.f32 %v3475_v21, %v3475_v21  ;;  %v3510_v15 = vsel %vm92_vm0, %v3489_v49, 0.0 }
 0xbed   :  { %v3503_v1 = vadd.f32 %v3502_v53, %v3501_v62  ;;  %v3478_v54 = vsub.f32 %v6483_v16, %v6526_v29  ;;  %v3492_v5 = vmul.f32 %v3476_v20, %v3476_v20  ;;  %v3512_v46 = vsel %vm92_vm0, %v3490_v40, 0.0 }
 0xbee   :  { %v3479_v26 = vsub.f32 %v6493_v63, %v6526_v29  ;;  %v3493_v17 = vmul.f32 %v3477_v31, %v3477_v31  ;;  %v3514_v0 = vsel %vm92_vm0, %v3491_v12, 0.0  ;;  %v3480_v39 = vsub.f32 %v6503_v24, %v6526_v29  ;;  %v3427_v12 = vld [vmem:[%s6738_s8] sm:$0x1] }
 0xbef   :  { %v3505_v14 = vadd.f32 %v3504_v19, %v3503_v1  ;;  %v3494_v37 = vmul.f32 %v3478_v54, %v3478_v54  ;;  %v3516_v45 = vsel %vm92_vm0, %v3492_v5, 0.0  ;;  %v3481_v51 = vsub.f32 %v6513_v32, %v6526_v29 }
 0xbf0   :  { %v3495_v48 = vmul.f32 %v3479_v26, %v3479_v26  ;;  %v3518_v23 = vsel %vm92_vm0, %v3493_v17, 0.0  ;;  %v3482_v3 = vsub.f32 %v6521_v6, %v6526_v29  ;;  %v3496_v2 = vmul.f32 %v3480_v39, %v3480_v39 }
 0xbf1   :  { %v3507_v50 = vadd.f32 %v3506_v7, %v3505_v14  ;;  %v3520_v18 = vsel %vm92_vm0, %v3494_v37, 0.0  ;;  %v3497_v36 = vmul.f32 %v3481_v51, %v3481_v51 }
 0xbf2   :  { %v3522_v8 = vsel %vm92_vm0, %v3495_v48, 0.0  ;;  %v3498_v35 = vmul.f32 %v3482_v3, %v3482_v3  ;;  %v3524_v55 = vsel %vm92_vm0, %v3496_v2, 0.0  ;;  %v3593_v2 = vld [vmem:[%s6731_s0 + $0x20] sm:$0xff] }
 0xbf3   :  { %v3509_v25 = vadd.f32 %v3508_v57, %v3507_v50  ;;  %v3526_v44 = vsel %vm92_vm0, %v3497_v36, 0.0 }
 0xbf4   :  { %v3528_v53 = vsel %vm92_vm0, %v3498_v35, 0.0  ;;  %v3595_v35 = vld [vmem:[%s6731_s0 + $0x30] sm:$0xff] }
 0xbf5   :  { %v3511_v52 = vadd.f32 %v3510_v15, %v3509_v25 }
 0xbf7   :  { %v3513_v61 = vadd.f32 %v3512_v46, %v3511_v52 }
 0xbf9   :  { %v3515_v47 = vadd.f32 %v3514_v0, %v3513_v61 }
 0xbfb   :  { %v3517_v27 = vadd.f32 %v3516_v45, %v3515_v47 }
 0xbfd   :  { %v3519_v38 = vadd.f32 %v3518_v23, %v3517_v27 }
 0xbff   :  { %v3521_v4 = vadd.f32 %v3520_v18, %v3519_v38 }
 0xc01   :  { %v3523_v34 = vadd.f32 %v3522_v8, %v3521_v4 }
 0xc03   :  { %v3525_v62 = vadd.f32 %v3524_v55, %v3523_v34 }
 0xc05   :  { %v3527_v41 = vadd.f32 %v3526_v44, %v3525_v62 }
 0xc07   :  { %v3529_v1 = vadd.f32 %v3528_v53, %v3527_v41  ;;  %v3596_v41 = vld [vmem:[%s6731_s0 + $0x38] sm:$0xff] }
 0xc09   :  { %v3530_v13 = vrot.slane %v3529_v1, 4 }
 0xc0b   :  { %v3531_v10 = vadd.f32 %v3530_v13, %v3529_v1  ;;  %v3597_v13 = vld [vmem:[%s6731_s0 + $0x40] sm:$0xff] }
 0xc0d   :  { %v3532_v19 = vrot.slane %v3531_v10, 2 }
 0xc0f   :  { %v3533_v14 = vadd.f32 %v3532_v19, %v3531_v10 }
 0xc11   :  { %v3534_v21 = vrot.slane %v3533_v14, 1 }
 0xc13   :  { %v3535_v49 = vadd.f32 %v3534_v21, %v3533_v14 }
 0xc15   :  { %v3536_v7 = vmul.f32 %v3535_v49, %v3998_v22  ;;  %v3428_v22 = vld [vmem:[%s6739_s9] sm:$0x1] }
 0xc17   :  { %v3537_v50 = vadd.f32 1e-05, %v3536_v7 }
 0xc19   :  { %3797 = vrsqrt.f32 %v3537_v50  ;;  %vm3544_vm9 = vweird.f32 %v3537_v50 }
 0xc1f   :  { %v3798_v20 = vpop.eup %3797 }
 0xc20   :  { %v3539_v40 = vmul.f32 %v3798_v20, %v3537_v50  ;;  %vm3545_vm1 = vweird.f32 %v3798_v20  ;;  %v3599_v50 = vld [vmem:[%s6731_s0 + $0x50] sm:$0xff] }
 0xc21   :  { %vm3546_vm11 = vmor %vm3544_vm9, %vm3545_vm1 }
 0xc22   :  { %v3540_v57 = vmul.f32 %v3798_v20, %v3539_v40 }
 0xc24   :  { %v3541_v25 = vmul.f32 0.5, %v3540_v57 }
 0xc26   :  { %v3542_v31 = vsub.f32 1.5, %v3541_v25 }
 0xc28   :  { %v3543_v15 = vmul.f32 %v3798_v20, %v3542_v31  ;;  %v3600_v31 = vld [vmem:[%s6731_s0 + $0x58] sm:$0xff] }
 0xc2a   :  { %v3547_v52 = vsel %vm3546_vm11, %v3798_v20, %v3543_v15 }
 0xc2b   :  { %v3548_v54 = vmul.f32 %v3547_v52, %v3427_v12 }
 0xc2d   :  { %v3549_v5 = vmul.f32 %v3548_v54, %v6526_v29  ;;  %v3552_v61 = vperm.slane %v3548_v54, 0 }
 0xc2f   :  { %v3550_v46 = vsub.f32 %v3428_v22, %v3549_v5  ;;  %v3554_v26 = vmul.f32 %v3552_v61, %v6461_v42  ;;  %v3555_v17 = vmul.f32 %v3552_v61, %v6463_v59  ;;  %v3556_v0 = vmul.f32 %v3552_v61, %v6465_v9  ;;  %v3589_v59 = vld [vmem:[%s6731_s0] sm:$0xff]  ;;  %v3590_v9 = vld [vmem:[%s6731_s0 + $0x8] sm:$0xff] }
 0xc30   :  { %v3557_v39 = vmul.f32 %v3552_v61, %v6467_v30  ;;  %v3558_v37 = vmul.f32 %v3552_v61, %v6469_v33  ;;  %v3559_v51 = vmul.f32 %v3552_v61, %v6471_v56  ;;  %v3591_v30 = vld [vmem:[%s6731_s0 + $0x10] sm:$0xff]  ;;  %v3560_v33 = vmul.f32 %v3552_v61, %v6473_v28  ;;  %v3592_v56 = vld [vmem:[%s6731_s0 + $0x18] sm:$0xff]  ;;  %v3594_v28 = vld [vmem:[%s6731_s0 + $0x28] sm:$0xff] }
 0xc31   :  { %v6587_v47 = vperm.slane %v3550_v46, 0  ;;  %v3561_v23 = vmul.f32 %v3552_v61, %v6475_v58  ;;  %v3562_v38 = vmul.f32 %v3552_v61, %v6477_v60  ;;  %v3563_v34 = vmul.f32 %v3552_v61, %v6479_v43  ;;  %v3602_v46 = vld [vmem:[%s6731_s0 + $0x68] sm:$0xff] }
 0xc32   :  { %v3564_v58 = vmul.f32 %v3552_v61, %v6481_v11  ;;  %v3565_v62 = vmul.f32 %v3552_v61, %v6483_v16  ;;  %v3566_v43 = vmul.f32 %v3552_v61, %v6493_v63  ;;  %v3598_v16 = vld [vmem:[%s6731_s0 + $0x48] sm:$0xff]  ;;  %v3567_v7 = vmul.f32 %v3552_v61, %v6503_v24 }
 0xc33   :  { %v3573_v45 = vadd.f32 %v6587_v47, %v3554_v26  ;;  %v3574_v27 = vadd.f32 %v6587_v47, %v3555_v17  ;;  %v3575_v29 = vadd.f32 %v6587_v47, %v3556_v0  ;;  %v3576_v42 = vadd.f32 %v6587_v47, %v3557_v39  ;;  %v3603_v17 = vld [vmem:[%s6731_s0 + $0x70] sm:$0xff] }
 0xc34   :  { %v3577_v48 = vadd.f32 %v6587_v47, %v3558_v37  ;;  %v3578_v3 = vadd.f32 %v6587_v47, %v3559_v51  ;;  %v3579_v18 = vadd.f32 %v6587_v47, %v3560_v33  ;;  %v3580_v60 = vadd.f32 %v6587_v47, %v3561_v23  ;;  %v3604_v37 = vld [vmem:[%s6731_s0 + $0x78] sm:$0xff] }
 0xc35   :  { %v3605_v4 = vadd.f32 %v3589_v59, %v3573_v45  ;;  %v3606_v36 = vadd.f32 %v3590_v9, %v3574_v27  ;;  %v3607_v8 = vadd.f32 %v3591_v30, %v3575_v29  ;;  %v3608_v55 = vadd.f32 %v3592_v56, %v3576_v42 }
 0xc36   :  { %v3581_v44 = vadd.f32 %v6587_v47, %v3562_v38  ;;  %v3609_v53 = vadd.f32 %v3593_v2, %v3577_v48  ;;  %v3582_v11 = vadd.f32 %v6587_v47, %v3563_v34  ;;  %v3583_v1 = vadd.f32 %v6587_v47, %v3564_v58 }
 0xc37   :  { %v3610_v10 = vadd.f32 %v3594_v28, %v3578_v3  ;;  %v3611_v19 = vadd.f32 %v3595_v35, %v3579_v18  ;;  %v3621_v14 = vmax.f32 %v3605_v4, 0.0  ;;  %v3622_v21 = vmax.f32 %v3606_v36, 0.0 }
 0xc38   :  { %v3623_v49 = vmax.f32 %v3607_v8, 0.0  ;;  %v3584_v63 = vadd.f32 %v6587_v47, %v3565_v62  ;;  %v3612_v20 = vadd.f32 %v3596_v41, %v3580_v60  ;;  %v3624_v40 = vmax.f32 %v3608_v55, 0.0 }
 0xc39   :  { %v3568_v57 = vmul.f32 %v3552_v61, %v6513_v32  ;;  %v3585_v25 = vadd.f32 %v6587_v47, %v3566_v43  ;;  %v3613_v12 = vadd.f32 %v3597_v13, %v3581_v44  ;;  %v3625_v15 = vmax.f32 %v3609_v53, 0.0  ;;  %3637 = vst.msk [vmem:[%s6740_s10] sm:$0xff] %vm92_vm0, %v3621_v14  ;;  %v3601_v32 = vld [vmem:[%s6731_s0 + $0x60] sm:$0xff] }
 0xc3a   :  { %v3569_v24 = vmul.f32 %v3552_v61, %v6521_v6  ;;  %v3586_v52 = vadd.f32 %v6587_v47, %v3567_v7  ;;  %v3614_v54 = vadd.f32 %v3598_v16, %v3582_v11  ;;  %v3626_v22 = vmax.f32 %v3610_v10, 0.0  ;;  %3638 = vst.msk [vmem:[%s6740_s10 + $0x8] sm:$0xff] %vm92_vm0, %v3622_v21 }
 0xc3b   :  { %v3587_v5 = vadd.f32 %v6587_v47, %v3568_v57  ;;  %v3615_v6 = vadd.f32 %v3599_v50, %v3583_v1  ;;  %v3627_v61 = vmax.f32 %v3611_v19, 0.0  ;;  %3639 = vst.msk [vmem:[%s6740_s10 + $0x10] sm:$0xff] %vm92_vm0, %v3623_v49  ;;  %v3616_v0 = vadd.f32 %v3600_v31, %v3584_v63 }
 0xc3c   :  { %v3588_v26 = vadd.f32 %v6587_v47, %v3569_v24  ;;  %v3628_v39 = vmax.f32 %v3612_v20, 0.0  ;;  %3640 = vst.msk [vmem:[%s6740_s10 + $0x18] sm:$0xff] %vm92_vm0, %v3624_v40  ;;  %v3617_v45 = vadd.f32 %v3601_v32, %v3585_v25  ;;  %v3629_v27 = vmax.f32 %v3613_v12, 0.0 }
 0xc3d   :  { %3641 = vst.msk [vmem:[%s6740_s10 + $0x20] sm:$0xff] %vm92_vm0, %v3625_v15  ;;  %v3618_v47 = vadd.f32 %v3602_v46, %v3586_v52  ;;  %v3630_v29 = vmax.f32 %v3614_v54, 0.0  ;;  %v3619_v51 = vadd.f32 %v3603_v17, %v3587_v5  ;;  %v3631_v42 = vmax.f32 %v3615_v6, 0.0 }
 0xc3e   :  { %3642 = vst.msk [vmem:[%s6740_s10 + $0x28] sm:$0xff] %vm92_vm0, %v3626_v22  ;;  %v3620_v59 = vadd.f32 %v3604_v37, %v3588_v26  ;;  %v3632_v9 = vmax.f32 %v3616_v0, 0.0  ;;  %v3633_v30 = vmax.f32 %v3617_v45, 0.0 }
 0xc3f   :  { %3643 = vst.msk [vmem:[%s6740_s10 + $0x30] sm:$0xff] %vm92_vm0, %v3627_v61  ;;  %v3634_v33 = vmax.f32 %v3618_v47, 0.0  ;;  %v3635_v48 = vmax.f32 %v3619_v51, 0.0 }
 0xc40   :  { %3644 = vst.msk [vmem:[%s6740_s10 + $0x38] sm:$0xff] %vm92_vm0, %v3628_v39  ;;  %v3636_v56 = vmax.f32 %v3620_v59, 0.0 }
 0xc41   :  { %3645 = vst.msk [vmem:[%s6740_s10 + $0x40] sm:$0xff] %vm92_vm0, %v3629_v27 }
 0xc42   :  { %3646 = vst.msk [vmem:[%s6740_s10 + $0x48] sm:$0xff] %vm92_vm0, %v3630_v29 }
 0xc43   :  { %3647 = vst.msk [vmem:[%s6740_s10 + $0x50] sm:$0xff] %vm92_vm0, %v3631_v42 }
 0xc44   :  { %3648 = vst.msk [vmem:[%s6740_s10 + $0x58] sm:$0xff] %vm92_vm0, %v3632_v9 }
 0xc45   :  { %3649 = vst.msk [vmem:[%s6740_s10 + $0x60] sm:$0xff] %vm92_vm0, %v3633_v30 }
 0xc46   :  { %3650 = vst.msk [vmem:[%s6740_s10 + $0x68] sm:$0xff] %vm92_vm0, %v3634_v33 }
 0xc47   :  { %3651 = vst.msk [vmem:[%s6740_s10 + $0x70] sm:$0xff] %vm92_vm0, %v3635_v48 }
 0xc48   :  { %3652 = vst.msk [vmem:[%s6740_s10 + $0x78] sm:$0xff] %vm92_vm0, %v3636_v56 }

</bundles_post_ra>
